<compile_context>
chip_gen: v5e
topology: v5e:2x2
jax: 0.10.0
libtpu: 0.0.40
codegen_flags: <defaults>
</compile_context>

<pallas_src>
import jax
import jax.numpy as jnp
from jax.experimental import pallas as pl
from jax.experimental.pallas import tpu as pltpu


# -----------------------------------------------------------------------------
# Pallas kernels (all operands are whole-array VMEM refs; no grid).
# -----------------------------------------------------------------------------

def _matmul_bias_kernel(x_ref, w_ref, b_ref, o_ref):
    # x: (M, K), w: (K, Cout), b: (1, Cout) -> o: (M, Cout)
    z = jnp.dot(x_ref[...], w_ref[...], preferred_element_type=jnp.float32)
    o_ref[...] = (z + b_ref[...]).astype(o_ref.dtype)


def _conv_relu_maxpool_kernel(p_ref, w_ref, b_ref, o_ref):
    # p: (8, Mp, K) -- im2col patches grouped by 2x2x2 pool-window offset.
    # conv+bias+ReLU for each of the 8 offsets, then elementwise max
    # => fused Conv3d(k3,p1) + ReLU + MaxPool3d(kernel=2, stride=2).
    w = w_ref[...]
    b = b_ref[...]
    acc = None
    for p in range(8):
        z = jnp.dot(p_ref[p], w, preferred_element_type=jnp.float32) + b
        z = jnp.maximum(z, 0.0)
        acc = z if acc is None else jnp.maximum(acc, z)
    o_ref[...] = acc.astype(o_ref.dtype)


def _conv_relu_tconv_kernel(p_ref, w1_ref, b1_ref, w2_ref, b2_ref, o_ref):
    # Fused Conv3d(k3,p1)+bias+ReLU chained into ConvTranspose3d(k2,s2)+bias.
    # p: (M, K1), w1: (K1, Cmid), w2: (Cmid, 8*Cout); o: (M, 8*Cout) where the
    # 8 = 2x2x2 output sub-positions (depth-to-space done by the wrapper).
    h = jnp.dot(p_ref[...], w1_ref[...], preferred_element_type=jnp.float32)
    h = jnp.maximum(h + b1_ref[...], 0.0)
    y = jnp.dot(h, w2_ref[...], preferred_element_type=jnp.float32)
    o_ref[...] = (y + b2_ref[...]).astype(o_ref.dtype)


def _vmem_call(kernel, out_shape, *args):
    return pl.pallas_call(
        kernel,
        out_shape=jax.ShapeDtypeStruct(out_shape, jnp.float32),
        in_specs=[pl.BlockSpec(memory_space=pltpu.MemorySpace.VMEM)] * len(args),
        out_specs=pl.BlockSpec(memory_space=pltpu.MemorySpace.VMEM),
    )(*args)


# -----------------------------------------------------------------------------
# Wrapper-side layout helpers (channels-last activations).
# -----------------------------------------------------------------------------

def _im2col_k3(x_cl, pad):
    # x_cl: (N, D, H, W, C). Returns (N, Do, Ho, Wo, 27*C) with K ordered
    # (kd, kh, kw, cin) to match the weight layout from prepare_kernel_params.
    if pad:
        x_cl = jnp.pad(x_cl, ((0, 0), (1, 1), (1, 1), (1, 1), (0, 0)))
    n, dp, hp, wp, c = x_cl.shape
    do, ho, wo = dp - 2, hp - 2, wp - 2
    slabs = [x_cl[:, kd:kd + do, kh:kh + ho, kw:kw + wo, :]
             for kd in range(3) for kh in range(3) for kw in range(3)]
    patches = jnp.stack(slabs, axis=-2)                 # (N, Do, Ho, Wo, 27, C)
    return patches.reshape(n, do, ho, wo, 27 * c)


def _conv3d(x_cl, w_mat, b_row, pad):
    patches = _im2col_k3(x_cl, pad)
    n, do, ho, wo, k = patches.shape
    m = n * do * ho * wo
    cout = w_mat.shape[1]
    out = _vmem_call(_matmul_bias_kernel, (m, cout),
                     patches.reshape(m, k), w_mat, b_row)
    return out.reshape(n, do, ho, wo, cout)


def _encoder_block(x_cl, w_mat, b_row):
    patches = _im2col_k3(x_cl, pad=True)
    n, do, ho, wo, k = patches.shape
    cout = w_mat.shape[1]
    # Group conv-output positions by their 2x2x2 max-pool window offset so the
    # kernel can fuse the pooling reduction (pooled tensor is the only output).
    groups = [patches[:, pd::2, ph::2, pw::2, :].reshape(-1, k)
              for pd in range(2) for ph in range(2) for pw in range(2)]
    grouped = jnp.stack(groups, axis=0)                 # (8, Mp, K)
    mp = grouped.shape[1]
    out = _vmem_call(_conv_relu_maxpool_kernel, (mp, cout), grouped, w_mat, b_row)
    return out.reshape(n, do // 2, ho // 2, wo // 2, cout)


def _decoder_block(x_cl, w1_mat, b1_row, w2_mat, b2_row):
    patches = _im2col_k3(x_cl, pad=True)
    n, do, ho, wo, k = patches.shape
    m = n * do * ho * wo
    cout8 = w2_mat.shape[1]
    cout = cout8 // 8
    y = _vmem_call(_conv_relu_tconv_kernel, (m, cout8),
                   patches.reshape(m, k), w1_mat, b1_row, w2_mat, b2_row)
    # depth-to-space: columns are ordered (i, j, k, cout) over the 2x2x2 block.
    y = y.reshape(n, do, ho, wo, 2, 2, 2, cout)
    y = jnp.transpose(y, (0, 1, 4, 2, 5, 3, 6, 7))
    return y.reshape(n, 2 * do, 2 * ho, 2 * wo, cout)


# -----------------------------------------------------------------------------
# LightUNet forward (Pallas path).
# -----------------------------------------------------------------------------

def lightunet_forward(x_ncdhw, kp):
    """LightUNet.forward with Pallas kernels. x: (N, C, D, H, W)."""
    height = x_ncdhw.shape[3]
    x = jnp.transpose(x_ncdhw, (0, 2, 3, 4, 1))          # channels-last
    if height == 7:
        # F.pad(x, (1,0,1,0,0,0)): W pad (1,0), H pad (1,0).
        x = jnp.pad(x, ((0, 0), (0, 0), (1, 0), (1, 0), (0, 0)))
    x1 = _encoder_block(x, kp['enc1_w'], kp['enc1_b'])
    if height == 14:
        x1 = jnp.pad(x1, ((0, 0), (0, 0), (1, 0), (1, 0), (0, 0)))
    x2 = _encoder_block(x1, kp['enc2_w'], kp['enc2_b'])
    x3 = _decoder_block(x2, kp['dec2_w'], kp['dec2_b'], kp['dec2_tw'], kp['dec2_tb'])
    x3 = jnp.concatenate([x3, x1], axis=-1)
    x4 = _decoder_block(x3, kp['dec1_w'], kp['dec1_b'], kp['dec1_tw'], kp['dec1_tb'])
    if height == 14:
        # TODO(synk): H==14 / H==7 branches mirror the reference code but are
        # not exercised by the demo shapes below.
        x4 = jnp.pad(x4, ((0, 0), (1, 1), (0, 0), (0, 0), (0, 0)))   # D pad (1,1)
        x4 = _conv3d(x4, kp['conv3_w'], kp['conv3_b'], pad=False)
    x4 = jnp.concatenate([x4, x], axis=-1)
    y = _conv3d(x4, kp['conv_w'], kp['conv_b'], pad=True)
    if height == 7:
        y = jnp.pad(y, ((0, 0), (1, 1), (1, 0), (1, 0), (0, 0)))
        y = _conv3d(y, kp['conv2_w'], kp['conv2_b'], pad=False)
    return jnp.transpose(y, (0, 4, 1, 2, 3))             # back to NCDHW


# -----------------------------------------------------------------------------
# Parameters (PyTorch layouts) + one-time conversion to GEMM-ready layouts.
# -----------------------------------------------------------------------------

def init_params(key, c):
    keys = jax.random.split(key, 9)

    def conv_p(k, cout, cin, ks):
        kw, kb = jax.random.split(k)
        bound = 1.0 / float(cin * ks ** 3) ** 0.5
        w = jax.random.uniform(kw, (cout, cin, ks, ks, ks), jnp.float32, -bound, bound)
        b = jax.random.uniform(kb, (cout,), jnp.float32, -bound, bound)
        return w, b

    def tconv_p(k, cin, cout, ks):
        kw, kb = jax.random.split(k)
        bound = 1.0 / float(cout * ks ** 3) ** 0.5
        w = jax.random.uniform(kw, (cin, cout, ks, ks, ks), jnp.float32, -bound, bound)
        b = jax.random.uniform(kb, (cout,), jnp.float32, -bound, bound)
        return w, b

    p = {}
    p['enc1_w'], p['enc1_b'] = conv_p(keys[0], 2 * c, c, 3)
    p['enc2_w'], p['enc2_b'] = conv_p(keys[1], 4 * c, 2 * c, 3)
    p['dec2_w'], p['dec2_b'] = conv_p(keys[2], 2 * c, 4 * c, 3)
    p['dec2_tw'], p['dec2_tb'] = tconv_p(keys[3], 2 * c, 2 * c, 2)
    p['dec1_w'], p['dec1_b'] = conv_p(keys[4], c, 4 * c, 3)
    p['dec1_tw'], p['dec1_tb'] = tconv_p(keys[5], c, c, 2)
    p['conv_w'], p['conv_b'] = conv_p(keys[6], c, 2 * c, 3)
    p['conv2_w'], p['conv2_b'] = conv_p(keys[7], c, c, 3)
    p['conv3_w'], p['conv3_b'] = conv_p(keys[8], c, c, 3)
    return p


def prepare_kernel_params(rp):
    """One-time re-layout of PyTorch-style weights into GEMM matrices."""
    def conv_mat(w):    # (Cout, Cin, 3,3,3) -> (27*Cin, Cout), K = (kd,kh,kw,cin)
        cout, cin = w.shape[0], w.shape[1]
        return jnp.transpose(w, (2, 3, 4, 1, 0)).reshape(27 * cin, cout)

    def tconv_mat(w):   # (Cin, Cout, 2,2,2) -> (Cin, 8*Cout), cols = (i,j,k,cout)
        cin, cout = w.shape[0], w.shape[1]
        return jnp.transpose(w, (0, 2, 3, 4, 1)).reshape(cin, 8 * cout)

    kp = {}
    for name in ('enc1', 'enc2', 'dec2', 'dec1', 'conv', 'conv2', 'conv3'):
        kp[name + '_w'] = conv_mat(rp[name + '_w'])
        kp[name + '_b'] = rp[name + '_b'].reshape(1, -1)
    for name in ('dec2', 'dec1'):
        kp[name + '_tw'] = tconv_mat(rp[name + '_tw'])
        kp[name + '_tb'] = jnp.tile(rp[name + '_tb'], 8).reshape(1, -1)
    return kp


# -----------------------------------------------------------------------------
# Pure-JAX (XLA) reference implementation for the correctness check.
# -----------------------------------------------------------------------------

def _ref_conv3d(x, w, b, padding):
    y = jax.lax.conv_general_dilated(
        x, w, window_strides=(1, 1, 1), padding=[(padding, padding)] * 3,
        dimension_numbers=('NCDHW', 'OIDHW', 'NCDHW'))
    return y + b.reshape(1, -1, 1, 1, 1)


def _ref_tconv3d_k2s2(x, w, b):
    # PyTorch ConvTranspose3d(k=2, s=2, p=0), weight layout (Cin, Cout, 2,2,2).
    w_flip = w[:, :, ::-1, ::-1, ::-1]
    w_oidhw = jnp.transpose(w_flip, (1, 0, 2, 3, 4))
    y = jax.lax.conv_general_dilated(
        x, w_oidhw, window_strides=(1, 1, 1), padding=[(1, 1)] * 3,
        lhs_dilation=(2, 2, 2), dimension_numbers=('NCDHW', 'OIDHW', 'NCDHW'))
    return y + b.reshape(1, -1, 1, 1, 1)


def _ref_maxpool2(x):
    return jax.lax.reduce_window(x, -jnp.inf, jax.lax.max,
                                 (1, 1, 2, 2, 2), (1, 1, 2, 2, 2), 'VALID')


def lightunet_reference(x, rp):
    height = x.shape[3]
    if height == 7:
        x = jnp.pad(x, ((0, 0), (0, 0), (0, 0), (1, 0), (1, 0)))
    x1 = _ref_maxpool2(jax.nn.relu(_ref_conv3d(x, rp['enc1_w'], rp['enc1_b'], 1)))
    if height == 14:
        x1 = jnp.pad(x1, ((0, 0), (0, 0), (0, 0), (1, 0), (1, 0)))
    x2 = _ref_maxpool2(jax.nn.relu(_ref_conv3d(x1, rp['enc2_w'], rp['enc2_b'], 1)))
    x3 = _ref_tconv3d_k2s2(jax.nn.relu(_ref_conv3d(x2, rp['dec2_w'], rp['dec2_b'], 1)),
                           rp['dec2_tw'], rp['dec2_tb'])
    x3 = jnp.concatenate([x3, x1], axis=1)
    x4 = _ref_tconv3d_k2s2(jax.nn.relu(_ref_conv3d(x3, rp['dec1_w'], rp['dec1_b'], 1)),
                           rp['dec1_tw'], rp['dec1_tb'])
    if height == 14:
        x4 = jnp.pad(x4, ((0, 0), (0, 0), (1, 1), (0, 0), (0, 0)))
        x4 = _ref_conv3d(x4, rp['conv3_w'], rp['conv3_b'], 0)
    x4 = jnp.concatenate([x4, x], axis=1)
    y = _ref_conv3d(x4, rp['conv_w'], rp['conv_b'], 1)
    if height == 7:
        y = jnp.pad(y, ((0, 0), (0, 0), (1, 1), (1, 0), (1, 0)))
        y = _ref_conv3d(y, rp['conv2_w'], rp['conv2_b'], 0)
    return y


# -----------------------------------------------------------------------------

if __name__ == "__main__":
    in_channels = 4
    n, d, h, w = 2, 4, 8, 8                       # small shapes; pool twice OK

    root = jax.random.PRNGKey(0)
    k_x, k_p = jax.random.split(root)
    x = jax.random.normal(k_x, (n, in_channels, d, h, w), dtype=jnp.float32)

    raw_params = init_params(k_p, in_channels)
    kernel_params = prepare_kernel_params(raw_params)   # one-time re-layout

    fwd = jax.jit(lightunet_forward)
    out = jax.block_until_ready(fwd(x, kernel_params))

    ref = lightunet_reference(x, raw_params)
    assert out.shape == ref.shape == (n, in_channels, d, h, w), (out.shape, ref.shape)
    max_err = float(jnp.max(jnp.abs(out - ref)))
    scale = float(jnp.max(jnp.abs(ref)))
    # tolerance accommodates MXU pass-precision differences vs XLA convs
    assert max_err <= 1e-2 * max(scale, 1e-3), (max_err, scale)

    print("KERNEL_OK")
</pallas_src>

<mosaic_0001>
module attributes {stable_mosaic.version = 11 : i64} {
  func.func @_conv_relu_maxpool_kernel(%arg0: memref<8x64x108xf32, #tpu.memory_space<vmem>>, %arg1: memref<108x8xf32, #tpu.memory_space<vmem>>, %arg2: memref<1x8xf32, #tpu.memory_space<vmem>>, %arg3: memref<64x8xf32, #tpu.memory_space<vmem>>) attributes {dimension_semantics = [], scalar_prefetch = 0 : i64, scratch_operands = 0 : i64, tpu.core_type = #tpu.core_type<tc>} {
    %c0 = arith.constant 0 : index
    %c0_0 = arith.constant 0 : index
    %0 = vector.load %arg1[%c0, %c0_0] : memref<108x8xf32, #tpu.memory_space<vmem>>, vector<108x8xf32>
    %c0_1 = arith.constant 0 : index
    %c0_2 = arith.constant 0 : index
    %1 = vector.load %arg2[%c0_1, %c0_2] : memref<1x8xf32, #tpu.memory_space<vmem>>, vector<1x8xf32>
    %c0_3 = arith.constant 0 : index
    %c0_4 = arith.constant 0 : index
    %c0_5 = arith.constant 0 : index
    %2 = vector.load %arg0[%c0_3, %c0_4, %c0_5] : memref<8x64x108xf32, #tpu.memory_space<vmem>>, vector<1x64x108xf32>
    %3 = vector.shape_cast %2 : vector<1x64x108xf32> to vector<64x108xf32>
    %cst = arith.constant dense<0.000000e+00> : vector<64x8xf32>
    %4 = tpu.matmul %3, %0, %cst {dimension_numbers = #tpu.dot_dimension_numbers<[1], [0], [0], [1], [0, 0, 1, 1], [], []>} : vector<64x108xf32>, vector<108x8xf32>, vector<64x8xf32> -> vector<64x8xf32>
    %5 = vector.broadcast %1 : vector<1x8xf32> to vector<64x8xf32>
    %6 = arith.addf %4, %5 : vector<64x8xf32>
    %cst_6 = arith.constant 0.000000e+00 : f32
    %7 = vector.broadcast %cst_6 : f32 to vector<64x8xf32>
    %8 = arith.maximumf %6, %7 : vector<64x8xf32>
    %c1 = arith.constant 1 : index
    %c0_7 = arith.constant 0 : index
    %c0_8 = arith.constant 0 : index
    %9 = vector.load %arg0[%c1, %c0_7, %c0_8] : memref<8x64x108xf32, #tpu.memory_space<vmem>>, vector<1x64x108xf32>
    %10 = vector.shape_cast %9 : vector<1x64x108xf32> to vector<64x108xf32>
    %cst_9 = arith.constant dense<0.000000e+00> : vector<64x8xf32>
    %11 = tpu.matmul %10, %0, %cst_9 {dimension_numbers = #tpu.dot_dimension_numbers<[1], [0], [0], [1], [0, 0, 1, 1], [], []>} : vector<64x108xf32>, vector<108x8xf32>, vector<64x8xf32> -> vector<64x8xf32>
    %12 = vector.broadcast %1 : vector<1x8xf32> to vector<64x8xf32>
    %13 = arith.addf %11, %12 : vector<64x8xf32>
    %cst_10 = arith.constant 0.000000e+00 : f32
    %14 = vector.broadcast %cst_10 : f32 to vector<64x8xf32>
    %15 = arith.maximumf %13, %14 : vector<64x8xf32>
    %16 = arith.maximumf %8, %15 : vector<64x8xf32>
    %c2 = arith.constant 2 : index
    %c0_11 = arith.constant 0 : index
    %c0_12 = arith.constant 0 : index
    %17 = vector.load %arg0[%c2, %c0_11, %c0_12] : memref<8x64x108xf32, #tpu.memory_space<vmem>>, vector<1x64x108xf32>
    %18 = vector.shape_cast %17 : vector<1x64x108xf32> to vector<64x108xf32>
    %cst_13 = arith.constant dense<0.000000e+00> : vector<64x8xf32>
    %19 = tpu.matmul %18, %0, %cst_13 {dimension_numbers = #tpu.dot_dimension_numbers<[1], [0], [0], [1], [0, 0, 1, 1], [], []>} : vector<64x108xf32>, vector<108x8xf32>, vector<64x8xf32> -> vector<64x8xf32>
    %20 = vector.broadcast %1 : vector<1x8xf32> to vector<64x8xf32>
    %21 = arith.addf %19, %20 : vector<64x8xf32>
    %cst_14 = arith.constant 0.000000e+00 : f32
    %22 = vector.broadcast %cst_14 : f32 to vector<64x8xf32>
    %23 = arith.maximumf %21, %22 : vector<64x8xf32>
    %24 = arith.maximumf %16, %23 : vector<64x8xf32>
    %c3 = arith.constant 3 : index
    %c0_15 = arith.constant 0 : index
    %c0_16 = arith.constant 0 : index
    %25 = vector.load %arg0[%c3, %c0_15, %c0_16] : memref<8x64x108xf32, #tpu.memory_space<vmem>>, vector<1x64x108xf32>
    %26 = vector.shape_cast %25 : vector<1x64x108xf32> to vector<64x108xf32>
    %cst_17 = arith.constant dense<0.000000e+00> : vector<64x8xf32>
    %27 = tpu.matmul %26, %0, %cst_17 {dimension_numbers = #tpu.dot_dimension_numbers<[1], [0], [0], [1], [0, 0, 1, 1], [], []>} : vector<64x108xf32>, vector<108x8xf32>, vector<64x8xf32> -> vector<64x8xf32>
    %28 = vector.broadcast %1 : vector<1x8xf32> to vector<64x8xf32>
    %29 = arith.addf %27, %28 : vector<64x8xf32>
    %cst_18 = arith.constant 0.000000e+00 : f32
    %30 = vector.broadcast %cst_18 : f32 to vector<64x8xf32>
    %31 = arith.maximumf %29, %30 : vector<64x8xf32>
    %32 = arith.maximumf %24, %31 : vector<64x8xf32>
    %c4 = arith.constant 4 : index
    %c0_19 = arith.constant 0 : index
    %c0_20 = arith.constant 0 : index
    %33 = vector.load %arg0[%c4, %c0_19, %c0_20] : memref<8x64x108xf32, #tpu.memory_space<vmem>>, vector<1x64x108xf32>
    %34 = vector.shape_cast %33 : vector<1x64x108xf32> to vector<64x108xf32>
    %cst_21 = arith.constant dense<0.000000e+00> : vector<64x8xf32>
    %35 = tpu.matmul %34, %0, %cst_21 {dimension_numbers = #tpu.dot_dimension_numbers<[1], [0], [0], [1], [0, 0, 1, 1], [], []>} : vector<64x108xf32>, vector<108x8xf32>, vector<64x8xf32> -> vector<64x8xf32>
    %36 = vector.broadcast %1 : vector<1x8xf32> to vector<64x8xf32>
    %37 = arith.addf %35, %36 : vector<64x8xf32>
    %cst_22 = arith.constant 0.000000e+00 : f32
    %38 = vector.broadcast %cst_22 : f32 to vector<64x8xf32>
    %39 = arith.maximumf %37, %38 : vector<64x8xf32>
    %40 = arith.maximumf %32, %39 : vector<64x8xf32>
    %c5 = arith.constant 5 : index
    %c0_23 = arith.constant 0 : index
    %c0_24 = arith.constant 0 : index
    %41 = vector.load %arg0[%c5, %c0_23, %c0_24] : memref<8x64x108xf32, #tpu.memory_space<vmem>>, vector<1x64x108xf32>
    %42 = vector.shape_cast %41 : vector<1x64x108xf32> to vector<64x108xf32>
    %cst_25 = arith.constant dense<0.000000e+00> : vector<64x8xf32>
    %43 = tpu.matmul %42, %0, %cst_25 {dimension_numbers = #tpu.dot_dimension_numbers<[1], [0], [0], [1], [0, 0, 1, 1], [], []>} : vector<64x108xf32>, vector<108x8xf32>, vector<64x8xf32> -> vector<64x8xf32>
    %44 = vector.broadcast %1 : vector<1x8xf32> to vector<64x8xf32>
    %45 = arith.addf %43, %44 : vector<64x8xf32>
    %cst_26 = arith.constant 0.000000e+00 : f32
    %46 = vector.broadcast %cst_26 : f32 to vector<64x8xf32>
    %47 = arith.maximumf %45, %46 : vector<64x8xf32>
    %48 = arith.maximumf %40, %47 : vector<64x8xf32>
    %c6 = arith.constant 6 : index
    %c0_27 = arith.constant 0 : index
    %c0_28 = arith.constant 0 : index
    %49 = vector.load %arg0[%c6, %c0_27, %c0_28] : memref<8x64x108xf32, #tpu.memory_space<vmem>>, vector<1x64x108xf32>
    %50 = vector.shape_cast %49 : vector<1x64x108xf32> to vector<64x108xf32>
    %cst_29 = arith.constant dense<0.000000e+00> : vector<64x8xf32>
    %51 = tpu.matmul %50, %0, %cst_29 {dimension_numbers = #tpu.dot_dimension_numbers<[1], [0], [0], [1], [0, 0, 1, 1], [], []>} : vector<64x108xf32>, vector<108x8xf32>, vector<64x8xf32> -> vector<64x8xf32>
    %52 = vector.broadcast %1 : vector<1x8xf32> to vector<64x8xf32>
    %53 = arith.addf %51, %52 : vector<64x8xf32>
    %cst_30 = arith.constant 0.000000e+00 : f32
    %54 = vector.broadcast %cst_30 : f32 to vector<64x8xf32>
    %55 = arith.maximumf %53, %54 : vector<64x8xf32>
    %56 = arith.maximumf %48, %55 : vector<64x8xf32>
    %c7 = arith.constant 7 : index
    %c0_31 = arith.constant 0 : index
    %c0_32 = arith.constant 0 : index
    %57 = vector.load %arg0[%c7, %c0_31, %c0_32] : memref<8x64x108xf32, #tpu.memory_space<vmem>>, vector<1x64x108xf32>
    %58 = vector.shape_cast %57 : vector<1x64x108xf32> to vector<64x108xf32>
    %cst_33 = arith.constant dense<0.000000e+00> : vector<64x8xf32>
    %59 = tpu.matmul %58, %0, %cst_33 {dimension_numbers = #tpu.dot_dimension_numbers<[1], [0], [0], [1], [0, 0, 1, 1], [], []>} : vector<64x108xf32>, vector<108x8xf32>, vector<64x8xf32> -> vector<64x8xf32>
    %60 = vector.broadcast %1 : vector<1x8xf32> to vector<64x8xf32>
    %61 = arith.addf %59, %60 : vector<64x8xf32>
    %cst_34 = arith.constant 0.000000e+00 : f32
    %62 = vector.broadcast %cst_34 : f32 to vector<64x8xf32>
    %63 = arith.maximumf %61, %62 : vector<64x8xf32>
    %64 = arith.maximumf %56, %63 : vector<64x8xf32>
    %c0_35 = arith.constant 0 : index
    %c0_36 = arith.constant 0 : index
    %65 = vector.load %arg3[%c0_35, %c0_36] : memref<64x8xf32, #tpu.memory_space<vmem>>, vector<64x8xf32>
    tpu.vector_store %arg3[%c0_35, %c0_36], %64 {strides = array<i32>} : memref<64x8xf32, #tpu.memory_space<vmem>>, vector<64x8xf32>,
    return
  }
}

module attributes {stable_mosaic.version = 11 : i64} {
  func.func @_conv_relu_maxpool_kernel(%arg0: memref<8x8x216xf32, #tpu.memory_space<vmem>>, %arg1: memref<216x16xf32, #tpu.memory_space<vmem>>, %arg2: memref<1x16xf32, #tpu.memory_space<vmem>>, %arg3: memref<8x16xf32, #tpu.memory_space<vmem>>) attributes {dimension_semantics = [], scalar_prefetch = 0 : i64, scratch_operands = 0 : i64, tpu.core_type = #tpu.core_type<tc>} {
    %c0 = arith.constant 0 : index
    %c0_0 = arith.constant 0 : index
    %0 = vector.load %arg1[%c0, %c0_0] : memref<216x16xf32, #tpu.memory_space<vmem>>, vector<216x16xf32>
    %c0_1 = arith.constant 0 : index
    %c0_2 = arith.constant 0 : index
    %1 = vector.load %arg2[%c0_1, %c0_2] : memref<1x16xf32, #tpu.memory_space<vmem>>, vector<1x16xf32>
    %c0_3 = arith.constant 0 : index
    %c0_4 = arith.constant 0 : index
    %c0_5 = arith.constant 0 : index
    %2 = vector.load %arg0[%c0_3, %c0_4, %c0_5] : memref<8x8x216xf32, #tpu.memory_space<vmem>>, vector<1x8x216xf32>
    %3 = vector.shape_cast %2 : vector<1x8x216xf32> to vector<8x216xf32>
    %cst = arith.constant dense<0.000000e+00> : vector<8x16xf32>
    %4 = tpu.matmul %3, %0, %cst {dimension_numbers = #tpu.dot_dimension_numbers<[1], [0], [0], [1], [0, 0, 1, 1], [], []>} : vector<8x216xf32>, vector<216x16xf32>, vector<8x16xf32> -> vector<8x16xf32>
    %5 = vector.broadcast %1 : vector<1x16xf32> to vector<8x16xf32>
    %6 = arith.addf %4, %5 : vector<8x16xf32>
    %cst_6 = arith.constant 0.000000e+00 : f32
    %7 = vector.broadcast %cst_6 : f32 to vector<8x16xf32>
    %8 = arith.maximumf %6, %7 : vector<8x16xf32>
    %c1 = arith.constant 1 : index
    %c0_7 = arith.constant 0 : index
    %c0_8 = arith.constant 0 : index
    %9 = vector.load %arg0[%c1, %c0_7, %c0_8] : memref<8x8x216xf32, #tpu.memory_space<vmem>>, vector<1x8x216xf32>
    %10 = vector.shape_cast %9 : vector<1x8x216xf32> to vector<8x216xf32>
    %cst_9 = arith.constant dense<0.000000e+00> : vector<8x16xf32>
    %11 = tpu.matmul %10, %0, %cst_9 {dimension_numbers = #tpu.dot_dimension_numbers<[1], [0], [0], [1], [0, 0, 1, 1], [], []>} : vector<8x216xf32>, vector<216x16xf32>, vector<8x16xf32> -> vector<8x16xf32>
    %12 = vector.broadcast %1 : vector<1x16xf32> to vector<8x16xf32>
    %13 = arith.addf %11, %12 : vector<8x16xf32>
    %cst_10 = arith.constant 0.000000e+00 : f32
    %14 = vector.broadcast %cst_10 : f32 to vector<8x16xf32>
    %15 = arith.maximumf %13, %14 : vector<8x16xf32>
    %16 = arith.maximumf %8, %15 : vector<8x16xf32>
    %c2 = arith.constant 2 : index
    %c0_11 = arith.constant 0 : index
    %c0_12 = arith.constant 0 : index
    %17 = vector.load %arg0[%c2, %c0_11, %c0_12] : memref<8x8x216xf32, #tpu.memory_space<vmem>>, vector<1x8x216xf32>
    %18 = vector.shape_cast %17 : vector<1x8x216xf32> to vector<8x216xf32>
    %cst_13 = arith.constant dense<0.000000e+00> : vector<8x16xf32>
    %19 = tpu.matmul %18, %0, %cst_13 {dimension_numbers = #tpu.dot_dimension_numbers<[1], [0], [0], [1], [0, 0, 1, 1], [], []>} : vector<8x216xf32>, vector<216x16xf32>, vector<8x16xf32> -> vector<8x16xf32>
    %20 = vector.broadcast %1 : vector<1x16xf32> to vector<8x16xf32>
    %21 = arith.addf %19, %20 : vector<8x16xf32>
    %cst_14 = arith.constant 0.000000e+00 : f32
    %22 = vector.broadcast %cst_14 : f32 to vector<8x16xf32>
    %23 = arith.maximumf %21, %22 : vector<8x16xf32>
    %24 = arith.maximumf %16, %23 : vector<8x16xf32>
    %c3 = arith.constant 3 : index
    %c0_15 = arith.constant 0 : index
    %c0_16 = arith.constant 0 : index
    %25 = vector.load %arg0[%c3, %c0_15, %c0_16] : memref<8x8x216xf32, #tpu.memory_space<vmem>>, vector<1x8x216xf32>
    %26 = vector.shape_cast %25 : vector<1x8x216xf32> to vector<8x216xf32>
    %cst_17 = arith.constant dense<0.000000e+00> : vector<8x16xf32>
    %27 = tpu.matmul %26, %0, %cst_17 {dimension_numbers = #tpu.dot_dimension_numbers<[1], [0], [0], [1], [0, 0, 1, 1], [], []>} : vector<8x216xf32>, vector<216x16xf32>, vector<8x16xf32> -> vector<8x16xf32>
    %28 = vector.broadcast %1 : vector<1x16xf32> to vector<8x16xf32>
    %29 = arith.addf %27, %28 : vector<8x16xf32>
    %cst_18 = arith.constant 0.000000e+00 : f32
    %30 = vector.broadcast %cst_18 : f32 to vector<8x16xf32>
    %31 = arith.maximumf %29, %30 : vector<8x16xf32>
    %32 = arith.maximumf %24, %31 : vector<8x16xf32>
    %c4 = arith.constant 4 : index
    %c0_19 = arith.constant 0 : index
    %c0_20 = arith.constant 0 : index
    %33 = vector.load %arg0[%c4, %c0_19, %c0_20] : memref<8x8x216xf32, #tpu.memory_space<vmem>>, vector<1x8x216xf32>
    %34 = vector.shape_cast %33 : vector<1x8x216xf32> to vector<8x216xf32>
    %cst_21 = arith.constant dense<0.000000e+00> : vector<8x16xf32>
    %35 = tpu.matmul %34, %0, %cst_21 {dimension_numbers = #tpu.dot_dimension_numbers<[1], [0], [0], [1], [0, 0, 1, 1], [], []>} : vector<8x216xf32>, vector<216x16xf32>, vector<8x16xf32> -> vector<8x16xf32>
    %36 = vector.broadcast %1 : vector<1x16xf32> to vector<8x16xf32>
    %37 = arith.addf %35, %36 : vector<8x16xf32>
    %cst_22 = arith.constant 0.000000e+00 : f32
    %38 = vector.broadcast %cst_22 : f32 to vector<8x16xf32>
    %39 = arith.maximumf %37, %38 : vector<8x16xf32>
    %40 = arith.maximumf %32, %39 : vector<8x16xf32>
    %c5 = arith.constant 5 : index
    %c0_23 = arith.constant 0 : index
    %c0_24 = arith.constant 0 : index
    %41 = vector.load %arg0[%c5, %c0_23, %c0_24] : memref<8x8x216xf32, #tpu.memory_space<vmem>>, vector<1x8x216xf32>
    %42 = vector.shape_cast %41 : vector<1x8x216xf32> to vector<8x216xf32>
    %cst_25 = arith.constant dense<0.000000e+00> : vector<8x16xf32>
    %43 = tpu.matmul %42, %0, %cst_25 {dimension_numbers = #tpu.dot_dimension_numbers<[1], [0], [0], [1], [0, 0, 1, 1], [], []>} : vector<8x216xf32>, vector<216x16xf32>, vector<8x16xf32> -> vector<8x16xf32>
    %44 = vector.broadcast %1 : vector<1x16xf32> to vector<8x16xf32>
    %45 = arith.addf %43, %44 : vector<8x16xf32>
    %cst_26 = arith.constant 0.000000e+00 : f32
    %46 = vector.broadcast %cst_26 : f32 to vector<8x16xf32>
    %47 = arith.maximumf %45, %46 : vector<8x16xf32>
    %48 = arith.maximumf %40, %47 : vector<8x16xf32>
    %c6 = arith.constant 6 : index
    %c0_27 = arith.constant 0 : index
    %c0_28 = arith.constant 0 : index
    %49 = vector.load %arg0[%c6, %c0_27, %c0_28] : memref<8x8x216xf32, #tpu.memory_space<vmem>>, vector<1x8x216xf32>
    %50 = vector.shape_cast %49 : vector<1x8x216xf32> to vector<8x216xf32>
    %cst_29 = arith.constant dense<0.000000e+00> : vector<8x16xf32>
    %51 = tpu.matmul %50, %0, %cst_29 {dimension_numbers = #tpu.dot_dimension_numbers<[1], [0], [0], [1], [0, 0, 1, 1], [], []>} : vector<8x216xf32>, vector<216x16xf32>, vector<8x16xf32> -> vector<8x16xf32>
    %52 = vector.broadcast %1 : vector<1x16xf32> to vector<8x16xf32>
    %53 = arith.addf %51, %52 : vector<8x16xf32>
    %cst_30 = arith.constant 0.000000e+00 : f32
    %54 = vector.broadcast %cst_30 : f32 to vector<8x16xf32>
    %55 = arith.maximumf %53, %54 : vector<8x16xf32>
    %56 = arith.maximumf %48, %55 : vector<8x16xf32>
    %c7 = arith.constant 7 : index
    %c0_31 = arith.constant 0 : index
    %c0_32 = arith.constant 0 : index
    %57 = vector.load %arg0[%c7, %c0_31, %c0_32] : memref<8x8x216xf32, #tpu.memory_space<vmem>>, vector<1x8x216xf32>
    %58 = vector.shape_cast %57 : vector<1x8x216xf32> to vector<8x216xf32>
    %cst_33 = arith.constant dense<0.000000e+00> : vector<8x16xf32>
    %59 = tpu.matmul %58, %0, %cst_33 {dimension_numbers = #tpu.dot_dimension_numbers<[1], [0], [0], [1], [0, 0, 1, 1], [], []>} : vector<8x216xf32>, vector<216x16xf32>, vector<8x16xf32> -> vector<8x16xf32>
    %60 = vector.broadcast %1 : vector<1x16xf32> to vector<8x16xf32>
    %61 = arith.addf %59, %60 : vector<8x16xf32>
    %cst_34 = arith.constant 0.000000e+00 : f32
    %62 = vector.broadcast %cst_34 : f32 to vector<8x16xf32>
    %63 = arith.maximumf %61, %62 : vector<8x16xf32>
    %64 = arith.maximumf %56, %63 : vector<8x16xf32>
    %c0_35 = arith.constant 0 : index
    %c0_36 = arith.constant 0 : index
    %65 = vector.load %arg3[%c0_35, %c0_36] : memref<8x16xf32, #tpu.memory_space<vmem>>, vector<8x16xf32>
    tpu.vector_store %arg3[%c0_35, %c0_36], %64 {strides = array<i32>} : memref<8x16xf32, #tpu.memory_space<vmem>>, vector<8x16xf32>,
    return
  }
}

module attributes {stable_mosaic.version = 11 : i64} {
  func.func @_conv_relu_tconv_kernel(%arg0: memref<8x432xf32, #tpu.memory_space<vmem>>, %arg1: memref<432x8xf32, #tpu.memory_space<vmem>>, %arg2: memref<1x8xf32, #tpu.memory_space<vmem>>, %arg3: memref<8x64xf32, #tpu.memory_space<vmem>>, %arg4: memref<1x64xf32, #tpu.memory_space<vmem>>, %arg5: memref<8x64xf32, #tpu.memory_space<vmem>>) attributes {dimension_semantics = [], scalar_prefetch = 0 : i64, scratch_operands = 0 : i64, tpu.core_type = #tpu.core_type<tc>} {
    %c0 = arith.constant 0 : index
    %c0_0 = arith.constant 0 : index
    %0 = vector.load %arg0[%c0, %c0_0] : memref<8x432xf32, #tpu.memory_space<vmem>>, vector<8x432xf32>
    %c0_1 = arith.constant 0 : index
    %c0_2 = arith.constant 0 : index
    %1 = vector.load %arg1[%c0_1, %c0_2] : memref<432x8xf32, #tpu.memory_space<vmem>>, vector<432x8xf32>
    %cst = arith.constant dense<0.000000e+00> : vector<8x8xf32>
    %2 = tpu.matmul %0, %1, %cst {dimension_numbers = #tpu.dot_dimension_numbers<[1], [0], [0], [1], [0, 0, 1, 1], [], []>} : vector<8x432xf32>, vector<432x8xf32>, vector<8x8xf32> -> vector<8x8xf32>
    %c0_3 = arith.constant 0 : index
    %c0_4 = arith.constant 0 : index
    %3 = vector.load %arg2[%c0_3, %c0_4] : memref<1x8xf32, #tpu.memory_space<vmem>>, vector<1x8xf32>
    %4 = vector.broadcast %3 : vector<1x8xf32> to vector<8x8xf32>
    %5 = arith.addf %2, %4 : vector<8x8xf32>
    %cst_5 = arith.constant 0.000000e+00 : f32
    %6 = vector.broadcast %cst_5 : f32 to vector<8x8xf32>
    %7 = arith.maximumf %5, %6 : vector<8x8xf32>
    %c0_6 = arith.constant 0 : index
    %c0_7 = arith.constant 0 : index
    %8 = vector.load %arg3[%c0_6, %c0_7] : memref<8x64xf32, #tpu.memory_space<vmem>>, vector<8x64xf32>
    %cst_8 = arith.constant dense<0.000000e+00> : vector<8x64xf32>
    %9 = tpu.matmul %7, %8, %cst_8 {dimension_numbers = #tpu.dot_dimension_numbers<[1], [0], [0], [1], [0, 0, 1, 1], [], []>} : vector<8x8xf32>, vector<8x64xf32>, vector<8x64xf32> -> vector<8x64xf32>
    %c0_9 = arith.constant 0 : index
    %c0_10 = arith.constant 0 : index
    %10 = vector.load %arg4[%c0_9, %c0_10] : memref<1x64xf32, #tpu.memory_space<vmem>>, vector<1x64xf32>
    %11 = vector.broadcast %10 : vector<1x64xf32> to vector<8x64xf32>
    %12 = arith.addf %9, %11 : vector<8x64xf32>
    %c0_11 = arith.constant 0 : index
    %c0_12 = arith.constant 0 : index
    %13 = vector.load %arg5[%c0_11, %c0_12] : memref<8x64xf32, #tpu.memory_space<vmem>>, vector<8x64xf32>
    tpu.vector_store %arg5[%c0_11, %c0_12], %12 {strides = array<i32>} : memref<8x64xf32, #tpu.memory_space<vmem>>, vector<8x64xf32>,
    return
  }
}

module attributes {stable_mosaic.version = 11 : i64} {
  func.func @_conv_relu_tconv_kernel(%arg0: memref<64x432xf32, #tpu.memory_space<vmem>>, %arg1: memref<432x4xf32, #tpu.memory_space<vmem>>, %arg2: memref<1x4xf32, #tpu.memory_space<vmem>>, %arg3: memref<4x32xf32, #tpu.memory_space<vmem>>, %arg4: memref<1x32xf32, #tpu.memory_space<vmem>>, %arg5: memref<64x32xf32, #tpu.memory_space<vmem>>) attributes {dimension_semantics = [], scalar_prefetch = 0 : i64, scratch_operands = 0 : i64, tpu.core_type = #tpu.core_type<tc>} {
    %c0 = arith.constant 0 : index
    %c0_0 = arith.constant 0 : index
    %0 = vector.load %arg0[%c0, %c0_0] : memref<64x432xf32, #tpu.memory_space<vmem>>, vector<64x432xf32>
    %c0_1 = arith.constant 0 : index
    %c0_2 = arith.constant 0 : index
    %1 = vector.load %arg1[%c0_1, %c0_2] : memref<432x4xf32, #tpu.memory_space<vmem>>, vector<432x4xf32>
    %cst = arith.constant dense<0.000000e+00> : vector<64x4xf32>
    %2 = tpu.matmul %0, %1, %cst {dimension_numbers = #tpu.dot_dimension_numbers<[1], [0], [0], [1], [0, 0, 1, 1], [], []>} : vector<64x432xf32>, vector<432x4xf32>, vector<64x4xf32> -> vector<64x4xf32>
    %c0_3 = arith.constant 0 : index
    %c0_4 = arith.constant 0 : index
    %3 = vector.load %arg2[%c0_3, %c0_4] : memref<1x4xf32, #tpu.memory_space<vmem>>, vector<1x4xf32>
    %4 = vector.broadcast %3 : vector<1x4xf32> to vector<64x4xf32>
    %5 = arith.addf %2, %4 : vector<64x4xf32>
    %cst_5 = arith.constant 0.000000e+00 : f32
    %6 = vector.broadcast %cst_5 : f32 to vector<64x4xf32>
    %7 = arith.maximumf %5, %6 : vector<64x4xf32>
    %c0_6 = arith.constant 0 : index
    %c0_7 = arith.constant 0 : index
    %8 = vector.load %arg3[%c0_6, %c0_7] : memref<4x32xf32, #tpu.memory_space<vmem>>, vector<4x32xf32>
    %cst_8 = arith.constant dense<0.000000e+00> : vector<64x32xf32>
    %9 = tpu.matmul %7, %8, %cst_8 {dimension_numbers = #tpu.dot_dimension_numbers<[1], [0], [0], [1], [0, 0, 1, 1], [], []>} : vector<64x4xf32>, vector<4x32xf32>, vector<64x32xf32> -> vector<64x32xf32>
    %c0_9 = arith.constant 0 : index
    %c0_10 = arith.constant 0 : index
    %10 = vector.load %arg4[%c0_9, %c0_10] : memref<1x32xf32, #tpu.memory_space<vmem>>, vector<1x32xf32>
    %11 = vector.broadcast %10 : vector<1x32xf32> to vector<64x32xf32>
    %12 = arith.addf %9, %11 : vector<64x32xf32>
    %c0_11 = arith.constant 0 : index
    %c0_12 = arith.constant 0 : index
    %13 = vector.load %arg5[%c0_11, %c0_12] : memref<64x32xf32, #tpu.memory_space<vmem>>, vector<64x32xf32>
    tpu.vector_store %arg5[%c0_11, %c0_12], %12 {strides = array<i32>} : memref<64x32xf32, #tpu.memory_space<vmem>>, vector<64x32xf32>,
    return
  }
}

module attributes {stable_mosaic.version = 11 : i64} {
  func.func @_matmul_bias_kernel(%arg0: memref<512x216xf32, #tpu.memory_space<vmem>>, %arg1: memref<216x4xf32, #tpu.memory_space<vmem>>, %arg2: memref<1x4xf32, #tpu.memory_space<vmem>>, %arg3: memref<512x4xf32, #tpu.memory_space<vmem>>) attributes {dimension_semantics = [], scalar_prefetch = 0 : i64, scratch_operands = 0 : i64, tpu.core_type = #tpu.core_type<tc>} {
    %c0 = arith.constant 0 : index
    %c0_0 = arith.constant 0 : index
    %0 = vector.load %arg0[%c0, %c0_0] : memref<512x216xf32, #tpu.memory_space<vmem>>, vector<512x216xf32>
    %c0_1 = arith.constant 0 : index
    %c0_2 = arith.constant 0 : index
    %1 = vector.load %arg1[%c0_1, %c0_2] : memref<216x4xf32, #tpu.memory_space<vmem>>, vector<216x4xf32>
    %cst = arith.constant dense<0.000000e+00> : vector<512x4xf32>
    %2 = tpu.matmul %0, %1, %cst {dimension_numbers = #tpu.dot_dimension_numbers<[1], [0], [0], [1], [0, 0, 1, 1], [], []>} : vector<512x216xf32>, vector<216x4xf32>, vector<512x4xf32> -> vector<512x4xf32>
    %c0_3 = arith.constant 0 : index
    %c0_4 = arith.constant 0 : index
    %3 = vector.load %arg2[%c0_3, %c0_4] : memref<1x4xf32, #tpu.memory_space<vmem>>, vector<1x4xf32>
    %4 = vector.broadcast %3 : vector<1x4xf32> to vector<512x4xf32>
    %5 = arith.addf %2, %4 : vector<512x4xf32>
    %c0_5 = arith.constant 0 : index
    %c0_6 = arith.constant 0 : index
    %6 = vector.load %arg3[%c0_5, %c0_6] : memref<512x4xf32, #tpu.memory_space<vmem>>, vector<512x4xf32>
    tpu.vector_store %arg3[%c0_5, %c0_6], %5 {strides = array<i32>} : memref<512x4xf32, #tpu.memory_space<vmem>>, vector<512x4xf32>,
    return
  }
}

</mosaic_0001>

<bundles_post_ra>
// kernel: lightunet_forward.5
= control target key start
LH: loop header
LB: loop body
LE: loop exit
PB: predicated region body
PF: predicated region fallthrough
CT: control target
= control target key end

     0   :  { %vm65_vm0 = vcmask 1043456   ;;  %vm40_vm1 = vcmask 883712   ;;  %vm748_vm2 = vcmask 64512   ;;  %s1517_s1 = inlined_call_operand.vmem [shape: f32[108,8], index: 1, kind: input, shape index: {}]   ;;  %s1518_s0 = inlined_call_operand.vmem [shape: f32[8,64,108], index: 0, kind: input, shape index: {}]   ;;  %s1519_s2 = inlined_call_operand.vmem [shape: f32[1,8], index: 2, kind: input, shape index: {}]   ;;  %s1520_s3 = inlined_call_operand.vmem [shape: f32[64,8], index: 3, kind: output, shape index: {}]  }
   0x1   :  { %v913_v0 = vld [vmem:[%s1517_s1 + $0x68] sm:$0xf]  ;;  %v918_v1 = vld [vmem:[%s1517_s1 + $0x60] sm:$0xff]  ;;  %v931_v2 = vld [vmem:[%s1517_s1 + $0x58] sm:$0xff] }
   0x2   :  { %761 = vmatpush.msk.msra.mxu0 %vm65_vm0, %v913_v0  ;;  %795 = vmatpush.msk.msra.mxu2 %vm65_vm0, %v913_v0  ;;  %v940_v3 = vld [vmem:[%s1517_s1 + $0x50] sm:$0xff]  ;;  %v949_v4 = vld [vmem:[%s1517_s1 + $0x48] sm:$0xff]  ;;  %v958_v5 = vld [vmem:[%s1517_s1 + $0x40] sm:$0xff] }
   0x3   :  { %778 = vmatpush.msk.msra.mxu1 %vm65_vm0, %v913_v0  ;;  %812 = vmatpush.msk.msra.mxu3 %vm65_vm0, %v913_v0  ;;  %v967_v6 = vld [vmem:[%s1517_s1 + $0x38] sm:$0xff]  ;;  %v976_v7 = vld [vmem:[%s1517_s1 + $0x30] sm:$0xff]  ;;  %v985_v8 = vld [vmem:[%s1517_s1 + $0x28] sm:$0xff] }
   0x4   :  { %72 = vmatpush.msra.mxu0 %v918_v1  ;;  %244 = vmatpush.msra.mxu2 %v918_v1  ;;  %v994_v9 = vld [vmem:[%s1517_s1 + $0x20] sm:$0xff]  ;;  %v1003_v10 = vld [vmem:[%s1517_s1 + $0x18] sm:$0xff]  ;;  %v1012_v11 = vld [vmem:[%s1517_s1 + $0x10] sm:$0xff] }
   0x5   :  { %154 = vmatpush.msra.mxu1 %v918_v1  ;;  %334 = vmatpush.msra.mxu3 %v918_v1  ;;  %v1021_v12 = vld [vmem:[%s1517_s1 + $0x8] sm:$0xff]  ;;  %v1030_v13 = vld [vmem:[%s1517_s1] sm:$0xff]  ;;  %v31_v22 = vld [vmem:[%s1518_s0 + $0x10] sm:$0xff] }
   0x6   :  { %73 = vmatpush.msra.mxu0 %v931_v2  ;;  %245 = vmatpush.msra.mxu2 %v931_v2  ;;  %v29_v14 = vld [vmem:[%s1518_s0] sm:$0xff]  ;;  %v30_v18 = vld [vmem:[%s1518_s0 + $0x8] sm:$0xff]  ;;  %v789_v23 = vld [vmem:[%s1518_s0 + $0x90] sm:$0xff] }
   0x7   :  { %155 = vmatpush.msra.mxu1 %v931_v2  ;;  %335 = vmatpush.msra.mxu3 %v931_v2  ;;  %v787_v15 = vld [vmem:[%s1518_s0 + $0x80] sm:$0xff]  ;;  %v788_v19 = vld [vmem:[%s1518_s0 + $0x88] sm:$0xff]  ;;  %v772_v24 = vld [vmem:[%s1518_s0 + $0x50] sm:$0xff] }
   0x8   :  { %74 = vmatpush.msra.mxu0 %v940_v3  ;;  %246 = vmatpush.msra.mxu2 %v940_v3  ;;  %v770_v16 = vld [vmem:[%s1518_s0 + $0x40] sm:$0xff]  ;;  %v771_v20 = vld [vmem:[%s1518_s0 + $0x48] sm:$0xff]  ;;  %v806_v25 = vld [vmem:[%s1518_s0 + $0xd0] sm:$0xff] }
   0x9   :  { %156 = vmatpush.msra.mxu1 %v940_v3  ;;  %336 = vmatpush.msra.mxu3 %v940_v3  ;;  %v804_v17 = vld [vmem:[%s1518_s0 + $0xc0] sm:$0xff]  ;;  %v805_v21 = vld [vmem:[%s1518_s0 + $0xc8] sm:$0xff]  ;;  %v32_v26 = vld [vmem:[%s1518_s0 + $0x18] sm:$0xff] }
   0xa   :  { %75 = vmatpush.msra.mxu0 %v949_v4  ;;  %247 = vmatpush.msra.mxu2 %v949_v4  ;;  %v790_v27 = vld [vmem:[%s1518_s0 + $0x98] sm:$0xff]  ;;  %v33_v30 = vld [vmem:[%s1518_s0 + $0x20] sm:$0xff]  ;;  %v34_v34 = vld [vmem:[%s1518_s0 + $0x28] sm:$0xff] }
   0xb   :  { %157 = vmatpush.msra.mxu1 %v949_v4  ;;  %337 = vmatpush.msra.mxu3 %v949_v4  ;;  %v773_v28 = vld [vmem:[%s1518_s0 + $0x58] sm:$0xff]  ;;  %v791_v31 = vld [vmem:[%s1518_s0 + $0xa0] sm:$0xff]  ;;  %v792_v35 = vld [vmem:[%s1518_s0 + $0xa8] sm:$0xff] }
   0xc   :  { %76 = vmatpush.msra.mxu0 %v958_v5  ;;  %248 = vmatpush.msra.mxu2 %v958_v5  ;;  %v807_v29 = vld [vmem:[%s1518_s0 + $0xd8] sm:$0xff]  ;;  %v774_v32 = vld [vmem:[%s1518_s0 + $0x60] sm:$0xff]  ;;  %v775_v36 = vld [vmem:[%s1518_s0 + $0x68] sm:$0xff] }
   0xd   :  { %158 = vmatpush.msra.mxu1 %v958_v5  ;;  %338 = vmatpush.msra.mxu3 %v958_v5  ;;  %v808_v33 = vld [vmem:[%s1518_s0 + $0xe0] sm:$0xff]  ;;  %v809_v37 = vld [vmem:[%s1518_s0 + $0xe8] sm:$0xff]  ;;  %v35_v38 = vld [vmem:[%s1518_s0 + $0x30] sm:$0xff] }
   0xe   :  { %77 = vmatpush.msra.mxu0 %v967_v6  ;;  %249 = vmatpush.msra.mxu2 %v967_v6  ;;  %v793_v39 = vld [vmem:[%s1518_s0 + $0xb0] sm:$0xff]  ;;  %v36_v42 = vld [vmem:[%s1518_s0 + $0x38] sm:$0xff]  ;;  %v821_v46 = vld [vmem:[%s1518_s0 + $0x100] sm:$0xff] }
   0xf   :  { %159 = vmatpush.msra.mxu1 %v967_v6  ;;  %339 = vmatpush.msra.mxu3 %v967_v6  ;;  %v776_v40 = vld [vmem:[%s1518_s0 + $0x70] sm:$0xff]  ;;  %v794_v43 = vld [vmem:[%s1518_s0 + $0xb8] sm:$0xff]  ;;  %v855_v47 = vld [vmem:[%s1518_s0 + $0x180] sm:$0xff] }
  0x10   :  { %78 = vmatpush.msra.mxu0 %v976_v7  ;;  %250 = vmatpush.msra.mxu2 %v976_v7  ;;  %v810_v41 = vld [vmem:[%s1518_s0 + $0xf0] sm:$0xff]  ;;  %v777_v44 = vld [vmem:[%s1518_s0 + $0x78] sm:$0xff]  ;;  %v838_v48 = vld [vmem:[%s1518_s0 + $0x140] sm:$0xff] }
  0x11   :  { %160 = vmatpush.msra.mxu1 %v976_v7  ;;  %340 = vmatpush.msra.mxu3 %v976_v7  ;;  %v811_v45 = vld [vmem:[%s1518_s0 + $0xf8] sm:$0xff]  ;;  %v872_v49 = vld [vmem:[%s1518_s0 + $0x1c0] sm:$0xff]  ;;  %v822_v50 = vld [vmem:[%s1518_s0 + $0x108] sm:$0xff] }
  0x12   :  { %79 = vmatpush.msra.mxu0 %v985_v8  ;;  %251 = vmatpush.msra.mxu2 %v985_v8  ;;  %v856_v51 = vld [vmem:[%s1518_s0 + $0x188] sm:$0xff]  ;;  %v823_v54 = vld [vmem:[%s1518_s0 + $0x110] sm:$0xff]  ;;  %v824_v58 = vld [vmem:[%s1518_s0 + $0x118] sm:$0xff] }
  0x13   :  { %161 = vmatpush.msra.mxu1 %v985_v8  ;;  %341 = vmatpush.msra.mxu3 %v985_v8  ;;  %v839_v52 = vld [vmem:[%s1518_s0 + $0x148] sm:$0xff]  ;;  %v857_v55 = vld [vmem:[%s1518_s0 + $0x190] sm:$0xff]  ;;  %v858_v59 = vld [vmem:[%s1518_s0 + $0x198] sm:$0xff] }
  0x14   :  { %80 = vmatpush.msra.mxu0 %v994_v9  ;;  %252 = vmatpush.msra.mxu2 %v994_v9  ;;  %v873_v53 = vld [vmem:[%s1518_s0 + $0x1c8] sm:$0xff]  ;;  %v840_v56 = vld [vmem:[%s1518_s0 + $0x150] sm:$0xff]  ;;  %v841_v60 = vld [vmem:[%s1518_s0 + $0x158] sm:$0xff] }
  0x15   :  { %162 = vmatpush.msra.mxu1 %v994_v9  ;;  %342 = vmatpush.msra.mxu3 %v994_v9  ;;  %v874_v57 = vld [vmem:[%s1518_s0 + $0x1d0] sm:$0xff]  ;;  %v875_v61 = vld [vmem:[%s1518_s0 + $0x1d8] sm:$0xff]  ;;  %v825_v62 = vld [vmem:[%s1518_s0 + $0x120] sm:$0xff] }
  0x16   :  { %81 = vmatpush.msra.mxu0 %v1003_v10  ;;  %253 = vmatpush.msra.mxu2 %v1003_v10  ;;  %v859_v63 = vld [vmem:[%s1518_s0 + $0x1a0] sm:$0xff] }
  0x17   :  { %163 = vmatpush.msra.mxu1 %v1003_v10  ;;  %343 = vmatpush.msra.mxu3 %v1003_v10 }
  0x18   :  { %82 = vmatpush.msra.mxu0 %v1012_v11  ;;  %254 = vmatpush.msra.mxu2 %v1012_v11 }
  0x19   :  { %164 = vmatpush.msra.mxu1 %v1012_v11  ;;  %344 = vmatpush.msra.mxu3 %v1012_v11 }
  0x1a   :  { %83 = vmatpush.msra.mxu0 %v1021_v12  ;;  %255 = vmatpush.msra.mxu2 %v1021_v12 }
  0x1b   :  { %165 = vmatpush.msra.mxu1 %v1021_v12  ;;  %345 = vmatpush.msra.mxu3 %v1021_v12 }
  0x1c   :  { %84 = vmatpush.msra.mxu0 %v1030_v13  ;;  %256 = vmatpush.msra.mxu2 %v1030_v13 }
  0x1d   :  { %762 = vmatmul.msk.f32.vlgmr.msra.gmra.mxu0 %vm40_vm1, %v29_v14  ;;  %796 = vmatmul.msk.f32.vlgmr.msra.gmra.mxu2 %vm40_vm1, %v787_v15 }
  0x1e   :  { %863 = vmatpush.msk.msrb.mxu2 %vm65_vm0, %v913_v0  ;;  %166 = vmatpush.msra.mxu1 %v1030_v13 }
  0x1f   :  { %346 = vmatpush.msra.mxu3 %v1030_v13  ;;  %779 = vmatmul.msk.f32.vlgmr.msra.gmra.mxu1 %vm40_vm1, %v770_v16 }
  0x20   :  { %813 = vmatmul.msk.f32.vlgmr.msra.gmra.mxu3 %vm40_vm1, %v804_v17  ;;  %829 = vmatpush.msk.msrb.mxu0 %vm65_vm0, %v913_v0 }
  0x21   :  { %880 = vmatpush.msk.msrb.mxu3 %vm65_vm0, %v913_v0  ;;  %846 = vmatpush.msk.msrb.mxu1 %vm65_vm0, %v913_v0  ;;  %v842_v0 = vld [vmem:[%s1518_s0 + $0x160] sm:$0xff] }
  0x22   :  { %604 = vmatpush.msrb.mxu2 %v918_v1  ;;  %424 = vmatpush.msrb.mxu0 %v918_v1 }
  0x23   :  { %694 = vmatpush.msrb.mxu3 %v918_v1  ;;  %514 = vmatpush.msrb.mxu1 %v918_v1  ;;  %v876_v1 = vld [vmem:[%s1518_s0 + $0x1e0] sm:$0xff] }
  0x24   :  { %605 = vmatpush.msrb.mxu2 %v931_v2  ;;  %425 = vmatpush.msrb.mxu0 %v931_v2 }
  0x25   :  { %763 = vmatmul.msk.f32.gmra.mxu0 %vm40_vm1, %v30_v18  ;;  %797 = vmatmul.msk.f32.gmra.mxu2 %vm40_vm1, %v788_v19 }
  0x26   :  { %695 = vmatpush.msrb.mxu3 %v931_v2  ;;  %515 = vmatpush.msrb.mxu1 %v931_v2  ;;  %v826_v2 = vld [vmem:[%s1518_s0 + $0x128] sm:$0xff] }
  0x27   :  { %780 = vmatmul.msk.f32.gmra.mxu1 %vm40_vm1, %v771_v20  ;;  %606 = vmatpush.msrb.mxu2 %v940_v3 }
  0x28   :  { %814 = vmatmul.msk.f32.gmra.mxu3 %vm40_vm1, %v805_v21  ;;  %426 = vmatpush.msrb.mxu0 %v940_v3 }
  0x29   :  { %696 = vmatpush.msrb.mxu3 %v940_v3  ;;  %516 = vmatpush.msrb.mxu1 %v940_v3  ;;  %v860_v3 = vld [vmem:[%s1518_s0 + $0x1a8] sm:$0xff] }
  0x2a   :  { %607 = vmatpush.msrb.mxu2 %v949_v4  ;;  %427 = vmatpush.msrb.mxu0 %v949_v4 }
  0x2b   :  { %697 = vmatpush.msrb.mxu3 %v949_v4  ;;  %517 = vmatpush.msrb.mxu1 %v949_v4  ;;  %v843_v4 = vld [vmem:[%s1518_s0 + $0x168] sm:$0xff] }
  0x2c   :  { %608 = vmatpush.msrb.mxu2 %v958_v5  ;;  %428 = vmatpush.msrb.mxu0 %v958_v5 }
  0x2d   :  { %764 = vmatmul.msk.f32.gmra.mxu0 %vm40_vm1, %v31_v22  ;;  %798 = vmatmul.msk.f32.gmra.mxu2 %vm40_vm1, %v789_v23 }
  0x2e   :  { %698 = vmatpush.msrb.mxu3 %v958_v5  ;;  %518 = vmatpush.msrb.mxu1 %v958_v5  ;;  %v877_v5 = vld [vmem:[%s1518_s0 + $0x1e8] sm:$0xff] }
  0x2f   :  { %781 = vmatmul.msk.f32.gmra.mxu1 %vm40_vm1, %v772_v24  ;;  %609 = vmatpush.msrb.mxu2 %v967_v6 }
  0x30   :  { %815 = vmatmul.msk.f32.gmra.mxu3 %vm40_vm1, %v806_v25  ;;  %429 = vmatpush.msrb.mxu0 %v967_v6 }
  0x31   :  { %699 = vmatpush.msrb.mxu3 %v967_v6  ;;  %519 = vmatpush.msrb.mxu1 %v967_v6  ;;  %v827_v6 = vld [vmem:[%s1518_s0 + $0x130] sm:$0xff] }
  0x32   :  { %610 = vmatpush.msrb.mxu2 %v976_v7  ;;  %430 = vmatpush.msrb.mxu0 %v976_v7 }
  0x33   :  { %700 = vmatpush.msrb.mxu3 %v976_v7  ;;  %520 = vmatpush.msrb.mxu1 %v976_v7  ;;  %v861_v7 = vld [vmem:[%s1518_s0 + $0x1b0] sm:$0xff] }
  0x34   :  { %611 = vmatpush.msrb.mxu2 %v985_v8  ;;  %431 = vmatpush.msrb.mxu0 %v985_v8 }
  0x35   :  { %765 = vmatmul.msk.f32.gmra.mxu0 %vm40_vm1, %v32_v26  ;;  %799 = vmatmul.msk.f32.gmra.mxu2 %vm40_vm1, %v790_v27 }
  0x36   :  { %701 = vmatpush.msrb.mxu3 %v985_v8  ;;  %521 = vmatpush.msrb.mxu1 %v985_v8  ;;  %v844_v8 = vld [vmem:[%s1518_s0 + $0x170] sm:$0xff] }
  0x37   :  { %782 = vmatmul.msk.f32.gmra.mxu1 %vm40_vm1, %v773_v28  ;;  %612 = vmatpush.msrb.mxu2 %v994_v9 }
  0x38   :  { %816 = vmatmul.msk.f32.gmra.mxu3 %vm40_vm1, %v807_v29  ;;  %432 = vmatpush.msrb.mxu0 %v994_v9 }
  0x39   :  { %702 = vmatpush.msrb.mxu3 %v994_v9  ;;  %522 = vmatpush.msrb.mxu1 %v994_v9  ;;  %v878_v9 = vld [vmem:[%s1518_s0 + $0x1f0] sm:$0xff] }
  0x3a   :  { %613 = vmatpush.msrb.mxu2 %v1003_v10  ;;  %433 = vmatpush.msrb.mxu0 %v1003_v10 }
  0x3b   :  { %703 = vmatpush.msrb.mxu3 %v1003_v10  ;;  %523 = vmatpush.msrb.mxu1 %v1003_v10  ;;  %v828_v10 = vld [vmem:[%s1518_s0 + $0x138] sm:$0xff] }
  0x3c   :  { %614 = vmatpush.msrb.mxu2 %v1012_v11  ;;  %434 = vmatpush.msrb.mxu0 %v1012_v11 }
  0x3d   :  { %766 = vmatmul.msk.f32.gmra.mxu0 %vm40_vm1, %v33_v30  ;;  %800 = vmatmul.msk.f32.gmra.mxu2 %vm40_vm1, %v791_v31 }
  0x3e   :  { %704 = vmatpush.msrb.mxu3 %v1012_v11  ;;  %524 = vmatpush.msrb.mxu1 %v1012_v11  ;;  %v862_v11 = vld [vmem:[%s1518_s0 + $0x1b8] sm:$0xff] }
  0x3f   :  { %783 = vmatmul.msk.f32.gmra.mxu1 %vm40_vm1, %v774_v32  ;;  %615 = vmatpush.msrb.mxu2 %v1021_v12 }
  0x40   :  { %817 = vmatmul.msk.f32.gmra.mxu3 %vm40_vm1, %v808_v33  ;;  %435 = vmatpush.msrb.mxu0 %v1021_v12 }
  0x41   :  { %705 = vmatpush.msrb.mxu3 %v1021_v12  ;;  %525 = vmatpush.msrb.mxu1 %v1021_v12  ;;  %v845_v12 = vld [vmem:[%s1518_s0 + $0x178] sm:$0xff] }
  0x42   :  { %616 = vmatpush.msrb.mxu2 %v1030_v13  ;;  %436 = vmatpush.msrb.mxu0 %v1030_v13 }
  0x43   :  { %706 = vmatpush.msrb.mxu3 %v1030_v13  ;;  %526 = vmatpush.msrb.mxu1 %v1030_v13  ;;  %v879_v13 = vld [vmem:[%s1518_s0 + $0x1f8] sm:$0xff] }
  0x45   :  { %767 = vmatmul.msk.f32.gmra.mxu0 %vm40_vm1, %v34_v34  ;;  %801 = vmatmul.msk.f32.gmra.mxu2 %vm40_vm1, %v792_v35 }
  0x47   :  { %784 = vmatmul.msk.f32.gmra.mxu1 %vm40_vm1, %v775_v36 }
  0x48   :  { %818 = vmatmul.msk.f32.gmra.mxu3 %vm40_vm1, %v809_v37  ;;  %v1381_v37 = vld [vmem:[%s1519_s2] ss:$0 sm:$0xff] }
  0x4d   :  { %768 = vmatmul.msk.f32.gmra.mxu0 %vm40_vm1, %v35_v38  ;;  %802 = vmatmul.msk.f32.gmra.mxu2 %vm40_vm1, %v793_v39 }
  0x4f   :  { %785 = vmatmul.msk.f32.gmra.mxu1 %vm40_vm1, %v776_v40 }
  0x50   :  { %819 = vmatmul.msk.f32.gmra.mxu3 %vm40_vm1, %v810_v41 }
  0x55   :  { %769 = vmatmul.msk.f32.gmra.mxu0 %vm40_vm1, %v36_v42  ;;  %803 = vmatmul.msk.f32.gmra.mxu2 %vm40_vm1, %v794_v43 }
  0x57   :  { %786 = vmatmul.msk.f32.gmra.mxu1 %vm40_vm1, %v777_v44 }
  0x58   :  { %820 = vmatmul.msk.f32.gmra.mxu3 %vm40_vm1, %v811_v45 }
  0x5d   :  { %830 = vmatmul.msk.f32.vlgmr.msrb.gmra.mxu0 %vm40_vm1, %v821_v46  ;;  %864 = vmatmul.msk.f32.vlgmr.msrb.gmra.mxu2 %vm40_vm1, %v855_v47 }
  0x5f   :  { %847 = vmatmul.msk.f32.vlgmr.msrb.gmra.mxu1 %vm40_vm1, %v838_v48 }
  0x60   :  { %881 = vmatmul.msk.f32.vlgmr.msrb.gmra.mxu3 %vm40_vm1, %v872_v49 }
  0x65   :  { %831 = vmatmul.msk.f32.gmra.mxu0 %vm40_vm1, %v822_v50  ;;  %865 = vmatmul.msk.f32.gmra.mxu2 %vm40_vm1, %v856_v51 }
  0x67   :  { %848 = vmatmul.msk.f32.gmra.mxu1 %vm40_vm1, %v839_v52 }
  0x68   :  { %882 = vmatmul.msk.f32.gmra.mxu3 %vm40_vm1, %v873_v53 }
  0x6d   :  { %832 = vmatmul.msk.f32.gmra.mxu0 %vm40_vm1, %v823_v54  ;;  %866 = vmatmul.msk.f32.gmra.mxu2 %vm40_vm1, %v857_v55 }
  0x6f   :  { %849 = vmatmul.msk.f32.gmra.mxu1 %vm40_vm1, %v840_v56 }
  0x70   :  { %883 = vmatmul.msk.f32.gmra.mxu3 %vm40_vm1, %v874_v57 }
  0x75   :  { %833 = vmatmul.msk.f32.gmra.mxu0 %vm40_vm1, %v824_v58  ;;  %867 = vmatmul.msk.f32.gmra.mxu2 %vm40_vm1, %v858_v59 }
  0x77   :  { %850 = vmatmul.msk.f32.gmra.mxu1 %vm40_vm1, %v841_v60 }
  0x78   :  { %884 = vmatmul.msk.f32.gmra.mxu3 %vm40_vm1, %v875_v61 }
  0x7d   :  { %834 = vmatmul.msk.f32.gmra.mxu0 %vm40_vm1, %v825_v62  ;;  %868 = vmatmul.msk.f32.gmra.mxu2 %vm40_vm1, %v859_v63 }
  0x7f   :  { %851 = vmatmul.msk.f32.gmra.mxu1 %vm40_vm1, %v842_v0 }
  0x80   :  { %885 = vmatmul.msk.f32.gmra.mxu3 %vm40_vm1, %v876_v1 }
  0x85   :  { %835 = vmatmul.msk.f32.gmra.mxu0 %vm40_vm1, %v826_v2  ;;  %869 = vmatmul.msk.f32.gmra.mxu2 %vm40_vm1, %v860_v3 }
  0x87   :  { %852 = vmatmul.msk.f32.gmra.mxu1 %vm40_vm1, %v843_v4 }
  0x88   :  { %886 = vmatmul.msk.f32.gmra.mxu3 %vm40_vm1, %v877_v5 }
  0x8d   :  { %836 = vmatmul.msk.f32.gmra.mxu0 %vm40_vm1, %v827_v6  ;;  %870 = vmatmul.msk.f32.gmra.mxu2 %vm40_vm1, %v861_v7 }
  0x8f   :  { %853 = vmatmul.msk.f32.gmra.mxu1 %vm40_vm1, %v844_v8 }
  0x90   :  { %887 = vmatmul.msk.f32.gmra.mxu3 %vm40_vm1, %v878_v9 }
  0x95   :  { %837 = vmatmul.msk.f32.gmra.mxu0 %vm40_vm1, %v828_v10  ;;  %871 = vmatmul.msk.f32.gmra.mxu2 %vm40_vm1, %v862_v11 }
  0x97   :  { %854 = vmatmul.msk.f32.gmra.mxu1 %vm40_vm1, %v845_v12 }
  0x98   :  { %888 = vmatmul.msk.f32.gmra.mxu3 %vm40_vm1, %v879_v13 }
  0x9a   :  { %v86_v14 = vpop.f32.mrf.mxu0 }
  0x9b   :  { %v87_v41 = vadd.f32 %v1381_v37, %v86_v14 }
  0x9c   :  { %v168_v15 = vpop.f32.mrf.mxu1 }
  0x9d   :  { %v169_v42 = vadd.f32 %v1381_v37, %v168_v15  ;;  %v110_v45 = vmax.f32 %v87_v41, 0.0 }
  0x9f   :  { %v192_v46 = vmax.f32 %v169_v42, 0.0 }
  0xa0   :  { %v258_v16 = vpop.f32.mrf.mxu2 }
  0xa1   :  { %v259_v43 = vadd.f32 %v1381_v37, %v258_v16  ;;  %v200_v52 = vmax.f32 %v110_v45, %v192_v46 }
  0xa2   :  { %v89_v17 = vpop.f32.mrf.mxu0 }
  0xa3   :  { %v348_v18 = vpop.f32.mrf.mxu3  ;;  %v282_v49 = vmax.f32 %v259_v43, 0.0  ;;  %v90_v53 = vadd.f32 %v1381_v37, %v89_v17 }
  0xa4   :  { %v171_v19 = vpop.f32.mrf.mxu1  ;;  %v349_v50 = vadd.f32 %v1381_v37, %v348_v18 }
  0xa5   :  { %v172_v54 = vadd.f32 %v1381_v37, %v171_v19  ;;  %v290_v55 = vmax.f32 %v200_v52, %v282_v49  ;;  %v111_v60 = vmax.f32 %v90_v53, 0.0 }
  0xa6   :  { %v372_v56 = vmax.f32 %v349_v50, 0.0 }
  0xa7   :  { %v193_v61 = vmax.f32 %v172_v54, 0.0 }
  0xa8   :  { %v261_v20 = vpop.f32.mrf.mxu2  ;;  %v380_v0 = vmax.f32 %v290_v55, %v372_v56 }
  0xa9   :  { %v262_v58 = vadd.f32 %v1381_v37, %v261_v20  ;;  %v201_v8 = vmax.f32 %v111_v60, %v193_v61 }
  0xaa   :  { %v92_v21 = vpop.f32.mrf.mxu0 }
  0xab   :  { %v351_v22 = vpop.f32.mrf.mxu3  ;;  %v283_v2 = vmax.f32 %v262_v58, 0.0  ;;  %v93_v6 = vadd.f32 %v1381_v37, %v92_v21 }
  0xac   :  { %v174_v23 = vpop.f32.mrf.mxu1  ;;  %v352_v3 = vadd.f32 %v1381_v37, %v351_v22 }
  0xad   :  { %v175_v7 = vadd.f32 %v1381_v37, %v174_v23  ;;  %v291_v13 = vmax.f32 %v201_v8, %v283_v2  ;;  %v112_v16 = vmax.f32 %v93_v6, 0.0 }
  0xae   :  { %v373_v14 = vmax.f32 %v352_v3, 0.0 }
  0xaf   :  { %v194_v17 = vmax.f32 %v175_v7, 0.0 }
  0xb0   :  { %v264_v24 = vpop.f32.mrf.mxu2 }
  0xb1   :  { %v265_v11 = vadd.f32 %v1381_v37, %v264_v24  ;;  %v381_v24 = vmax.f32 %v291_v13, %v373_v14  ;;  %v202_v50 = vmax.f32 %v112_v16, %v194_v17 }
  0xb2   :  { %v1356_v25 = vpop.f32.mrf.mxu0 }
  0xb3   :  { %v354_v26 = vpop.f32.mrf.mxu3  ;;  %v284_v41 = vmax.f32 %v265_v11, 0.0  ;;  %v96_v52 = vadd.f32 %v1381_v37, %v1356_v25 }
  0xb4   :  { %v1358_v27 = vpop.f32.mrf.mxu1  ;;  %v355_v23 = vadd.f32 %v1381_v37, %v354_v26 }
  0xb5   :  { %v178_v54 = vadd.f32 %v1381_v37, %v1358_v27  ;;  %v292_v26 = vmax.f32 %v202_v50, %v284_v41 }
  0xb6   :  { %v374_v58 = vmax.f32 %v355_v23, 0.0 }
  0xb7   :  { %v195_v27 = vmax.f32 %v178_v54, 0.0 }
  0xb8   :  { %v1360_v28 = vpop.f32.mrf.mxu2 }
  0xba   :  { %v1362_v29 = vpop.f32.mrf.mxu0 }
  0xbb   :  { %v1364_v30 = vpop.f32.mrf.mxu3 }
  0xbc   :  { %v1366_v31 = vpop.f32.mrf.mxu1  ;;  %v358_v8 = vadd.f32 %v1381_v37, %v1364_v30 }
  0xbd   :  { %v181_v13 = vadd.f32 %v1381_v37, %v1366_v31 }
  0xbf   :  { %v196_v23 = vmax.f32 %v181_v13, 0.0 }
  0xc0   :  { %v1368_v32 = vpop.f32.mrf.mxu2 }
  0xc2   :  { %v1370_v33 = vpop.f32.mrf.mxu0 }
  0xc3   :  { %v1372_v34 = vpop.f32.mrf.mxu3 }
  0xc4   :  { %v1374_v35 = vpop.f32.mrf.mxu1 }
  0xc8   :  { %v1376_v36 = vpop.f32.mrf.mxu2 }
  0xca   :  { %v1383_v38 = vpop.f32.mrf.mxu0 }
  0xcb   :  { %v1385_v39 = vpop.f32.mrf.mxu3 }
  0xcc   :  { %v1387_v40 = vpop.f32.mrf.mxu1 }
  0xcd   :  { %v187_v13 = vadd.f32 %v1381_v37, %v1387_v40 }
  0xd0   :  { %v1392_v44 = vpop.f32.mrf.mxu2 }
  0xd2   :  { %v1394_v47 = vpop.f32.mrf.mxu0 }
  0xd3   :  { %v1396_v48 = vpop.f32.mrf.mxu3 }
  0xd4   :  { %v1399_v51 = vpop.f32.mrf.mxu1 }
  0xd8   :  { %v1403_v57 = vpop.f32.mrf.mxu2 }
  0xda   :  { %v438_v59 = vpop.f32.mrf.mxu0 }
  0xdb   :  { %v1406_v62 = vpop.f32.mrf.mxu3  ;;  %v439_v63 = vadd.f32 %v1381_v37, %v438_v59  ;;  %v268_v59 = vadd.f32 %v1381_v37, %v1360_v28 }
  0xdc   :  { %v528_v1 = vpop.f32.mrf.mxu1 }
  0xdd   :  { %v462_v4 = vmax.f32 %v439_v63, 0.0  ;;  %v529_v5 = vadd.f32 %v1381_v37, %v528_v1  ;;  %v285_v6 = vmax.f32 %v268_v59, 0.0 }
  0xdf   :  { %v470_v9 = vmax.f32 %v380_v0, %v462_v4  ;;  %v552_v10 = vmax.f32 %v529_v5, 0.0  ;;  %v113_v0 = vmax.f32 %v96_v52, 0.0  ;;  %v382_v5 = vmax.f32 %v292_v26, %v374_v58 }
  0xe0   :  { %v618_v12 = vpop.f32.mrf.mxu2  ;;  %v184_v58 = vadd.f32 %v1381_v37, %v1374_v35 }
  0xe1   :  { %v619_v15 = vadd.f32 %v1381_v37, %v618_v12  ;;  %v560_v19 = vmax.f32 %v470_v9, %v552_v10  ;;  %v99_v12 = vadd.f32 %v1381_v37, %v1362_v29 }
  0xe2   :  { %v441_v18 = vpop.f32.mrf.mxu0 }
  0xe3   :  { %v642_v20 = vmax.f32 %v619_v15, 0.0  ;;  %v442_v22 = vadd.f32 %v1381_v37, %v441_v18  ;;  %v708_v21 = vpop.f32.mrf.mxu3  ;;  %v203_v15 = vmax.f32 %v113_v0, %v195_v27  ;;  %v271_v18 = vadd.f32 %v1381_v37, %v1368_v32 }
  0xe4   :  { %v709_v42 = vadd.f32 %v1381_v37, %v708_v21  ;;  %v531_v43 = vpop.f32.mrf.mxu1  ;;  %v114_v41 = vmax.f32 %v99_v12, 0.0  ;;  %v105_v12 = vadd.f32 %v1381_v37, %v1383_v38 }
  0xe5   :  { %v650_v45 = vmax.f32 %v560_v19, %v642_v20  ;;  %v463_v46 = vmax.f32 %v442_v22, 0.0  ;;  %v532_v49 = vadd.f32 %v1381_v37, %v531_v43  ;;  %v293_v30 = vmax.f32 %v203_v15, %v285_v6 }
  0xe6   :  { %v732_v53 = vmax.f32 %v709_v42, 0.0  ;;  %v375_v22 = vmax.f32 %v358_v8, 0.0  ;;  %v286_v32 = vmax.f32 %v271_v18, 0.0  ;;  %v364_v8 = vadd.f32 %v1381_v37, %v1385_v39 }
  0xe7   :  { %v471_v55 = vmax.f32 %v381_v24, %v463_v46  ;;  %v553_v56 = vmax.f32 %v532_v49, 0.0  ;;  %v277_v18 = vadd.f32 %v1381_v37, %v1392_v44 }
  0xe8   :  { %v740_v60 = vmax.f32 %v650_v45, %v732_v53  ;;  %v621_v61 = vpop.f32.mrf.mxu2  ;;  %v361_v45 = vadd.f32 %v1381_v37, %v1372_v34  ;;  %v383_v50 = vmax.f32 %v293_v30, %v375_v22  ;;  %v377_v30 = vmax.f32 %v364_v8, 0.0 }
  0xe9   :  { %v622_v63 = vadd.f32 %v1381_v37, %v621_v61  ;;  %v561_v1 = vmax.f32 %v471_v55, %v553_v56  ;;  %v204_v55 = vmax.f32 %v114_v41, %v196_v23  ;;  %v102_v56 = vadd.f32 %v1381_v37, %v1370_v33 }
  0xea   :  { %749 = vst.msk [vmem:[%s1520_s3] sm:$0xff] %vm748_vm2, %v740_v60  ;;  %v444_v25 = vpop.f32.mrf.mxu0  ;;  %v376_v34 = vmax.f32 %v361_v45, 0.0  ;;  %v198_v41 = vmax.f32 %v187_v13, 0.0  ;;  %v288_v44 = vmax.f32 %v277_v18, 0.0 }
  0xeb   :  { %v643_v2 = vmax.f32 %v622_v63, 0.0  ;;  %v445_v3 = vadd.f32 %v1381_v37, %v444_v25  ;;  %v711_v4 = vpop.f32.mrf.mxu3  ;;  %v294_v61 = vmax.f32 %v204_v55, %v286_v32  ;;  %v274_v63 = vadd.f32 %v1381_v37, %v1376_v36 }
  0xec   :  { %v712_v28 = vadd.f32 %v1381_v37, %v711_v4  ;;  %v534_v7 = vpop.f32.mrf.mxu1 }
  0xed   :  { %v651_v9 = vmax.f32 %v561_v1, %v643_v2  ;;  %v464_v10 = vmax.f32 %v445_v3, 0.0  ;;  %v535_v11 = vadd.f32 %v1381_v37, %v534_v7  ;;  %v115_v1 = vmax.f32 %v102_v56, 0.0 }
  0xee   :  { %v733_v14 = vmax.f32 %v712_v28, 0.0  ;;  %v197_v2 = vmax.f32 %v184_v58, 0.0  ;;  %v384_v6 = vmax.f32 %v294_v61, %v376_v34  ;;  %v287_v28 = vmax.f32 %v274_v63, 0.0 }
  0xef   :  { %v472_v16 = vmax.f32 %v382_v5, %v464_v10  ;;  %v554_v17 = vmax.f32 %v535_v11, 0.0  ;;  %v280_v58 = vadd.f32 %v1381_v37, %v1403_v57 }
  0xf0   :  { %v741_v19 = vmax.f32 %v651_v9, %v733_v14  ;;  %v624_v20 = vpop.f32.mrf.mxu2  ;;  %v205_v15 = vmax.f32 %v115_v1, %v197_v2 }
  0xf1   :  { %v625_v21 = vadd.f32 %v1381_v37, %v624_v20  ;;  %v562_v31 = vmax.f32 %v472_v16, %v554_v17 }
  0xf2   :  { %750 = vst.msk [vmem:[%s1520_s3 + $0x8] sm:$0xff] %vm748_vm2, %v741_v19  ;;  %v447_v29 = vpop.f32.mrf.mxu0  ;;  %v295_v39 = vmax.f32 %v205_v15, %v287_v28 }
  0xf3   :  { %v644_v42 = vmax.f32 %v625_v21, 0.0  ;;  %v448_v43 = vadd.f32 %v1381_v37, %v447_v29  ;;  %v714_v24 = vpop.f32.mrf.mxu3  ;;  %v116_v21 = vmax.f32 %v105_v12, 0.0 }
  0xf4   :  { %v715_v46 = vadd.f32 %v1381_v37, %v714_v24  ;;  %v537_v49 = vpop.f32.mrf.mxu1  ;;  %v385_v32 = vmax.f32 %v295_v39, %v377_v30 }
  0xf5   :  { %v652_v52 = vmax.f32 %v562_v31, %v644_v42  ;;  %v465_v53 = vmax.f32 %v448_v43, 0.0  ;;  %v538_v54 = vadd.f32 %v1381_v37, %v537_v49  ;;  %v367_v42 = vadd.f32 %v1381_v37, %v1396_v48 }
  0xf6   :  { %v734_v26 = vmax.f32 %v715_v46, 0.0 }
  0xf7   :  { %v473_v59 = vmax.f32 %v383_v50, %v465_v53  ;;  %v555_v60 = vmax.f32 %v538_v54, 0.0  ;;  %v206_v50 = vmax.f32 %v116_v21, %v198_v41  ;;  %v190_v54 = vadd.f32 %v1381_v37, %v1399_v51 }
  0xf8   :  { %v742_v0 = vmax.f32 %v652_v52, %v734_v26  ;;  %v627_v25 = vpop.f32.mrf.mxu2  ;;  %v108_v52 = vadd.f32 %v1381_v37, %v1394_v47  ;;  %v378_v48 = vmax.f32 %v367_v42, 0.0 }
  0xf9   :  { %v628_v27 = vadd.f32 %v1381_v37, %v627_v25  ;;  %v563_v35 = vmax.f32 %v473_v59, %v555_v60  ;;  %v296_v26 = vmax.f32 %v206_v50, %v288_v44  ;;  %v199_v63 = vmax.f32 %v190_v54, 0.0 }
  0xfa   :  { %751 = vst.msk [vmem:[%s1520_s3 + $0x10] sm:$0xff] %vm748_vm2, %v742_v0  ;;  %v450_v33 = vpop.f32.mrf.mxu0  ;;  %v117_v34 = vmax.f32 %v108_v52, 0.0 }
  0xfb   :  { %v645_v3 = vmax.f32 %v628_v27, 0.0  ;;  %v451_v4 = vadd.f32 %v1381_v37, %v450_v33  ;;  %v717_v5 = vpop.f32.mrf.mxu3  ;;  %v386_v1 = vmax.f32 %v296_v26, %v378_v48  ;;  %v289_v33 = vmax.f32 %v280_v58, 0.0 }
  0xfc   :  { %v718_v36 = vadd.f32 %v1381_v37, %v717_v5  ;;  %v540_v7 = vpop.f32.mrf.mxu1  ;;  %v207_v28 = vmax.f32 %v117_v34, %v199_v63 }
  0xfd   :  { %v653_v9 = vmax.f32 %v563_v35, %v645_v3  ;;  %v466_v10 = vmax.f32 %v451_v4, 0.0  ;;  %v541_v11 = vadd.f32 %v1381_v37, %v540_v7  ;;  %v370_v35 = vadd.f32 %v1381_v37, %v1406_v62 }
  0xfe   :  { %v735_v14 = vmax.f32 %v718_v36, 0.0 }
  0xff   :  { %v474_v16 = vmax.f32 %v384_v6, %v466_v10  ;;  %v556_v17 = vmax.f32 %v541_v11, 0.0  ;;  %v297_v10 = vmax.f32 %v207_v28, %v289_v33  ;;  %v379_v11 = vmax.f32 %v370_v35, 0.0 }
 0x100   :  { %v743_v19 = vmax.f32 %v653_v9, %v735_v14  ;;  %v630_v20 = vpop.f32.mrf.mxu2 }
 0x101   :  { %v631_v22 = vadd.f32 %v1381_v37, %v630_v20  ;;  %v564_v40 = vmax.f32 %v474_v16, %v556_v17 }
 0x102   :  { %752 = vst.msk [vmem:[%s1520_s3 + $0x18] sm:$0xff] %vm748_vm2, %v743_v19  ;;  %v453_v38 = vpop.f32.mrf.mxu0  ;;  %v387_v19 = vmax.f32 %v297_v10, %v379_v11 }
 0x103   :  { %v646_v23 = vmax.f32 %v631_v22, 0.0  ;;  %v454_v29 = vadd.f32 %v1381_v37, %v453_v38  ;;  %v720_v31 = vpop.f32.mrf.mxu3 }
 0x104   :  { %v721_v43 = vadd.f32 %v1381_v37, %v720_v31  ;;  %v543_v24 = vpop.f32.mrf.mxu1 }
 0x105   :  { %v654_v45 = vmax.f32 %v564_v40, %v646_v23  ;;  %v467_v46 = vmax.f32 %v454_v29, 0.0  ;;  %v544_v49 = vadd.f32 %v1381_v37, %v543_v24 }
 0x106   :  { %v736_v53 = vmax.f32 %v721_v43, 0.0 }
 0x107   :  { %v475_v55 = vmax.f32 %v385_v32, %v467_v46  ;;  %v557_v56 = vmax.f32 %v544_v49, 0.0 }
 0x108   :  { %v744_v59 = vmax.f32 %v654_v45, %v736_v53  ;;  %v633_v60 = vpop.f32.mrf.mxu2 }
 0x109   :  { %v634_v61 = vadd.f32 %v1381_v37, %v633_v60  ;;  %v565_v51 = vmax.f32 %v475_v55, %v557_v56 }
 0x10a   :  { %753 = vst.msk [vmem:[%s1520_s3 + $0x20] sm:$0xff] %vm748_vm2, %v744_v59  ;;  %v456_v47 = vpop.f32.mrf.mxu0 }
 0x10b   :  { %v647_v0 = vmax.f32 %v634_v61, 0.0  ;;  %v457_v25 = vadd.f32 %v1381_v37, %v456_v47  ;;  %v723_v27 = vpop.f32.mrf.mxu3 }
 0x10c   :  { %v724_v57 = vadd.f32 %v1381_v37, %v723_v27  ;;  %v546_v2 = vpop.f32.mrf.mxu1 }
 0x10d   :  { %v655_v3 = vmax.f32 %v565_v51, %v647_v0  ;;  %v468_v4 = vmax.f32 %v457_v25, 0.0  ;;  %v547_v5 = vadd.f32 %v1381_v37, %v546_v2 }
 0x10e   :  { %v737_v6 = vmax.f32 %v724_v57, 0.0 }
 0x10f   :  { %v476_v36 = vmax.f32 %v386_v1, %v468_v4  ;;  %v558_v7 = vmax.f32 %v547_v5, 0.0 }
 0x110   :  { %v745_v8 = vmax.f32 %v655_v3, %v737_v6  ;;  %v636_v9 = vpop.f32.mrf.mxu2 }
 0x111   :  { %v637_v12 = vadd.f32 %v1381_v37, %v636_v9  ;;  %v566_v13 = vmax.f32 %v476_v36, %v558_v7 }
 0x112   :  { %754 = vst.msk [vmem:[%s1520_s3 + $0x28] sm:$0xff] %vm748_vm2, %v745_v8  ;;  %v459_v62 = vpop.f32.mrf.mxu0 }
 0x113   :  { %v648_v14 = vmax.f32 %v637_v12, 0.0  ;;  %v460_v15 = vadd.f32 %v1381_v37, %v459_v62  ;;  %v726_v16 = vpop.f32.mrf.mxu3 }
 0x114   :  { %v727_v17 = vadd.f32 %v1381_v37, %v726_v16  ;;  %v549_v18 = vpop.f32.mrf.mxu1 }
 0x115   :  { %v656_v20 = vmax.f32 %v566_v13, %v648_v14  ;;  %v469_v39 = vmax.f32 %v460_v15, 0.0  ;;  %v550_v30 = vadd.f32 %v1381_v37, %v549_v18 }
 0x116   :  { %v738_v22 = vmax.f32 %v727_v17, 0.0 }
 0x117   :  { %v477_v21 = vmax.f32 %v387_v19, %v469_v39  ;;  %v559_v41 = vmax.f32 %v550_v30, 0.0 }
 0x118   :  { %v746_v38 = vmax.f32 %v656_v20, %v738_v22  ;;  %v639_v40 = vpop.f32.mrf.mxu2 }
 0x119   :  { %v640_v23 = vadd.f32 %v1381_v37, %v639_v40  ;;  %v567_v29 = vmax.f32 %v477_v21, %v559_v41 }
 0x11a   :  { %755 = vst.msk [vmem:[%s1520_s3 + $0x30] sm:$0xff] %vm748_vm2, %v746_v38 }
 0x11b   :  { %v649_v31 = vmax.f32 %v640_v23, 0.0  ;;  %v729_v44 = vpop.f32.mrf.mxu3 }
 0x11c   :  { %v730_v42 = vadd.f32 %v1381_v37, %v729_v44 }
 0x11d   :  { %v657_v43 = vmax.f32 %v567_v29, %v649_v31 }
 0x11e   :  { %v739_v24 = vmax.f32 %v730_v42, 0.0 }
 0x120   :  { %v747_v32 = vmax.f32 %v657_v43, %v739_v24 }
 0x122   :  { %756 = vst.msk [vmem:[%s1520_s3 + $0x38] sm:$0xff] %vm748_vm2, %v747_v32 }

// kernel: lightunet_forward.6
= control target key start
LH: loop header
LB: loop body
LE: loop exit
PB: predicated region body
PF: predicated region fallthrough
CT: control target
= control target key end

     0   :  { %vm47_vm0 = vcmask 719872   ;;  %vm428_vm1 = vcmask 130048   ;;  %s890_s1 = inlined_call_operand.vmem [shape: f32[216,16], index: 1, kind: input, shape index: {}]   ;;  %s891_s0 = inlined_call_operand.vmem [shape: f32[8,8,216], index: 0, kind: input, shape index: {}]   ;;  %s892_s2 = inlined_call_operand.vmem [shape: f32[1,16], index: 2, kind: input, shape index: {}]   ;;  %s893_s3 = inlined_call_operand.vmem [shape: f32[8,16], index: 3, kind: output, shape index: {}]  }
   0x1   :  { %v480_v0 = vld [vmem:[%s890_s1 + $0x78] sm:$0xff]  ;;  %v485_v1 = vld [vmem:[%s890_s1 + $0xd0] sm:$0xff]  ;;  %v497_v3 = vld [vmem:[%s890_s1 + $0xc8] sm:$0xff] }
   0x2   :  { %v490_v2 = vld [vmem:[%s890_s1 + $0x70] sm:$0xff]  ;;  %51 = vmatpush.msra.mxu0 %v480_v0  ;;  %76 = vmatpush.msra.mxu1 %v485_v1  ;;  %v504_v4 = vld [vmem:[%s890_s1 + $0x68] sm:$0xff]  ;;  %v509_v5 = vld [vmem:[%s890_s1 + $0xc0] sm:$0xff] }
   0x3   :  { %98 = vmatpush.msra.mxu2 %v480_v0  ;;  %123 = vmatpush.msra.mxu3 %v485_v1  ;;  %v518_v6 = vld [vmem:[%s890_s1 + $0x60] sm:$0xff]  ;;  %v523_v7 = vld [vmem:[%s890_s1 + $0xb8] sm:$0xff]  ;;  %v537_v9 = vld [vmem:[%s890_s1 + $0xb0] sm:$0xff] }
   0x4   :  { %52 = vmatpush.msra.mxu0 %v490_v2  ;;  %77 = vmatpush.msra.mxu1 %v497_v3  ;;  %v532_v8 = vld [vmem:[%s890_s1 + $0x58] sm:$0xff]  ;;  %v546_v10 = vld [vmem:[%s890_s1 + $0x50] sm:$0xff]  ;;  %v551_v11 = vld [vmem:[%s890_s1 + $0xa8] sm:$0xff] }
   0x5   :  { %99 = vmatpush.msra.mxu2 %v490_v2  ;;  %124 = vmatpush.msra.mxu3 %v497_v3  ;;  %v560_v12 = vld [vmem:[%s890_s1 + $0x48] sm:$0xff]  ;;  %v565_v13 = vld [vmem:[%s890_s1 + $0xa0] sm:$0xff]  ;;  %v579_v15 = vld [vmem:[%s890_s1 + $0x98] sm:$0xff] }
   0x6   :  { %53 = vmatpush.msra.mxu0 %v504_v4  ;;  %78 = vmatpush.msra.mxu1 %v509_v5  ;;  %v574_v14 = vld [vmem:[%s890_s1 + $0x40] sm:$0xff]  ;;  %v588_v16 = vld [vmem:[%s890_s1 + $0x38] sm:$0xff]  ;;  %v593_v17 = vld [vmem:[%s890_s1 + $0x90] sm:$0xff] }
   0x7   :  { %100 = vmatpush.msra.mxu2 %v504_v4  ;;  %125 = vmatpush.msra.mxu3 %v509_v5  ;;  %v602_v18 = vld [vmem:[%s890_s1 + $0x30] sm:$0xff]  ;;  %v607_v19 = vld [vmem:[%s890_s1 + $0x88] sm:$0xff]  ;;  %v621_v21 = vld [vmem:[%s890_s1 + $0x80] sm:$0xff] }
   0x8   :  { %54 = vmatpush.msra.mxu0 %v518_v6  ;;  %79 = vmatpush.msra.mxu1 %v523_v7  ;;  %v616_v20 = vld [vmem:[%s890_s1 + $0x28] sm:$0xff]  ;;  %v632_v22 = vld [vmem:[%s890_s1 + $0x20] sm:$0xff]  ;;  %v641_v23 = vld [vmem:[%s890_s1 + $0x18] sm:$0xff] }
   0x9   :  { %101 = vmatpush.msra.mxu2 %v518_v6  ;;  %126 = vmatpush.msra.mxu3 %v523_v7  ;;  %v650_v24 = vld [vmem:[%s890_s1 + $0x10] sm:$0xff]  ;;  %v659_v25 = vld [vmem:[%s890_s1 + $0x8] sm:$0xff]  ;;  %v668_v26 = vld [vmem:[%s890_s1] sm:$0xff] }
   0xa   :  { %55 = vmatpush.msra.mxu0 %v532_v8  ;;  %80 = vmatpush.msra.mxu1 %v537_v9  ;;  %v436_v27 = vld [vmem:[%s891_s0 + $0x18] sm:$0xff]  ;;  %v435_v28 = vld [vmem:[%s891_s0 + $0x10] sm:$0xff]  ;;  %v43_v29 = vld [vmem:[%s891_s0 + $0x8] sm:$0xff] }
   0xb   :  { %102 = vmatpush.msra.mxu2 %v532_v8  ;;  %127 = vmatpush.msra.mxu3 %v537_v9  ;;  %v42_v30 = vld [vmem:[%s891_s0] sm:$0xff]  ;;  %v439_v31 = vld [vmem:[%s891_s0 + $0x28] sm:$0xff]  ;;  %v442_v32 = vld [vmem:[%s891_s0 + $0x38] sm:$0xff] }
   0xc   :  { %56 = vmatpush.msra.mxu0 %v546_v10  ;;  %81 = vmatpush.msra.mxu1 %v551_v11  ;;  %v438_v33 = vld [vmem:[%s891_s0 + $0x20] sm:$0xff]  ;;  %v441_v34 = vld [vmem:[%s891_s0 + $0x30] sm:$0xff]  ;;  %v445_v36 = vld [vmem:[%s891_s0 + $0x48] sm:$0xff] }
   0xd   :  { %103 = vmatpush.msra.mxu2 %v546_v10  ;;  %128 = vmatpush.msra.mxu3 %v551_v11  ;;  %v444_v35 = vld [vmem:[%s891_s0 + $0x40] sm:$0xff]  ;;  %v447_v37 = vld [vmem:[%s891_s0 + $0x50] sm:$0xff]  ;;  %v448_v38 = vld [vmem:[%s891_s0 + $0x58] sm:$0xff] }
   0xe   :  { %57 = vmatpush.msra.mxu0 %v560_v12  ;;  %82 = vmatpush.msra.mxu1 %v565_v13  ;;  %v451_v39 = vld [vmem:[%s891_s0 + $0x68] sm:$0xff]  ;;  %v450_v40 = vld [vmem:[%s891_s0 + $0x60] sm:$0xff]  ;;  %v454_v41 = vld [vmem:[%s891_s0 + $0x78] sm:$0xff] }
   0xf   :  { %104 = vmatpush.msra.mxu2 %v560_v12  ;;  %129 = vmatpush.msra.mxu3 %v565_v13  ;;  %v453_v42 = vld [vmem:[%s891_s0 + $0x70] sm:$0xff]  ;;  %v456_v48 = vld [vmem:[%s892_s2] ss:$0 sm:$0xff] }
  0x10   :  { %58 = vmatpush.msra.mxu0 %v574_v14  ;;  %83 = vmatpush.msra.mxu1 %v579_v15 }
  0x11   :  { %105 = vmatpush.msra.mxu2 %v574_v14  ;;  %130 = vmatpush.msra.mxu3 %v579_v15 }
  0x12   :  { %59 = vmatpush.msra.mxu0 %v588_v16  ;;  %84 = vmatpush.msra.mxu1 %v593_v17 }
  0x13   :  { %106 = vmatpush.msra.mxu2 %v588_v16  ;;  %131 = vmatpush.msra.mxu3 %v593_v17 }
  0x14   :  { %60 = vmatpush.msra.mxu0 %v602_v18  ;;  %85 = vmatpush.msra.mxu1 %v607_v19 }
  0x15   :  { %107 = vmatpush.msra.mxu2 %v602_v18  ;;  %132 = vmatpush.msra.mxu3 %v607_v19 }
  0x16   :  { %61 = vmatpush.msra.mxu0 %v616_v20  ;;  %86 = vmatpush.msra.mxu1 %v621_v21 }
  0x17   :  { %108 = vmatpush.msra.mxu2 %v616_v20  ;;  %133 = vmatpush.msra.mxu3 %v621_v21 }
  0x18   :  { %146 = vmatpush.msrb.mxu1 %v480_v0  ;;  %62 = vmatpush.msra.mxu0 %v632_v22 }
  0x19   :  { %171 = vmatpush.msrb.mxu3 %v485_v1  ;;  %109 = vmatpush.msra.mxu2 %v632_v22 }
  0x1a   :  { %147 = vmatpush.msrb.mxu1 %v490_v2  ;;  %63 = vmatpush.msra.mxu0 %v641_v23 }
  0x1b   :  { %172 = vmatpush.msrb.mxu3 %v497_v3  ;;  %110 = vmatpush.msra.mxu2 %v641_v23 }
  0x1c   :  { %148 = vmatpush.msrb.mxu1 %v504_v4  ;;  %64 = vmatpush.msra.mxu0 %v650_v24 }
  0x1d   :  { %173 = vmatpush.msrb.mxu3 %v509_v5  ;;  %111 = vmatpush.msra.mxu2 %v650_v24 }
  0x1e   :  { %149 = vmatpush.msrb.mxu1 %v518_v6  ;;  %65 = vmatpush.msra.mxu0 %v659_v25 }
  0x1f   :  { %174 = vmatpush.msrb.mxu3 %v523_v7  ;;  %112 = vmatpush.msra.mxu2 %v659_v25 }
  0x20   :  { %150 = vmatpush.msrb.mxu1 %v532_v8  ;;  %66 = vmatpush.msra.mxu0 %v668_v26 }
  0x21   :  { %175 = vmatpush.msrb.mxu3 %v537_v9  ;;  %113 = vmatpush.msra.mxu2 %v668_v26 }
  0x22   :  { %151 = vmatpush.msrb.mxu1 %v546_v10  ;;  %194 = vmatpush.msrb.mxu0 %v480_v0 }
  0x23   :  { %176 = vmatpush.msrb.mxu3 %v551_v11  ;;  %219 = vmatpush.msrb.mxu2 %v485_v1 }
  0x24   :  { %152 = vmatpush.msrb.mxu1 %v560_v12  ;;  %195 = vmatpush.msrb.mxu0 %v490_v2 }
  0x25   :  { %177 = vmatpush.msrb.mxu3 %v565_v13  ;;  %220 = vmatpush.msrb.mxu2 %v497_v3 }
  0x26   :  { %153 = vmatpush.msrb.mxu1 %v574_v14  ;;  %196 = vmatpush.msrb.mxu0 %v504_v4 }
  0x27   :  { %178 = vmatpush.msrb.mxu3 %v579_v15  ;;  %221 = vmatpush.msrb.mxu2 %v509_v5 }
  0x28   :  { %154 = vmatpush.msrb.mxu1 %v588_v16  ;;  %197 = vmatpush.msrb.mxu0 %v518_v6 }
  0x29   :  { %179 = vmatpush.msrb.mxu3 %v593_v17  ;;  %222 = vmatpush.msrb.mxu2 %v523_v7 }
  0x2a   :  { %155 = vmatpush.msrb.mxu1 %v602_v18  ;;  %198 = vmatpush.msrb.mxu0 %v532_v8 }
  0x2b   :  { %180 = vmatpush.msrb.mxu3 %v607_v19  ;;  %223 = vmatpush.msrb.mxu2 %v537_v9 }
  0x2c   :  { %156 = vmatpush.msrb.mxu1 %v616_v20  ;;  %199 = vmatpush.msrb.mxu0 %v546_v10 }
  0x2d   :  { %181 = vmatpush.msrb.mxu3 %v621_v21  ;;  %224 = vmatpush.msrb.mxu2 %v551_v11 }
  0x2e   :  { %437 = vmatmul.msk.f32.vlgmr.msra.gmra.mxu3 %vm47_vm0, %v436_v27  ;;  %157 = vmatpush.msrb.mxu1 %v632_v22 }
  0x2f   :  { %242 = vmatpush.msra.mxu3 %v480_v0  ;;  %200 = vmatpush.msrb.mxu0 %v560_v12 }
  0x30   :  { %225 = vmatpush.msrb.mxu2 %v565_v13  ;;  %158 = vmatpush.msrb.mxu1 %v641_v23 }
  0x31   :  { %243 = vmatpush.msra.mxu3 %v490_v2  ;;  %201 = vmatpush.msrb.mxu0 %v574_v14 }
  0x32   :  { %226 = vmatpush.msrb.mxu2 %v579_v15  ;;  %159 = vmatpush.msrb.mxu1 %v650_v24 }
  0x33   :  { %244 = vmatpush.msra.mxu3 %v504_v4  ;;  %202 = vmatpush.msrb.mxu0 %v588_v16 }
  0x34   :  { %227 = vmatpush.msrb.mxu2 %v593_v17  ;;  %160 = vmatpush.msrb.mxu1 %v659_v25 }
  0x35   :  { %245 = vmatpush.msra.mxu3 %v518_v6  ;;  %203 = vmatpush.msrb.mxu0 %v602_v18 }
  0x36   :  { %228 = vmatpush.msrb.mxu2 %v607_v19  ;;  %161 = vmatpush.msrb.mxu1 %v668_v26 }
  0x37   :  { %114 = vmatmul.f32.vlgmr.msra.gmra.mxu2 %v435_v28  ;;  %246 = vmatpush.msra.mxu3 %v532_v8 }
  0x38   :  { %204 = vmatpush.msrb.mxu0 %v616_v20  ;;  %229 = vmatpush.msrb.mxu2 %v621_v21 }
  0x39   :  { %434 = vmatmul.msk.f32.vlgmr.msra.gmra.mxu1 %vm47_vm0, %v43_v29  ;;  %247 = vmatpush.msra.mxu3 %v546_v10 }
  0x3a   :  { %267 = vmatpush.msra.mxu1 %v485_v1  ;;  %290 = vmatpush.msra.mxu2 %v480_v0 }
  0x3b   :  { %205 = vmatpush.msrb.mxu0 %v632_v22  ;;  %248 = vmatpush.msra.mxu3 %v560_v12 }
  0x3c   :  { %67 = vmatmul.f32.vlgmr.msra.gmra.mxu0 %v42_v30  ;;  %268 = vmatpush.msra.mxu1 %v497_v3 }
  0x3d   :  { %291 = vmatpush.msra.mxu2 %v490_v2  ;;  %206 = vmatpush.msrb.mxu0 %v641_v23 }
  0x3e   :  { %440 = vmatmul.msk.f32.vlgmr.msrb.gmra.mxu3 %vm47_vm0, %v439_v31  ;;  %269 = vmatpush.msra.mxu1 %v509_v5 }
  0x3f   :  { %249 = vmatpush.msra.mxu3 %v574_v14  ;;  %292 = vmatpush.msra.mxu2 %v504_v4 }
  0x40   :  { %207 = vmatpush.msrb.mxu0 %v650_v24  ;;  %443 = vmatmul.msk.f32.vlgmr.msrb.gmra.mxu2 %vm47_vm0, %v442_v32 }
  0x41   :  { %250 = vmatpush.msra.mxu3 %v588_v16  ;;  %270 = vmatpush.msra.mxu1 %v523_v7 }
  0x42   :  { %293 = vmatpush.msra.mxu2 %v518_v6  ;;  %208 = vmatpush.msrb.mxu0 %v659_v25 }
  0x43   :  { %162 = vmatmul.f32.vlgmr.msrb.gmra.mxu1 %v438_v33  ;;  %251 = vmatpush.msra.mxu3 %v602_v18 }
  0x44   :  { %271 = vmatpush.msra.mxu1 %v537_v9  ;;  %294 = vmatpush.msra.mxu2 %v532_v8 }
  0x45   :  { %209 = vmatpush.msrb.mxu0 %v668_v26  ;;  %252 = vmatpush.msra.mxu3 %v616_v20 }
  0x46   :  { %210 = vmatmul.f32.vlgmr.msrb.gmra.mxu0 %v441_v34  ;;  %272 = vmatpush.msra.mxu1 %v551_v11 }
  0x47   :  { %295 = vmatpush.msra.mxu2 %v546_v10  ;;  %315 = vmatpush.msra.mxu0 %v485_v1 }
  0x48   :  { %253 = vmatpush.msra.mxu3 %v632_v22  ;;  %273 = vmatpush.msra.mxu1 %v565_v13 }
  0x49   :  { %296 = vmatpush.msra.mxu2 %v560_v12  ;;  %316 = vmatpush.msra.mxu0 %v497_v3 }
  0x4a   :  { %254 = vmatpush.msra.mxu3 %v641_v23  ;;  %274 = vmatpush.msra.mxu1 %v579_v15 }
  0x4b   :  { %297 = vmatpush.msra.mxu2 %v574_v14  ;;  %317 = vmatpush.msra.mxu0 %v509_v5 }
  0x4c   :  { %255 = vmatpush.msra.mxu3 %v650_v24  ;;  %275 = vmatpush.msra.mxu1 %v593_v17 }
  0x4d   :  { %298 = vmatpush.msra.mxu2 %v588_v16  ;;  %318 = vmatpush.msra.mxu0 %v523_v7 }
  0x4e   :  { %256 = vmatpush.msra.mxu3 %v659_v25  ;;  %276 = vmatpush.msra.mxu1 %v607_v19 }
  0x4f   :  { %299 = vmatpush.msra.mxu2 %v602_v18  ;;  %319 = vmatpush.msra.mxu0 %v537_v9 }
  0x50   :  { %257 = vmatpush.msra.mxu3 %v668_v26  ;;  %277 = vmatpush.msra.mxu1 %v621_v21 }
  0x51   :  { %300 = vmatpush.msra.mxu2 %v616_v20  ;;  %320 = vmatpush.msra.mxu0 %v551_v11 }
  0x52   :  { %258 = vmatmul.f32.vlgmr.msra.gmra.mxu3 %v444_v35  ;;  %338 = vmatpush.msrb.mxu1 %v480_v0 }
  0x53   :  { %301 = vmatpush.msra.mxu2 %v632_v22  ;;  %321 = vmatpush.msra.mxu0 %v565_v13 }
  0x54   :  { %339 = vmatpush.msrb.mxu1 %v490_v2  ;;  %363 = vmatpush.msrb.mxu3 %v485_v1 }
  0x55   :  { %302 = vmatpush.msra.mxu2 %v641_v23  ;;  %322 = vmatpush.msra.mxu0 %v579_v15 }
  0x56   :  { %340 = vmatpush.msrb.mxu1 %v504_v4  ;;  %364 = vmatpush.msrb.mxu3 %v497_v3 }
  0x57   :  { %303 = vmatpush.msra.mxu2 %v650_v24  ;;  %323 = vmatpush.msra.mxu0 %v593_v17 }
  0x58   :  { %341 = vmatpush.msrb.mxu1 %v518_v6  ;;  %365 = vmatpush.msrb.mxu3 %v509_v5 }
  0x59   :  { %304 = vmatpush.msra.mxu2 %v659_v25  ;;  %324 = vmatpush.msra.mxu0 %v607_v19 }
  0x5a   :  { %446 = vmatmul.msk.f32.vlgmr.msra.gmra.mxu1 %vm47_vm0, %v445_v36  ;;  %366 = vmatpush.msrb.mxu3 %v523_v7 }
  0x5b   :  { %342 = vmatpush.msrb.mxu1 %v532_v8  ;;  %305 = vmatpush.msra.mxu2 %v668_v26 }
  0x5c   :  { %325 = vmatpush.msra.mxu0 %v621_v21  ;;  %306 = vmatmul.f32.vlgmr.msra.gmra.mxu2 %v447_v37 }
  0x5d   :  { %343 = vmatpush.msrb.mxu1 %v546_v10  ;;  %367 = vmatpush.msrb.mxu3 %v537_v9 }
  0x5e   :  { %386 = vmatpush.msrb.mxu0 %v480_v0  ;;  %411 = vmatpush.msrb.mxu2 %v485_v1 }
  0x5f   :  { %344 = vmatpush.msrb.mxu1 %v560_v12  ;;  %368 = vmatpush.msrb.mxu3 %v551_v11 }
  0x60   :  { %387 = vmatpush.msrb.mxu0 %v490_v2  ;;  %412 = vmatpush.msrb.mxu2 %v497_v3 }
  0x61   :  { %449 = vmatmul.msk.f32.vlgmr.msra.gmra.mxu0 %vm47_vm0, %v448_v38  ;;  %345 = vmatpush.msrb.mxu1 %v574_v14 }
  0x62   :  { %388 = vmatpush.msrb.mxu0 %v504_v4  ;;  %369 = vmatpush.msrb.mxu3 %v565_v13 }
  0x63   :  { %346 = vmatpush.msrb.mxu1 %v588_v16  ;;  %413 = vmatpush.msrb.mxu2 %v509_v5 }
  0x64   :  { %389 = vmatpush.msrb.mxu0 %v518_v6  ;;  %370 = vmatpush.msrb.mxu3 %v579_v15 }
  0x65   :  { %347 = vmatpush.msrb.mxu1 %v602_v18  ;;  %414 = vmatpush.msrb.mxu2 %v523_v7 }
  0x66   :  { %390 = vmatpush.msrb.mxu0 %v532_v8  ;;  %371 = vmatpush.msrb.mxu3 %v593_v17 }
  0x67   :  { %348 = vmatpush.msrb.mxu1 %v616_v20  ;;  %415 = vmatpush.msrb.mxu2 %v537_v9 }
  0x68   :  { %391 = vmatpush.msrb.mxu0 %v546_v10  ;;  %372 = vmatpush.msrb.mxu3 %v607_v19 }
  0x69   :  { %349 = vmatpush.msrb.mxu1 %v632_v22  ;;  %416 = vmatpush.msrb.mxu2 %v551_v11 }
  0x6a   :  { %392 = vmatpush.msrb.mxu0 %v560_v12  ;;  %373 = vmatpush.msrb.mxu3 %v621_v21 }
  0x6b   :  { %350 = vmatpush.msrb.mxu1 %v641_v23  ;;  %452 = vmatmul.msk.f32.vlgmr.msrb.gmra.mxu3 %vm47_vm0, %v451_v39 }
  0x6c   :  { %393 = vmatpush.msrb.mxu0 %v574_v14  ;;  %417 = vmatpush.msrb.mxu2 %v565_v13 }
  0x6d   :  { %351 = vmatpush.msrb.mxu1 %v650_v24 }
  0x6e   :  { %394 = vmatpush.msrb.mxu0 %v588_v16  ;;  %418 = vmatpush.msrb.mxu2 %v579_v15 }
  0x6f   :  { %352 = vmatpush.msrb.mxu1 %v659_v25 }
  0x70   :  { %395 = vmatpush.msrb.mxu0 %v602_v18  ;;  %419 = vmatpush.msrb.mxu2 %v593_v17 }
  0x71   :  { %353 = vmatpush.msrb.mxu1 %v668_v26 }
  0x72   :  { %396 = vmatpush.msrb.mxu0 %v616_v20  ;;  %354 = vmatmul.f32.vlgmr.msrb.gmra.mxu1 %v450_v40 }
  0x73   :  { %420 = vmatpush.msrb.mxu2 %v607_v19 }
  0x74   :  { %397 = vmatpush.msrb.mxu0 %v632_v22 }
  0x75   :  { %421 = vmatpush.msrb.mxu2 %v621_v21 }
  0x76   :  { %398 = vmatpush.msrb.mxu0 %v641_v23  ;;  %455 = vmatmul.msk.f32.vlgmr.msrb.gmra.mxu2 %vm47_vm0, %v454_v41 }
  0x78   :  { %399 = vmatpush.msrb.mxu0 %v650_v24 }
  0x7a   :  { %400 = vmatpush.msrb.mxu0 %v659_v25 }
  0x7c   :  { %401 = vmatpush.msrb.mxu0 %v668_v26 }
  0x7d   :  { %402 = vmatmul.f32.vlgmr.msrb.gmra.mxu0 %v453_v42 }
  0xb1   :  { %v135_v44 = vpop.f32.mrf.mxu3 }
  0xb6   :  { %v88_v43 = vpop.f32.mrf.mxu1 }
  0xb9   :  { %v68_v46 = vpop.f32.mrf.mxu0 }
  0xba   :  { %v115_v45 = vpop.f32.mrf.mxu2  ;;  %v69_v50 = vadd.f32 %v456_v48, %v68_v46 }
  0xbb   :  { %v116_v51 = vadd.f32 %v456_v48, %v115_v45 }
  0xbc   :  { %v89_v54 = vadd.f32 %v88_v43, %v69_v50 }
  0xbd   :  { %v136_v55 = vadd.f32 %v135_v44, %v116_v51 }
  0xbe   :  { %v91_v59 = vmax.f32 %v89_v54, 0.0 }
  0xbf   :  { %v138_v60 = vmax.f32 %v136_v55, 0.0 }
  0xc0   :  { %v163_v47 = vpop.f32.mrf.mxu1 }
  0xc1   :  { %v183_v49 = vpop.f32.mrf.mxu3  ;;  %v164_v56 = vadd.f32 %v456_v48, %v163_v47  ;;  %v139_v2 = vmax.f32 %v91_v59, %v138_v60 }
  0xc3   :  { %v231_v52 = vpop.f32.mrf.mxu2  ;;  %v211_v57 = vpop.f32.mrf.mxu0  ;;  %v184_v61 = vadd.f32 %v183_v49, %v164_v56 }
  0xc4   :  { %v212_v62 = vadd.f32 %v456_v48, %v211_v57 }
  0xc5   :  { %v186_v3 = vmax.f32 %v184_v61, 0.0 }
  0xc6   :  { %v232_v4 = vadd.f32 %v231_v52, %v212_v62 }
  0xc7   :  { %v187_v10 = vmax.f32 %v139_v2, %v186_v3 }
  0xc8   :  { %v234_v11 = vmax.f32 %v232_v4, 0.0 }
  0xca   :  { %v235_v15 = vmax.f32 %v187_v10, %v234_v11 }
  0xd5   :  { %v259_v58 = vpop.f32.mrf.mxu3 }
  0xd6   :  { %v260_v0 = vadd.f32 %v456_v48, %v259_v58 }
  0xd7   :  { %v279_v53 = vpop.f32.mrf.mxu1 }
  0xd8   :  { %v280_v7 = vadd.f32 %v279_v53, %v260_v0 }
  0xda   :  { %v282_v13 = vmax.f32 %v280_v7, 0.0 }
  0xdc   :  { %v283_v19 = vmax.f32 %v235_v15, %v282_v13 }
  0xde   :  { %v327_v6 = vpop.f32.mrf.mxu0 }
  0xdf   :  { %v307_v63 = vpop.f32.mrf.mxu2 }
  0xe0   :  { %v308_v5 = vadd.f32 %v456_v48, %v307_v63 }
  0xe2   :  { %v328_v12 = vadd.f32 %v327_v6, %v308_v5 }
  0xe4   :  { %v330_v16 = vmax.f32 %v328_v12, 0.0 }
  0xe6   :  { %v331_v22 = vmax.f32 %v283_v19, %v330_v16 }
  0xee   :  { %v375_v9 = vpop.f32.mrf.mxu3 }
  0xef   :  { %v355_v1 = vpop.f32.mrf.mxu1 }
  0xf0   :  { %v356_v8 = vadd.f32 %v456_v48, %v355_v1 }
  0xf2   :  { %v376_v14 = vadd.f32 %v375_v9, %v356_v8 }
  0xf4   :  { %v378_v20 = vmax.f32 %v376_v14, 0.0 }
  0xf6   :  { %v379_v24 = vmax.f32 %v331_v22, %v378_v20 }
  0xf9   :  { %v423_v18 = vpop.f32.mrf.mxu2 }
  0xfa   :  { %v403_v17 = vpop.f32.mrf.mxu0 }
  0xfb   :  { %v404_v21 = vadd.f32 %v456_v48, %v403_v17 }
  0xfd   :  { %v424_v23 = vadd.f32 %v423_v18, %v404_v21 }
  0xff   :  { %v426_v25 = vmax.f32 %v424_v23, 0.0 }
 0x101   :  { %v427_v26 = vmax.f32 %v379_v24, %v426_v25 }
 0x103   :  { %429 = vst.msk [vmem:[%s893_s3] sm:$0xff] %vm428_vm1, %v427_v26 }

// kernel: lightunet_forward.7
= control target key start
LH: loop header
LB: loop body
LE: loop exit
PB: predicated region body
PF: predicated region fallthrough
CT: control target
= control target key end

     0   :  { %vm82_vm0 = vcmask 392192   ;;  %vm172_vm1 = vcmask 64512   ;;  %vm196_vm2 = vcmask 523264   ;;  %s422_s1 = inlined_call_operand.vmem [shape: f32[432,8], index: 1, kind: input, shape index: {}]   ;;  %s423_s2 = inlined_call_operand.vmem [shape: f32[1,8], index: 2, kind: input, shape index: {}]   ;;  %s424_s0 = inlined_call_operand.vmem [shape: f32[8,432], index: 0, kind: input, shape index: {}]   ;;  %s425_s4 = inlined_call_operand.vmem [shape: f32[1,64], index: 4, kind: input, shape index: {}]   ;;  %s426_s3 = inlined_call_operand.vmem [shape: f32[8,64], index: 3, kind: input, shape index: {}]   ;;  %s427_s5 = inlined_call_operand.vmem [shape: f32[8,64], index: 5, kind: output, shape index: {}]  }
   0x1   :  { %v71_v0 = vld [vmem:[%s422_s1 + $0x178] sm:$0xff]  ;;  %v70_v2 = vld [vmem:[%s422_s1 + $0x170] sm:$0xff]  ;;  %v69_v5 = vld [vmem:[%s422_s1 + $0x168] sm:$0xff] }
   0x2   :  { %v39_v1 = vld [vmem:[%s422_s1 + $0x78] sm:$0xff]  ;;  %126 = vmatpush.msra.mxu2 %v71_v0  ;;  %v38_v3 = vld [vmem:[%s422_s1 + $0x70] sm:$0xff]  ;;  %v37_v6 = vld [vmem:[%s422_s1 + $0x68] sm:$0xff] }
   0x3   :  { %86 = vmatpush.msra.mxu0 %v39_v1  ;;  %v55_v4 = vld [vmem:[%s422_s1 + $0xf8] sm:$0xff]  ;;  %v54_v7 = vld [vmem:[%s422_s1 + $0xf0] sm:$0xff]  ;;  %v53_v8 = vld [vmem:[%s422_s1 + $0xe8] sm:$0xff] }
   0x4   :  { %106 = vmatpush.msra.mxu1 %v55_v4  ;;  %127 = vmatpush.msra.mxu2 %v70_v2  ;;  %v68_v9 = vld [vmem:[%s422_s1 + $0x160] sm:$0xff]  ;;  %v67_v12 = vld [vmem:[%s422_s1 + $0x158] sm:$0xff]  ;;  %v66_v15 = vld [vmem:[%s422_s1 + $0x150] sm:$0xff] }
   0x5   :  { %87 = vmatpush.msra.mxu0 %v38_v3  ;;  %v36_v10 = vld [vmem:[%s422_s1 + $0x60] sm:$0xff]  ;;  %v35_v13 = vld [vmem:[%s422_s1 + $0x58] sm:$0xff]  ;;  %v34_v16 = vld [vmem:[%s422_s1 + $0x50] sm:$0xff] }
   0x6   :  { %107 = vmatpush.msra.mxu1 %v54_v7  ;;  %128 = vmatpush.msra.mxu2 %v69_v5  ;;  %v52_v11 = vld [vmem:[%s422_s1 + $0xe0] sm:$0xff]  ;;  %v51_v14 = vld [vmem:[%s422_s1 + $0xd8] sm:$0xff]  ;;  %v50_v17 = vld [vmem:[%s422_s1 + $0xd0] sm:$0xff] }
   0x7   :  { %88 = vmatpush.msra.mxu0 %v37_v6  ;;  %v65_v18 = vld [vmem:[%s422_s1 + $0x148] sm:$0xff]  ;;  %v64_v22 = vld [vmem:[%s422_s1 + $0x140] sm:$0xff]  ;;  %v75_v26 = vld [vmem:[%s422_s1 + $0x198] sm:$0xff] }
   0x8   :  { %108 = vmatpush.msra.mxu1 %v53_v8  ;;  %129 = vmatpush.msra.mxu2 %v68_v9  ;;  %v33_v19 = vld [vmem:[%s422_s1 + $0x48] sm:$0xff]  ;;  %v32_v23 = vld [vmem:[%s422_s1 + $0x40] sm:$0xff]  ;;  %v63_v27 = vld [vmem:[%s422_s1 + $0x138] sm:$0xff] }
   0x9   :  { %89 = vmatpush.msra.mxu0 %v36_v10  ;;  %v49_v20 = vld [vmem:[%s422_s1 + $0xc8] sm:$0xff]  ;;  %v76_v24 = vld [vmem:[%s422_s1 + $0x1a0] sm:$0xff]  ;;  %v31_v28 = vld [vmem:[%s422_s1 + $0x38] sm:$0xff] }
   0xa   :  { %109 = vmatpush.msra.mxu1 %v52_v11  ;;  %130 = vmatpush.msra.mxu2 %v67_v12  ;;  %v77_v21 = vld [vmem:[%s422_s1 + $0x1a8] sm:$0xff]  ;;  %v48_v25 = vld [vmem:[%s422_s1 + $0xc0] sm:$0xff]  ;;  %v47_v29 = vld [vmem:[%s422_s1 + $0xb8] sm:$0xff] }
   0xb   :  { %90 = vmatpush.msra.mxu0 %v35_v13  ;;  %156 = vmatpush.msra.mxu3 %v77_v21  ;;  %v74_v30 = vld [vmem:[%s422_s1 + $0x190] sm:$0xff]  ;;  %v73_v34 = vld [vmem:[%s422_s1 + $0x188] sm:$0xff]  ;;  %v72_v38 = vld [vmem:[%s422_s1 + $0x180] sm:$0xff] }
   0xc   :  { %110 = vmatpush.msra.mxu1 %v51_v14  ;;  %131 = vmatpush.msra.mxu2 %v66_v15  ;;  %v62_v31 = vld [vmem:[%s422_s1 + $0x130] sm:$0xff]  ;;  %v61_v35 = vld [vmem:[%s422_s1 + $0x128] sm:$0xff]  ;;  %v60_v39 = vld [vmem:[%s422_s1 + $0x120] sm:$0xff] }
   0xd   :  { %91 = vmatpush.msra.mxu0 %v34_v16  ;;  %157 = vmatpush.msra.mxu3 %v76_v24  ;;  %v30_v32 = vld [vmem:[%s422_s1 + $0x30] sm:$0xff]  ;;  %v29_v36 = vld [vmem:[%s422_s1 + $0x28] sm:$0xff]  ;;  %v28_v40 = vld [vmem:[%s422_s1 + $0x20] sm:$0xff] }
   0xe   :  { %111 = vmatpush.msra.mxu1 %v50_v17  ;;  %132 = vmatpush.msra.mxu2 %v65_v18  ;;  %v46_v33 = vld [vmem:[%s422_s1 + $0xb0] sm:$0xff]  ;;  %v45_v37 = vld [vmem:[%s422_s1 + $0xa8] sm:$0xff]  ;;  %v44_v41 = vld [vmem:[%s422_s1 + $0xa0] sm:$0xff] }
   0xf   :  { %92 = vmatpush.msra.mxu0 %v33_v19  ;;  %158 = vmatpush.msra.mxu3 %v75_v26  ;;  %v23_v42 = vld [vmem:[%s424_s0 + $0x18] sm:$0xff]  ;;  %v58_v46 = vld [vmem:[%s422_s1 + $0x110] sm:$0xff]  ;;  %v57_v49 = vld [vmem:[%s422_s1 + $0x108] sm:$0xff] }
  0x10   :  { %112 = vmatpush.msra.mxu1 %v49_v20  ;;  %133 = vmatpush.msra.mxu2 %v64_v22  ;;  %v59_v43 = vld [vmem:[%s422_s1 + $0x118] sm:$0xff]  ;;  %v26_v47 = vld [vmem:[%s422_s1 + $0x10] sm:$0xff]  ;;  %v25_v50 = vld [vmem:[%s422_s1 + $0x8] sm:$0xff] }
  0x11   :  { %93 = vmatpush.msra.mxu0 %v32_v23  ;;  %159 = vmatpush.msra.mxu3 %v74_v30  ;;  %v27_v44 = vld [vmem:[%s422_s1 + $0x18] sm:$0xff]  ;;  %v42_v48 = vld [vmem:[%s422_s1 + $0x90] sm:$0xff]  ;;  %v41_v51 = vld [vmem:[%s422_s1 + $0x88] sm:$0xff] }
  0x12   :  { %113 = vmatpush.msra.mxu1 %v48_v25  ;;  %134 = vmatpush.msra.mxu2 %v63_v27  ;;  %v43_v45 = vld [vmem:[%s422_s1 + $0x98] sm:$0xff]  ;;  %v56_v52 = vld [vmem:[%s422_s1 + $0x100] sm:$0xff]  ;;  %v22_v54 = vld [vmem:[%s424_s0 + $0x10] sm:$0xff] }
  0x13   :  { %94 = vmatpush.msra.mxu0 %v31_v28  ;;  %160 = vmatpush.msra.mxu3 %v73_v34  ;;  %v24_v53 = vld [vmem:[%s422_s1] sm:$0xff]  ;;  %v21_v57 = vld [vmem:[%s424_s0 + $0x8] sm:$0xff] }
  0x14   :  { %114 = vmatpush.msra.mxu1 %v47_v29  ;;  %135 = vmatpush.msra.mxu2 %v62_v31  ;;  %v20_v55 = vld [vmem:[%s424_s0] sm:$0xff] }
  0x15   :  { %95 = vmatpush.msra.mxu0 %v30_v32  ;;  %161 = vmatpush.msra.mxu3 %v72_v38  ;;  %v40_v56 = vld [vmem:[%s422_s1 + $0x80] sm:$0xff] }
  0x16   :  { %115 = vmatpush.msra.mxu1 %v46_v33  ;;  %136 = vmatpush.msra.mxu2 %v61_v35  ;;  %v167_v58 = vld [vmem:[%s426_s3] sm:$0xff] }
  0x17   :  { %96 = vmatpush.msra.mxu0 %v29_v36  ;;  %202 = vmatmul.msk.f32.vlgmr.msra.gmra.mxu3 %vm82_vm0, %v23_v42  ;;  %v204_v59 = vld [vmem:[%s423_s2] ss:$0 sm:$0xff] }
  0x18   :  { %116 = vmatpush.msra.mxu1 %v45_v37  ;;  %137 = vmatpush.msra.mxu2 %v60_v39  ;;  %v205_v5 = vld [vmem:[%s425_s4] ss:$0 sm:$0xff] }
  0x19   :  { %97 = vmatpush.msra.mxu0 %v28_v40  ;;  %191 = vmatpush.msrb.mxu3 %v167_v58 }
  0x1a   :  { %117 = vmatpush.msra.mxu1 %v44_v41  ;;  %138 = vmatpush.msra.mxu2 %v59_v43 }
  0x1b   :  { %98 = vmatpush.msra.mxu0 %v27_v44 }
  0x1c   :  { %118 = vmatpush.msra.mxu1 %v43_v45  ;;  %139 = vmatpush.msra.mxu2 %v58_v46 }
  0x1d   :  { %99 = vmatpush.msra.mxu0 %v26_v47 }
  0x1e   :  { %119 = vmatpush.msra.mxu1 %v42_v48  ;;  %140 = vmatpush.msra.mxu2 %v57_v49 }
  0x1f   :  { %100 = vmatpush.msra.mxu0 %v25_v50 }
  0x20   :  { %120 = vmatpush.msra.mxu1 %v41_v51  ;;  %141 = vmatpush.msra.mxu2 %v56_v52 }
  0x21   :  { %101 = vmatpush.msra.mxu0 %v24_v53  ;;  %142 = vmatmul.f32.vlgmr.msra.gmra.mxu2 %v22_v54 }
  0x22   :  { %102 = vmatmul.f32.vlgmr.msra.gmra.mxu0 %v20_v55  ;;  %121 = vmatpush.msra.mxu1 %v40_v56 }
  0x23   :  { %122 = vmatmul.f32.vlgmr.msra.gmra.mxu1 %v21_v57 }
  0x9a   :  { %v163_v1 = vpop.f32.mrf.mxu3 }
  0x9f   :  { %v103_v60 = vpop.f32.mrf.mxu0 }
  0xa0   :  { %v104_v61 = vadd.f32 %v204_v59, %v103_v60  ;;  %v123_v62 = vpop.f32.mrf.mxu1 }
  0xa2   :  { %v124_v63 = vadd.f32 %v123_v62, %v104_v61 }
  0xa4   :  { %v143_v0 = vpop.f32.mrf.mxu2 }
  0xa5   :  { %v144_v2 = vadd.f32 %v143_v0, %v124_v63 }
  0xa7   :  { %v164_v3 = vadd.f32 %v163_v1, %v144_v2 }
  0xa9   :  { %v166_v4 = vmax.f32 %v164_v3, 0.0 }
  0xab   :  { %203 = vmatmul.msk.f32.vlgmr.msrb.gmra.mxu3 %vm172_vm1, %v166_v4 }
 0x12e   :  { %v193_v6 = vpop.f32.mrf.mxu3 }
 0x12f   :  { %v194_v7 = vadd.f32 %v205_v5, %v193_v6 }
 0x131   :  { %197 = vst.msk [vmem:[%s427_s5] sm:$0xff] %vm196_vm2, %v194_v7 }

// kernel: lightunet_forward.8
= control target key start
LH: loop header
LB: loop body
LE: loop exit
PB: predicated region body
PF: predicated region fallthrough
CT: control target
= control target key end

     0   :  { %vm110_vm0 = vcmask 392192   ;;  %vm337_vm1 = vcmask 1043456   ;;  %vm312_vm2 = vcmask 31744   ;;  %vm382_vm3 = vcmask 261120   ;;  %s789_s1 = inlined_call_operand.vmem [shape: f32[432,4], index: 1, kind: input, shape index: {}]   ;;  %s790_s2 = inlined_call_operand.vmem [shape: f32[1,4], index: 2, kind: input, shape index: {}]   ;;  %s791_s0 = inlined_call_operand.vmem [shape: f32[64,432], index: 0, kind: input, shape index: {}]   ;;  %s792_s4 = inlined_call_operand.vmem [shape: f32[1,32], index: 4, kind: input, shape index: {}]   ;;  %s793_s3 = inlined_call_operand.vmem [shape: f32[4,32], index: 3, kind: input, shape index: {}]   ;;  %s794_s5 = inlined_call_operand.vmem [shape: f32[64,32], index: 5, kind: output, shape index: {}]  }
   0x1   :  { %v67_v0 = vld [vmem:[%s789_s1 + $0x78] sm:$0xff]  ;;  %v66_v3 = vld [vmem:[%s789_s1 + $0x70] sm:$0xff]  ;;  %v65_v6 = vld [vmem:[%s789_s1 + $0x68] sm:$0xff] }
   0x2   :  { %v83_v1 = vld [vmem:[%s789_s1 + $0xf8] sm:$0xff]  ;;  %135 = vmatpush.msra.mxu0 %v67_v0  ;;  %v82_v4 = vld [vmem:[%s789_s1 + $0xf0] sm:$0xff]  ;;  %v81_v7 = vld [vmem:[%s789_s1 + $0xe8] sm:$0xff] }
   0x3   :  { %v99_v2 = vld [vmem:[%s789_s1 + $0x178] sm:$0xff]  ;;  %176 = vmatpush.msra.mxu1 %v83_v1  ;;  %v98_v5 = vld [vmem:[%s789_s1 + $0x170] sm:$0xff]  ;;  %v97_v8 = vld [vmem:[%s789_s1 + $0x168] sm:$0xff] }
   0x4   :  { %217 = vmatpush.msra.mxu2 %v99_v2  ;;  %136 = vmatpush.msra.mxu0 %v66_v3  ;;  %v64_v9 = vld [vmem:[%s789_s1 + $0x60] sm:$0xff]  ;;  %v63_v12 = vld [vmem:[%s789_s1 + $0x58] sm:$0xff]  ;;  %v62_v15 = vld [vmem:[%s789_s1 + $0x50] sm:$0xff] }
   0x5   :  { %177 = vmatpush.msra.mxu1 %v82_v4  ;;  %v80_v10 = vld [vmem:[%s789_s1 + $0xe0] sm:$0xff]  ;;  %v79_v13 = vld [vmem:[%s789_s1 + $0xd8] sm:$0xff]  ;;  %v78_v16 = vld [vmem:[%s789_s1 + $0xd0] sm:$0xff] }
   0x6   :  { %218 = vmatpush.msra.mxu2 %v98_v5  ;;  %137 = vmatpush.msra.mxu0 %v65_v6  ;;  %v96_v11 = vld [vmem:[%s789_s1 + $0x160] sm:$0xff]  ;;  %v95_v14 = vld [vmem:[%s789_s1 + $0x158] sm:$0xff]  ;;  %v94_v17 = vld [vmem:[%s789_s1 + $0x150] sm:$0xff] }
   0x7   :  { %178 = vmatpush.msra.mxu1 %v81_v7  ;;  %v61_v18 = vld [vmem:[%s789_s1 + $0x48] sm:$0xff]  ;;  %v60_v21 = vld [vmem:[%s789_s1 + $0x40] sm:$0xff]  ;;  %v59_v24 = vld [vmem:[%s789_s1 + $0x38] sm:$0xff] }
   0x8   :  { %219 = vmatpush.msra.mxu2 %v97_v8  ;;  %138 = vmatpush.msra.mxu0 %v64_v9  ;;  %v77_v19 = vld [vmem:[%s789_s1 + $0xc8] sm:$0xff]  ;;  %v76_v22 = vld [vmem:[%s789_s1 + $0xc0] sm:$0xff]  ;;  %v75_v25 = vld [vmem:[%s789_s1 + $0xb8] sm:$0xff] }
   0x9   :  { %179 = vmatpush.msra.mxu1 %v80_v10  ;;  %v93_v20 = vld [vmem:[%s789_s1 + $0x148] sm:$0xff]  ;;  %v92_v23 = vld [vmem:[%s789_s1 + $0x140] sm:$0xff]  ;;  %v91_v26 = vld [vmem:[%s789_s1 + $0x138] sm:$0xff] }
   0xa   :  { %220 = vmatpush.msra.mxu2 %v96_v11  ;;  %139 = vmatpush.msra.mxu0 %v63_v12  ;;  %v58_v27 = vld [vmem:[%s789_s1 + $0x30] sm:$0xff]  ;;  %v105_v30 = vld [vmem:[%s789_s1 + $0x1a8] sm:$0xff]  ;;  %v564_v33 = vld [vmem:[%s789_s1 + $0x1a0] sm:$0xff] }
   0xb   :  { %180 = vmatpush.msra.mxu1 %v79_v13  ;;  %v74_v28 = vld [vmem:[%s789_s1 + $0xb0] sm:$0xff]  ;;  %v57_v31 = vld [vmem:[%s789_s1 + $0x28] sm:$0xff]  ;;  %414 = vmatpush.msra.mxu3 %v105_v30  ;;  %v572_v35 = vld [vmem:[%s789_s1 + $0x198] sm:$0xff] }
   0xc   :  { %221 = vmatpush.msra.mxu2 %v95_v14  ;;  %140 = vmatpush.msra.mxu0 %v62_v15  ;;  %v90_v29 = vld [vmem:[%s789_s1 + $0x130] sm:$0xff]  ;;  %v73_v32 = vld [vmem:[%s789_s1 + $0xa8] sm:$0xff]  ;;  %v56_v36 = vld [vmem:[%s789_s1 + $0x20] sm:$0xff] }
   0xd   :  { %181 = vmatpush.msra.mxu1 %v78_v16  ;;  %v89_v34 = vld [vmem:[%s789_s1 + $0x128] sm:$0xff]  ;;  %v72_v37 = vld [vmem:[%s789_s1 + $0xa0] sm:$0xff]  ;;  %417 = vmatpush.msra.mxu3 %v564_v33  ;;  %v55_v39 = vld [vmem:[%s789_s1 + $0x18] sm:$0xff] }
   0xe   :  { %222 = vmatpush.msra.mxu2 %v94_v17  ;;  %141 = vmatpush.msra.mxu0 %v61_v18  ;;  %v88_v38 = vld [vmem:[%s789_s1 + $0x120] sm:$0xff]  ;;  %v71_v40 = vld [vmem:[%s789_s1 + $0x98] sm:$0xff]  ;;  %v54_v42 = vld [vmem:[%s789_s1 + $0x10] sm:$0xff] }
   0xf   :  { %182 = vmatpush.msra.mxu1 %v77_v19  ;;  %420 = vmatpush.msra.mxu3 %v572_v35  ;;  %v87_v41 = vld [vmem:[%s789_s1 + $0x118] sm:$0xff]  ;;  %v70_v43 = vld [vmem:[%s789_s1 + $0x90] sm:$0xff]  ;;  %v101_v46 = vld [vmem:[%s789_s1 + $0x188] sm:$0xff] }
  0x10   :  { %223 = vmatpush.msra.mxu2 %v93_v20  ;;  %142 = vmatpush.msra.mxu0 %v60_v21  ;;  %v86_v44 = vld [vmem:[%s789_s1 + $0x110] sm:$0xff]  ;;  %v53_v47 = vld [vmem:[%s789_s1 + $0x8] sm:$0xff]  ;;  %v52_v50 = vld [vmem:[%s789_s1] sm:$0xff] }
  0x11   :  { %183 = vmatpush.msra.mxu1 %v76_v22  ;;  %v102_v45 = vld [vmem:[%s789_s1 + $0x190] sm:$0xff]  ;;  %v69_v48 = vld [vmem:[%s789_s1 + $0x88] sm:$0xff]  ;;  %v68_v51 = vld [vmem:[%s789_s1 + $0x80] sm:$0xff] }
  0x12   :  { %224 = vmatpush.msra.mxu2 %v92_v23  ;;  %143 = vmatpush.msra.mxu0 %v59_v24  ;;  %v85_v49 = vld [vmem:[%s789_s1 + $0x108] sm:$0xff]  ;;  %v84_v52 = vld [vmem:[%s789_s1 + $0x100] sm:$0xff]  ;;  %v22_v55 = vld [vmem:[%s791_s0 + $0x10] sm:$0xff] }
  0x13   :  { %184 = vmatpush.msra.mxu1 %v75_v25  ;;  %423 = vmatpush.msra.mxu3 %v102_v45  ;;  %v20_v53 = vld [vmem:[%s791_s0] sm:$0xff]  ;;  %v21_v54 = vld [vmem:[%s791_s0 + $0x8] sm:$0xff]  ;;  %v39_v57 = vld [vmem:[%s791_s0 + $0x98] sm:$0xff] }
  0x14   :  { %225 = vmatpush.msra.mxu2 %v91_v26  ;;  %144 = vmatpush.msra.mxu0 %v58_v27  ;;  %v100_v56 = vld [vmem:[%s789_s1 + $0x180] sm:$0xff]  ;;  %v25_v59 = vld [vmem:[%s791_s0 + $0x28] sm:$0xff]  ;;  %v26_v60 = vld [vmem:[%s791_s0 + $0x30] sm:$0xff] }
  0x15   :  { %185 = vmatpush.msra.mxu1 %v74_v28  ;;  %426 = vmatpush.msra.mxu3 %v101_v46  ;;  %v24_v58 = vld [vmem:[%s791_s0 + $0x20] sm:$0xff]  ;;  %v43_v61 = vld [vmem:[%s791_s0 + $0xb8] sm:$0xff]  ;;  %v29_v63 = vld [vmem:[%s791_s0 + $0x48] sm:$0xff] }
  0x16   :  { %226 = vmatpush.msra.mxu2 %v90_v29  ;;  %145 = vmatpush.msra.mxu0 %v57_v31  ;;  %v28_v62 = vld [vmem:[%s791_s0 + $0x40] sm:$0xff]  ;;  %v30_v0 = vld [vmem:[%s791_s0 + $0x50] sm:$0xff]  ;;  %v47_v1 = vld [vmem:[%s791_s0 + $0xd8] sm:$0xff] }
  0x17   :  { %186 = vmatpush.msra.mxu1 %v73_v32  ;;  %429 = vmatpush.msra.mxu3 %v100_v56  ;;  %v32_v2 = vld [vmem:[%s791_s0 + $0x60] sm:$0xff]  ;;  %v33_v3 = vld [vmem:[%s791_s0 + $0x68] sm:$0xff]  ;;  %v34_v4 = vld [vmem:[%s791_s0 + $0x70] sm:$0xff] }
  0x18   :  { %227 = vmatpush.msra.mxu2 %v89_v34  ;;  %146 = vmatpush.msra.mxu0 %v56_v36  ;;  %v51_v5 = vld [vmem:[%s791_s0 + $0xf8] sm:$0xff]  ;;  %v36_v6 = vld [vmem:[%s791_s0 + $0x80] sm:$0xff]  ;;  %v37_v7 = vld [vmem:[%s791_s0 + $0x88] sm:$0xff] }
  0x19   :  { %187 = vmatpush.msra.mxu1 %v72_v37  ;;  %399 = vmatmul.msk.f32.vlgmr.msra.gmra.mxu3 %vm110_vm0, %v39_v57  ;;  %v38_v8 = vld [vmem:[%s791_s0 + $0x90] sm:$0xff]  ;;  %v40_v9 = vld [vmem:[%s791_s0 + $0xa0] sm:$0xff]  ;;  %v41_v10 = vld [vmem:[%s791_s0 + $0xa8] sm:$0xff] }
  0x1a   :  { %228 = vmatpush.msra.mxu2 %v88_v38  ;;  %147 = vmatpush.msra.mxu0 %v55_v39  ;;  %v42_v11 = vld [vmem:[%s791_s0 + $0xb0] sm:$0xff]  ;;  %v44_v12 = vld [vmem:[%s791_s0 + $0xc0] sm:$0xff]  ;;  %v45_v13 = vld [vmem:[%s791_s0 + $0xc8] sm:$0xff] }
  0x1b   :  { %188 = vmatpush.msra.mxu1 %v71_v40  ;;  %v46_v14 = vld [vmem:[%s791_s0 + $0xd0] sm:$0xff]  ;;  %v48_v15 = vld [vmem:[%s791_s0 + $0xe0] sm:$0xff]  ;;  %v49_v16 = vld [vmem:[%s791_s0 + $0xe8] sm:$0xff] }
  0x1c   :  { %229 = vmatpush.msra.mxu2 %v87_v41  ;;  %148 = vmatpush.msra.mxu0 %v54_v42  ;;  %v50_v17 = vld [vmem:[%s791_s0 + $0xf0] sm:$0xff]  ;;  %v23_v18 = vld [vmem:[%s791_s0 + $0x18] sm:$0xff]  ;;  %v307_v24 = vld [vmem:[%s793_s3] sm:$0xf] }
  0x1d   :  { %189 = vmatpush.msra.mxu1 %v70_v43  ;;  %v27_v19 = vld [vmem:[%s791_s0 + $0x38] sm:$0xff]  ;;  %403 = vmatpush.msk.msrb.mxu3 %vm337_vm1, %v307_v24  ;;  %v430_v42 = vld [vmem:[%s790_s2] ss:$0 sm:$0xff] }
  0x1e   :  { %230 = vmatpush.msra.mxu2 %v86_v44  ;;  %149 = vmatpush.msra.mxu0 %v53_v47  ;;  %v35_v20 = vld [vmem:[%s791_s0 + $0x78] sm:$0xff] }
  0x1f   :  { %190 = vmatpush.msra.mxu1 %v69_v48  ;;  %v31_v21 = vld [vmem:[%s791_s0 + $0x58] sm:$0xff] }
  0x20   :  { %231 = vmatpush.msra.mxu2 %v85_v49  ;;  %150 = vmatpush.msra.mxu0 %v52_v50 }
  0x21   :  { %191 = vmatpush.msra.mxu1 %v68_v51  ;;  %151 = vmatmul.f32.vlgmr.msra.gmra.mxu0 %v20_v53 }
  0x22   :  { %232 = vmatpush.msra.mxu2 %v84_v52  ;;  %192 = vmatmul.f32.vlgmr.msra.gmra.mxu1 %v21_v54 }
  0x23   :  { %233 = vmatmul.f32.vlgmr.msra.gmra.mxu2 %v22_v55  ;;  %268 = vmatpush.msrb.mxu0 %v105_v30 }
  0x24   :  { %412 = vmatpush.msrb.mxu1 %v105_v30  ;;  %413 = vmatpush.msrb.mxu2 %v105_v30 }
  0x25   :  { %269 = vmatpush.msrb.mxu0 %v564_v33  ;;  %400 = vmatmul.msk.f32.gmra.mxu3 %vm110_vm0, %v43_v61 }
  0x26   :  { %415 = vmatpush.msrb.mxu1 %v564_v33  ;;  %416 = vmatpush.msrb.mxu2 %v564_v33 }
  0x27   :  { %270 = vmatpush.msrb.mxu0 %v572_v35 }
  0x28   :  { %418 = vmatpush.msrb.mxu1 %v572_v35  ;;  %419 = vmatpush.msrb.mxu2 %v572_v35 }
  0x29   :  { %154 = vmatmul.f32.gmra.mxu0 %v24_v58 }
  0x2a   :  { %421 = vmatpush.msrb.mxu1 %v102_v45  ;;  %271 = vmatpush.msrb.mxu0 %v102_v45 }
  0x2b   :  { %195 = vmatmul.f32.gmra.mxu1 %v25_v59  ;;  %236 = vmatmul.f32.gmra.mxu2 %v26_v60 }
  0x2c   :  { %422 = vmatpush.msrb.mxu2 %v102_v45  ;;  %424 = vmatpush.msrb.mxu1 %v101_v46 }
  0x2d   :  { %272 = vmatpush.msrb.mxu0 %v101_v46  ;;  %401 = vmatmul.msk.f32.gmra.mxu3 %vm110_vm0, %v47_v1 }
  0x2e   :  { %425 = vmatpush.msrb.mxu2 %v101_v46  ;;  %427 = vmatpush.msrb.mxu1 %v100_v56 }
  0x2f   :  { %273 = vmatpush.msrb.mxu0 %v100_v56 }
  0x30   :  { %428 = vmatpush.msrb.mxu2 %v100_v56 }
  0x31   :  { %157 = vmatmul.f32.gmra.mxu0 %v28_v62 }
  0x33   :  { %198 = vmatmul.f32.gmra.mxu1 %v29_v63  ;;  %239 = vmatmul.f32.gmra.mxu2 %v30_v0 }
  0x35   :  { %402 = vmatmul.msk.f32.gmra.mxu3 %vm110_vm0, %v51_v5 }
  0x39   :  { %160 = vmatmul.f32.gmra.mxu0 %v32_v2 }
  0x3b   :  { %201 = vmatmul.f32.gmra.mxu1 %v33_v3  ;;  %242 = vmatmul.f32.gmra.mxu2 %v34_v4 }
  0x41   :  { %163 = vmatmul.f32.gmra.mxu0 %v36_v6 }
  0x43   :  { %204 = vmatmul.f32.gmra.mxu1 %v37_v7  ;;  %245 = vmatmul.f32.gmra.mxu2 %v38_v8 }
  0x49   :  { %166 = vmatmul.f32.gmra.mxu0 %v40_v9 }
  0x4b   :  { %207 = vmatmul.f32.gmra.mxu1 %v41_v10  ;;  %248 = vmatmul.f32.gmra.mxu2 %v42_v11 }
  0x51   :  { %169 = vmatmul.f32.gmra.mxu0 %v44_v12 }
  0x53   :  { %210 = vmatmul.f32.gmra.mxu1 %v45_v13  ;;  %251 = vmatmul.f32.gmra.mxu2 %v46_v14 }
  0x59   :  { %172 = vmatmul.f32.gmra.mxu0 %v48_v15 }
  0x5b   :  { %213 = vmatmul.f32.gmra.mxu1 %v49_v16  ;;  %254 = vmatmul.f32.gmra.mxu2 %v50_v17 }
  0x61   :  { %395 = vmatmul.msk.f32.vlgmr.msrb.gmra.mxu0 %vm110_vm0, %v23_v18 }
  0x63   :  { %396 = vmatmul.msk.f32.vlgmr.msrb.gmra.mxu1 %vm110_vm0, %v27_v19  ;;  %398 = vmatmul.msk.f32.vlgmr.msrb.gmra.mxu2 %vm110_vm0, %v35_v20 }
  0x6b   :  { %397 = vmatmul.msk.f32.gmra.mxu1 %vm110_vm0, %v31_v21 }
  0x9c   :  { %v287_v7 = vpop.f32.mrf.mxu3 }
  0x9e   :  { %v152_v22 = vpop.f32.mrf.mxu0 }
  0x9f   :  { %v193_v23 = vpop.f32.mrf.mxu1  ;;  %v153_v45 = vadd.f32 %v430_v42, %v152_v22 }
  0xa1   :  { %v194_v47 = vadd.f32 %v193_v23, %v153_v45 }
  0xa6   :  { %v234_v25 = vpop.f32.mrf.mxu2  ;;  %v155_v26 = vpop.f32.mrf.mxu0 }
  0xa7   :  { %v235_v48 = vadd.f32 %v234_v25, %v194_v47  ;;  %v156_v49 = vadd.f32 %v430_v42, %v155_v26 }
  0xa8   :  { %v196_v27 = vpop.f32.mrf.mxu1  ;;  %v290_v14 = vpop.f32.mrf.mxu3 }
  0xa9   :  { %v197_v54 = vadd.f32 %v196_v27, %v156_v49 }
  0xae   :  { %v237_v28 = vpop.f32.mrf.mxu2  ;;  %v158_v29 = vpop.f32.mrf.mxu0 }
  0xaf   :  { %v238_v56 = vadd.f32 %v237_v28, %v197_v54  ;;  %v159_v57 = vadd.f32 %v430_v42, %v158_v29 }
  0xb0   :  { %v199_v30 = vpop.f32.mrf.mxu1  ;;  %v293_v21 = vpop.f32.mrf.mxu3 }
  0xb1   :  { %v200_v60 = vadd.f32 %v199_v30, %v159_v57 }
  0xb6   :  { %v240_v31 = vpop.f32.mrf.mxu2  ;;  %v161_v32 = vpop.f32.mrf.mxu0 }
  0xb7   :  { %v241_v63 = vadd.f32 %v240_v31, %v200_v60  ;;  %v162_v0 = vadd.f32 %v430_v42, %v161_v32  ;;  %v431_v32 = vld [vmem:[%s792_s4] ss:$0 sm:$0xff] }
  0xb8   :  { %v202_v33 = vpop.f32.mrf.mxu1  ;;  %v296_v29 = vpop.f32.mrf.mxu3 }
  0xb9   :  { %v203_v2 = vadd.f32 %v202_v33, %v162_v0 }
  0xbe   :  { %v164_v34 = vpop.f32.mrf.mxu0  ;;  %v243_v36 = vpop.f32.mrf.mxu2 }
  0xbf   :  { %v244_v5 = vadd.f32 %v243_v36, %v203_v2  ;;  %v165_v6 = vadd.f32 %v430_v42, %v164_v34 }
  0xc0   :  { %v205_v35 = vpop.f32.mrf.mxu1 }
  0xc1   :  { %v206_v9 = vadd.f32 %v205_v35, %v165_v6 }
  0xc6   :  { %v167_v37 = vpop.f32.mrf.mxu0  ;;  %v246_v39 = vpop.f32.mrf.mxu2 }
  0xc7   :  { %v247_v10 = vadd.f32 %v246_v39, %v206_v9  ;;  %v168_v12 = vadd.f32 %v430_v42, %v167_v37 }
  0xc8   :  { %v208_v38 = vpop.f32.mrf.mxu1 }
  0xc9   :  { %v288_v13 = vadd.f32 %v287_v7, %v247_v10  ;;  %v209_v15 = vadd.f32 %v208_v38, %v168_v12 }
  0xcb   :  { %v303_v16 = vmax.f32 %v288_v13, 0.0 }
  0xce   :  { %v170_v40 = vpop.f32.mrf.mxu0  ;;  %v249_v43 = vpop.f32.mrf.mxu2 }
  0xcf   :  { %v250_v17 = vadd.f32 %v249_v43, %v209_v15  ;;  %v171_v18 = vadd.f32 %v430_v42, %v170_v40 }
  0xd0   :  { %v211_v41 = vpop.f32.mrf.mxu1 }
  0xd1   :  { %v291_v19 = vadd.f32 %v290_v14, %v250_v17  ;;  %v212_v20 = vadd.f32 %v211_v41, %v171_v18 }
  0xd3   :  { %v304_v22 = vmax.f32 %v291_v19, 0.0 }
  0xd6   :  { %v173_v44 = vpop.f32.mrf.mxu0  ;;  %v252_v50 = vpop.f32.mrf.mxu2 }
  0xd7   :  { %v253_v23 = vadd.f32 %v252_v50, %v212_v20  ;;  %v174_v24 = vadd.f32 %v430_v42, %v173_v44 }
  0xd8   :  { %v214_v46 = vpop.f32.mrf.mxu1 }
  0xd9   :  { %v294_v25 = vadd.f32 %v293_v21, %v253_v23  ;;  %v215_v26 = vadd.f32 %v214_v46, %v174_v24 }
  0xdb   :  { %v305_v27 = vmax.f32 %v294_v25, 0.0 }
  0xde   :  { %v275_v51 = vpop.f32.mrf.mxu0  ;;  %v255_v59 = vpop.f32.mrf.mxu2 }
  0xdf   :  { %v276_v52 = vadd.f32 %v275_v51, %v235_v48  ;;  %v256_v28 = vadd.f32 %v255_v59, %v215_v26 }
  0xe0   :  { %v278_v53 = vpop.f32.mrf.mxu1 }
  0xe1   :  { %v299_v55 = vmax.f32 %v276_v52, 0.0  ;;  %v279_v58 = vadd.f32 %v278_v53, %v238_v56  ;;  %v297_v30 = vadd.f32 %v296_v29, %v256_v28 }
  0xe3   :  { %404 = vmatmul.msk.f32.vlgmr.msrb.gmra.mxu3 %vm312_vm2, %v299_v55  ;;  %v300_v61 = vmax.f32 %v279_v58, 0.0  ;;  %v306_v31 = vmax.f32 %v297_v30, 0.0 }
  0xe6   :  { %v284_v4 = vpop.f32.mrf.mxu2 }
  0xe7   :  { %v285_v8 = vadd.f32 %v284_v4, %v244_v5 }
  0xe8   :  { %v281_v62 = vpop.f32.mrf.mxu1 }
  0xe9   :  { %v282_v1 = vadd.f32 %v281_v62, %v241_v63  ;;  %v302_v11 = vmax.f32 %v285_v8, 0.0 }
  0xeb   :  { %405 = vmatmul.msk.f32.gmra.mxu3 %vm312_vm2, %v300_v61  ;;  %v301_v3 = vmax.f32 %v282_v1, 0.0 }
  0xf3   :  { %406 = vmatmul.msk.f32.gmra.mxu3 %vm312_vm2, %v301_v3 }
  0xfb   :  { %407 = vmatmul.msk.f32.gmra.mxu3 %vm312_vm2, %v302_v11 }
 0x103   :  { %408 = vmatmul.msk.f32.gmra.mxu3 %vm312_vm2, %v303_v16 }
 0x10b   :  { %409 = vmatmul.msk.f32.gmra.mxu3 %vm312_vm2, %v304_v22 }
 0x113   :  { %410 = vmatmul.msk.f32.gmra.mxu3 %vm312_vm2, %v305_v27 }
 0x11b   :  { %411 = vmatmul.msk.f32.gmra.mxu3 %vm312_vm2, %v306_v31 }
 0x166   :  { %v358_v33 = vpop.f32.mrf.mxu3 }
 0x167   :  { %v359_v34 = vadd.f32 %v431_v32, %v358_v33 }
 0x169   :  { %383 = vst.msk [vmem:[%s794_s5] sm:$0xff] %vm382_vm3, %v359_v34 }
 0x16e   :  { %v361_v35 = vpop.f32.mrf.mxu3 }
 0x16f   :  { %v362_v36 = vadd.f32 %v431_v32, %v361_v35 }
 0x171   :  { %384 = vst.msk [vmem:[%s794_s5 + $0x8] sm:$0xff] %vm382_vm3, %v362_v36 }
 0x176   :  { %v364_v37 = vpop.f32.mrf.mxu3 }
 0x177   :  { %v365_v38 = vadd.f32 %v431_v32, %v364_v37 }
 0x179   :  { %385 = vst.msk [vmem:[%s794_s5 + $0x10] sm:$0xff] %vm382_vm3, %v365_v38 }
 0x17e   :  { %v367_v39 = vpop.f32.mrf.mxu3 }
 0x17f   :  { %v368_v40 = vadd.f32 %v431_v32, %v367_v39 }
 0x181   :  { %386 = vst.msk [vmem:[%s794_s5 + $0x18] sm:$0xff] %vm382_vm3, %v368_v40 }
 0x186   :  { %v370_v41 = vpop.f32.mrf.mxu3 }
 0x187   :  { %v371_v42 = vadd.f32 %v431_v32, %v370_v41 }
 0x189   :  { %387 = vst.msk [vmem:[%s794_s5 + $0x20] sm:$0xff] %vm382_vm3, %v371_v42 }
 0x18e   :  { %v373_v43 = vpop.f32.mrf.mxu3 }
 0x18f   :  { %v374_v44 = vadd.f32 %v431_v32, %v373_v43 }
 0x191   :  { %388 = vst.msk [vmem:[%s794_s5 + $0x28] sm:$0xff] %vm382_vm3, %v374_v44 }
 0x196   :  { %v376_v45 = vpop.f32.mrf.mxu3 }
 0x197   :  { %v377_v46 = vadd.f32 %v431_v32, %v376_v45 }
 0x199   :  { %389 = vst.msk [vmem:[%s794_s5 + $0x30] sm:$0xff] %vm382_vm3, %v377_v46 }
 0x19e   :  { %v379_v47 = vpop.f32.mrf.mxu3 }
 0x19f   :  { %v380_v48 = vadd.f32 %v431_v32, %v379_v47 }
 0x1a1   :  { %390 = vst.msk [vmem:[%s794_s5 + $0x38] sm:$0xff] %vm382_vm3, %v380_v48 }

// kernel: lightunet_forward.9
= control target key start
LH: loop header
LB: loop body
LE: loop exit
PB: predicated region body
PF: predicated region fallthrough
CT: control target
= control target key end

     0   :  { %vm173_vm0 = vcmask 719872   ;;  %vm784_vm1 = vcmask 31744   ;;  %s1825_s1 = inlined_call_operand.vmem [shape: f32[216,4], index: 1, kind: input, shape index: {}]   ;;  %s1826_s0 = inlined_call_operand.vmem [shape: f32[512,216], index: 0, kind: input, shape index: {}]   ;;  %s1827_s2 = inlined_call_operand.vmem [shape: f32[1,4], index: 2, kind: input, shape index: {}]   ;;  %s1828_s3 = inlined_call_operand.vmem [shape: f32[512,4], index: 3, kind: output, shape index: {}]  }
   0x1   :  { %v157_v0 = vld [vmem:[%s1825_s1 + $0x78] sm:$0xff]  ;;  %v168_v1 = vld [vmem:[%s1825_s1 + $0xd0] sm:$0xff]  ;;  %v167_v3 = vld [vmem:[%s1825_s1 + $0xc8] sm:$0xff] }
   0x2   :  { %v156_v2 = vld [vmem:[%s1825_s1 + $0x70] sm:$0xff]  ;;  %917 = vmatpush.msra.mxu2 %v157_v0  ;;  %580 = vmatpush.msra.mxu1 %v168_v1  ;;  %v155_v4 = vld [vmem:[%s1825_s1 + $0x68] sm:$0xff]  ;;  %v166_v5 = vld [vmem:[%s1825_s1 + $0xc0] sm:$0xff] }
   0x3   :  { %366 = vmatpush.msra.mxu0 %v157_v0  ;;  %933 = vmatpush.msra.mxu3 %v168_v1  ;;  %v154_v6 = vld [vmem:[%s1825_s1 + $0x60] sm:$0xff]  ;;  %v165_v7 = vld [vmem:[%s1825_s1 + $0xb8] sm:$0xff]  ;;  %v164_v9 = vld [vmem:[%s1825_s1 + $0xb0] sm:$0xff] }
   0x4   :  { %918 = vmatpush.msra.mxu2 %v156_v2  ;;  %581 = vmatpush.msra.mxu1 %v167_v3  ;;  %v153_v8 = vld [vmem:[%s1825_s1 + $0x58] sm:$0xff]  ;;  %v152_v10 = vld [vmem:[%s1825_s1 + $0x50] sm:$0xff]  ;;  %v163_v11 = vld [vmem:[%s1825_s1 + $0xa8] sm:$0xff] }
   0x5   :  { %367 = vmatpush.msra.mxu0 %v156_v2  ;;  %934 = vmatpush.msra.mxu3 %v167_v3  ;;  %v151_v12 = vld [vmem:[%s1825_s1 + $0x48] sm:$0xff]  ;;  %v162_v13 = vld [vmem:[%s1825_s1 + $0xa0] sm:$0xff]  ;;  %v161_v15 = vld [vmem:[%s1825_s1 + $0x98] sm:$0xff] }
   0x6   :  { %919 = vmatpush.msra.mxu2 %v155_v4  ;;  %582 = vmatpush.msra.mxu1 %v166_v5  ;;  %v150_v14 = vld [vmem:[%s1825_s1 + $0x40] sm:$0xff]  ;;  %v149_v16 = vld [vmem:[%s1825_s1 + $0x38] sm:$0xff]  ;;  %v160_v17 = vld [vmem:[%s1825_s1 + $0x90] sm:$0xff] }
   0x7   :  { %368 = vmatpush.msra.mxu0 %v155_v4  ;;  %935 = vmatpush.msra.mxu3 %v166_v5  ;;  %v148_v18 = vld [vmem:[%s1825_s1 + $0x30] sm:$0xff]  ;;  %v159_v19 = vld [vmem:[%s1825_s1 + $0x88] sm:$0xff]  ;;  %v158_v21 = vld [vmem:[%s1825_s1 + $0x80] sm:$0xff] }
   0x8   :  { %920 = vmatpush.msra.mxu2 %v154_v6  ;;  %583 = vmatpush.msra.mxu1 %v165_v7  ;;  %v147_v20 = vld [vmem:[%s1825_s1 + $0x28] sm:$0xff]  ;;  %v146_v23 = vld [vmem:[%s1825_s1 + $0x20] sm:$0xff]  ;;  %v81_v24 = vld [vmem:[%s1826_s0 + $0x218] sm:$0xff] }
   0x9   :  { %369 = vmatpush.msra.mxu0 %v154_v6  ;;  %936 = vmatpush.msra.mxu3 %v165_v7  ;;  %v15_v22 = vld [vmem:[%s1826_s0 + $0x8] sm:$0xff]  ;;  %v145_v25 = vld [vmem:[%s1825_s1 + $0x18] sm:$0xff]  ;;  %v144_v26 = vld [vmem:[%s1825_s1 + $0x10] sm:$0xff] }
   0xa   :  { %921 = vmatpush.msra.mxu2 %v153_v8  ;;  %584 = vmatpush.msra.mxu1 %v164_v9  ;;  %v143_v27 = vld [vmem:[%s1825_s1 + $0x8] sm:$0xff]  ;;  %v17_v28 = vld [vmem:[%s1826_s0 + $0x18] sm:$0xff]  ;;  %v142_v29 = vld [vmem:[%s1825_s1] sm:$0xff] }
   0xb   :  { %370 = vmatpush.msra.mxu0 %v153_v8  ;;  %937 = vmatpush.msra.mxu3 %v164_v9  ;;  %v76_v30 = vld [vmem:[%s1826_s0 + $0x1f0] sm:$0xff]  ;;  %v14_v31 = vld [vmem:[%s1826_s0] sm:$0xff]  ;;  %v83_v32 = vld [vmem:[%s1826_s0 + $0x228] sm:$0xff] }
   0xc   :  { %922 = vmatpush.msra.mxu2 %v152_v10  ;;  %585 = vmatpush.msra.mxu1 %v163_v11  ;;  %v19_v33 = vld [vmem:[%s1826_s0 + $0x28] sm:$0xff]  ;;  %v78_v34 = vld [vmem:[%s1826_s0 + $0x200] sm:$0xff]  ;;  %v16_v35 = vld [vmem:[%s1826_s0 + $0x10] sm:$0xff] }
   0xd   :  { %371 = vmatpush.msra.mxu0 %v152_v10  ;;  %938 = vmatpush.msra.mxu3 %v163_v11  ;;  %v85_v36 = vld [vmem:[%s1826_s0 + $0x238] sm:$0xff]  ;;  %v80_v38 = vld [vmem:[%s1826_s0 + $0x210] sm:$0xff]  ;;  %v18_v39 = vld [vmem:[%s1826_s0 + $0x20] sm:$0xff] }
   0xe   :  { %923 = vmatpush.msra.mxu2 %v151_v12  ;;  %586 = vmatpush.msra.mxu1 %v162_v13  ;;  %v21_v37 = vld [vmem:[%s1826_s0 + $0x38] sm:$0xff]  ;;  %v87_v40 = vld [vmem:[%s1826_s0 + $0x248] sm:$0xff]  ;;  %v82_v42 = vld [vmem:[%s1826_s0 + $0x220] sm:$0xff] }
   0xf   :  { %372 = vmatpush.msra.mxu0 %v151_v12  ;;  %939 = vmatpush.msra.mxu3 %v162_v13  ;;  %v23_v41 = vld [vmem:[%s1826_s0 + $0x48] sm:$0xff]  ;;  %v20_v43 = vld [vmem:[%s1826_s0 + $0x30] sm:$0xff]  ;;  %v89_v44 = vld [vmem:[%s1826_s0 + $0x258] sm:$0xff] }
  0x10   :  { %924 = vmatpush.msra.mxu2 %v150_v14  ;;  %587 = vmatpush.msra.mxu1 %v161_v15  ;;  %v25_v45 = vld [vmem:[%s1826_s0 + $0x58] sm:$0xff]  ;;  %v84_v46 = vld [vmem:[%s1826_s0 + $0x230] sm:$0xff]  ;;  %v22_v47 = vld [vmem:[%s1826_s0 + $0x40] sm:$0xff] }
  0x11   :  { %373 = vmatpush.msra.mxu0 %v150_v14  ;;  %940 = vmatpush.msra.mxu3 %v161_v15  ;;  %v91_v48 = vld [vmem:[%s1826_s0 + $0x268] sm:$0xff]  ;;  %v86_v50 = vld [vmem:[%s1826_s0 + $0x240] sm:$0xff]  ;;  %v24_v51 = vld [vmem:[%s1826_s0 + $0x50] sm:$0xff] }
  0x12   :  { %925 = vmatpush.msra.mxu2 %v149_v16  ;;  %588 = vmatpush.msra.mxu1 %v160_v17  ;;  %v27_v49 = vld [vmem:[%s1826_s0 + $0x68] sm:$0xff]  ;;  %v93_v52 = vld [vmem:[%s1826_s0 + $0x278] sm:$0xff]  ;;  %v88_v54 = vld [vmem:[%s1826_s0 + $0x250] sm:$0xff] }
  0x13   :  { %374 = vmatpush.msra.mxu0 %v149_v16  ;;  %941 = vmatpush.msra.mxu3 %v160_v17  ;;  %v29_v53 = vld [vmem:[%s1826_s0 + $0x78] sm:$0xff]  ;;  %v26_v55 = vld [vmem:[%s1826_s0 + $0x60] sm:$0xff]  ;;  %v95_v56 = vld [vmem:[%s1826_s0 + $0x288] sm:$0xff] }
  0x14   :  { %926 = vmatpush.msra.mxu2 %v148_v18  ;;  %589 = vmatpush.msra.mxu1 %v159_v19  ;;  %v31_v57 = vld [vmem:[%s1826_s0 + $0x88] sm:$0xff]  ;;  %v90_v58 = vld [vmem:[%s1826_s0 + $0x260] sm:$0xff]  ;;  %v28_v59 = vld [vmem:[%s1826_s0 + $0x70] sm:$0xff] }
  0x15   :  { %375 = vmatpush.msra.mxu0 %v148_v18  ;;  %942 = vmatpush.msra.mxu3 %v159_v19  ;;  %v97_v60 = vld [vmem:[%s1826_s0 + $0x298] sm:$0xff]  ;;  %v92_v62 = vld [vmem:[%s1826_s0 + $0x270] sm:$0xff]  ;;  %v30_v63 = vld [vmem:[%s1826_s0 + $0x80] sm:$0xff] }
  0x16   :  { %927 = vmatpush.msra.mxu2 %v147_v20  ;;  %590 = vmatpush.msra.mxu1 %v158_v21  ;;  %v33_v61 = vld [vmem:[%s1826_s0 + $0x98] sm:$0xff]  ;;  %v99_v0 = vld [vmem:[%s1826_s0 + $0x2a8] sm:$0xff]  ;;  %v94_v2 = vld [vmem:[%s1826_s0 + $0x280] sm:$0xff] }
  0x17   :  { %853 = vmatmul.msk.f32.vlgmr.msra.gmra.mxu1 %vm173_vm0, %v15_v22  ;;  %376 = vmatpush.msra.mxu0 %v147_v20  ;;  %v35_v1 = vld [vmem:[%s1826_s0 + $0xa8] sm:$0xff]  ;;  %v32_v3 = vld [vmem:[%s1826_s0 + $0x90] sm:$0xff]  ;;  %v101_v4 = vld [vmem:[%s1826_s0 + $0x2b8] sm:$0xff] }
  0x18   :  { %928 = vmatpush.msra.mxu2 %v146_v23  ;;  %943 = vmatpush.msra.mxu3 %v158_v21  ;;  %v37_v5 = vld [vmem:[%s1826_s0 + $0xb8] sm:$0xff]  ;;  %v96_v6 = vld [vmem:[%s1826_s0 + $0x290] sm:$0xff]  ;;  %v34_v7 = vld [vmem:[%s1826_s0 + $0xa0] sm:$0xff] }
  0x19   :  { %377 = vmatpush.msra.mxu0 %v146_v23  ;;  %886 = vmatmul.msk.f32.vlgmr.msra.gmra.mxu3 %vm173_vm0, %v81_v24  ;;  %v103_v8 = vld [vmem:[%s1826_s0 + $0x2c8] sm:$0xff]  ;;  %v98_v10 = vld [vmem:[%s1826_s0 + $0x2a0] sm:$0xff]  ;;  %v36_v11 = vld [vmem:[%s1826_s0 + $0xb0] sm:$0xff] }
  0x1a   :  { %929 = vmatpush.msra.mxu2 %v145_v25  ;;  %v39_v9 = vld [vmem:[%s1826_s0 + $0xc8] sm:$0xff]  ;;  %v105_v12 = vld [vmem:[%s1826_s0 + $0x2d8] sm:$0xff]  ;;  %v100_v14 = vld [vmem:[%s1826_s0 + $0x2b0] sm:$0xff] }
  0x1b   :  { %378 = vmatpush.msra.mxu0 %v145_v25  ;;  %v41_v13 = vld [vmem:[%s1826_s0 + $0xd8] sm:$0xff]  ;;  %v38_v15 = vld [vmem:[%s1826_s0 + $0xc0] sm:$0xff]  ;;  %v107_v16 = vld [vmem:[%s1826_s0 + $0x2e8] sm:$0xff] }
  0x1c   :  { %930 = vmatpush.msra.mxu2 %v144_v26  ;;  %v43_v17 = vld [vmem:[%s1826_s0 + $0xe8] sm:$0xff]  ;;  %v102_v18 = vld [vmem:[%s1826_s0 + $0x2c0] sm:$0xff]  ;;  %v40_v19 = vld [vmem:[%s1826_s0 + $0xd0] sm:$0xff] }
  0x1d   :  { %379 = vmatpush.msra.mxu0 %v144_v26  ;;  %v109_v20 = vld [vmem:[%s1826_s0 + $0x2f8] sm:$0xff]  ;;  %v104_v22 = vld [vmem:[%s1826_s0 + $0x2d0] sm:$0xff]  ;;  %v42_v23 = vld [vmem:[%s1826_s0 + $0xe0] sm:$0xff] }
  0x1e   :  { %931 = vmatpush.msra.mxu2 %v143_v27  ;;  %v45_v21 = vld [vmem:[%s1826_s0 + $0xf8] sm:$0xff]  ;;  %v111_v24 = vld [vmem:[%s1826_s0 + $0x308] sm:$0xff] }
  0x1f   :  { %854 = vmatmul.msk.f32.gmra.mxu1 %vm173_vm0, %v17_v28  ;;  %380 = vmatpush.msra.mxu0 %v143_v27  ;;  %v47_v26 = vld [vmem:[%s1826_s0 + $0x108] sm:$0xff]  ;;  %v106_v27 = vld [vmem:[%s1826_s0 + $0x2e0] sm:$0xff]  ;;  %v44_v28 = vld [vmem:[%s1826_s0 + $0xf0] sm:$0xff] }
  0x20   :  { %932 = vmatpush.msra.mxu2 %v142_v29 }
  0x21   :  { %475 = vmatmul.f32.vlgmr.msra.gmra.mxu2 %v76_v30  ;;  %381 = vmatpush.msra.mxu0 %v142_v29  ;;  %v113_v29 = vld [vmem:[%s1826_s0 + $0x318] sm:$0xff] }
  0x22   :  { %382 = vmatmul.f32.vlgmr.msra.gmra.mxu0 %v14_v31  ;;  %887 = vmatmul.msk.f32.gmra.mxu3 %vm173_vm0, %v83_v32  ;;  %v49_v31 = vld [vmem:[%s1826_s0 + $0x118] sm:$0xff]  ;;  %v1284_v32 = vld [vmem:[%s1827_s2] ss:$0 sm:$0xff] }
  0x27   :  { %855 = vmatmul.msk.f32.gmra.mxu1 %vm173_vm0, %v19_v33 }
  0x29   :  { %478 = vmatmul.f32.gmra.mxu2 %v78_v34  ;;  %v108_v34 = vld [vmem:[%s1826_s0 + $0x2f0] sm:$0xff] }
  0x2a   :  { %385 = vmatmul.f32.gmra.mxu0 %v16_v35  ;;  %888 = vmatmul.msk.f32.gmra.mxu3 %vm173_vm0, %v85_v36  ;;  %v46_v36 = vld [vmem:[%s1826_s0 + $0x100] sm:$0xff] }
  0x2f   :  { %856 = vmatmul.msk.f32.gmra.mxu1 %vm173_vm0, %v21_v37  ;;  %v115_v37 = vld [vmem:[%s1826_s0 + $0x328] sm:$0xff] }
  0x31   :  { %481 = vmatmul.f32.gmra.mxu2 %v80_v38 }
  0x32   :  { %388 = vmatmul.f32.gmra.mxu0 %v18_v39  ;;  %889 = vmatmul.msk.f32.gmra.mxu3 %vm173_vm0, %v87_v40 }
  0x37   :  { %857 = vmatmul.msk.f32.gmra.mxu1 %vm173_vm0, %v23_v41 }
  0x39   :  { %484 = vmatmul.f32.gmra.mxu2 %v82_v42  ;;  %v51_v42 = vld [vmem:[%s1826_s0 + $0x128] sm:$0xff] }
  0x3a   :  { %391 = vmatmul.f32.gmra.mxu0 %v20_v43  ;;  %890 = vmatmul.msk.f32.gmra.mxu3 %vm173_vm0, %v89_v44  ;;  %v110_v44 = vld [vmem:[%s1826_s0 + $0x300] sm:$0xff] }
  0x3f   :  { %858 = vmatmul.msk.f32.gmra.mxu1 %vm173_vm0, %v25_v45 }
  0x41   :  { %487 = vmatmul.f32.gmra.mxu2 %v84_v46  ;;  %v48_v46 = vld [vmem:[%s1826_s0 + $0x110] sm:$0xff] }
  0x42   :  { %394 = vmatmul.f32.gmra.mxu0 %v22_v47  ;;  %891 = vmatmul.msk.f32.gmra.mxu3 %vm173_vm0, %v91_v48  ;;  %v117_v47 = vld [vmem:[%s1826_s0 + $0x338] sm:$0xff] }
  0x47   :  { %859 = vmatmul.msk.f32.gmra.mxu1 %vm173_vm0, %v27_v49 }
  0x49   :  { %490 = vmatmul.f32.gmra.mxu2 %v86_v50 }
  0x4a   :  { %397 = vmatmul.f32.gmra.mxu0 %v24_v51  ;;  %892 = vmatmul.msk.f32.gmra.mxu3 %vm173_vm0, %v93_v52  ;;  %v53_v52 = vld [vmem:[%s1826_s0 + $0x138] sm:$0xff] }
  0x4f   :  { %860 = vmatmul.msk.f32.gmra.mxu1 %vm173_vm0, %v29_v53 }
  0x51   :  { %493 = vmatmul.f32.gmra.mxu2 %v88_v54  ;;  %v112_v54 = vld [vmem:[%s1826_s0 + $0x310] sm:$0xff] }
  0x52   :  { %400 = vmatmul.f32.gmra.mxu0 %v26_v55  ;;  %893 = vmatmul.msk.f32.gmra.mxu3 %vm173_vm0, %v95_v56  ;;  %v50_v56 = vld [vmem:[%s1826_s0 + $0x120] sm:$0xff] }
  0x57   :  { %861 = vmatmul.msk.f32.gmra.mxu1 %vm173_vm0, %v31_v57  ;;  %v119_v57 = vld [vmem:[%s1826_s0 + $0x348] sm:$0xff] }
  0x59   :  { %496 = vmatmul.f32.gmra.mxu2 %v90_v58 }
  0x5a   :  { %403 = vmatmul.f32.gmra.mxu0 %v28_v59  ;;  %894 = vmatmul.msk.f32.gmra.mxu3 %vm173_vm0, %v97_v60 }
  0x5f   :  { %862 = vmatmul.msk.f32.gmra.mxu1 %vm173_vm0, %v33_v61 }
  0x61   :  { %499 = vmatmul.f32.gmra.mxu2 %v92_v62  ;;  %v55_v62 = vld [vmem:[%s1826_s0 + $0x148] sm:$0xff] }
  0x62   :  { %406 = vmatmul.f32.gmra.mxu0 %v30_v63  ;;  %895 = vmatmul.msk.f32.gmra.mxu3 %vm173_vm0, %v99_v0 }
  0x67   :  { %863 = vmatmul.msk.f32.gmra.mxu1 %vm173_vm0, %v35_v1  ;;  %v114_v1 = vld [vmem:[%s1826_s0 + $0x320] sm:$0xff] }
  0x69   :  { %502 = vmatmul.f32.gmra.mxu2 %v94_v2 }
  0x6a   :  { %409 = vmatmul.f32.gmra.mxu0 %v32_v3  ;;  %896 = vmatmul.msk.f32.gmra.mxu3 %vm173_vm0, %v101_v4  ;;  %v52_v4 = vld [vmem:[%s1826_s0 + $0x130] sm:$0xff] }
  0x6f   :  { %864 = vmatmul.msk.f32.gmra.mxu1 %vm173_vm0, %v37_v5  ;;  %v121_v5 = vld [vmem:[%s1826_s0 + $0x358] sm:$0xff] }
  0x71   :  { %505 = vmatmul.f32.gmra.mxu2 %v96_v6 }
  0x72   :  { %412 = vmatmul.f32.gmra.mxu0 %v34_v7  ;;  %897 = vmatmul.msk.f32.gmra.mxu3 %vm173_vm0, %v103_v8 }
  0x77   :  { %865 = vmatmul.msk.f32.gmra.mxu1 %vm173_vm0, %v39_v9 }
  0x79   :  { %508 = vmatmul.f32.gmra.mxu2 %v98_v10  ;;  %v57_v10 = vld [vmem:[%s1826_s0 + $0x158] sm:$0xff] }
  0x7a   :  { %415 = vmatmul.f32.gmra.mxu0 %v36_v11  ;;  %898 = vmatmul.msk.f32.gmra.mxu3 %vm173_vm0, %v105_v12 }
  0x7f   :  { %866 = vmatmul.msk.f32.gmra.mxu1 %vm173_vm0, %v41_v13  ;;  %v116_v13 = vld [vmem:[%s1826_s0 + $0x330] sm:$0xff] }
  0x81   :  { %511 = vmatmul.f32.gmra.mxu2 %v100_v14 }
  0x82   :  { %418 = vmatmul.f32.gmra.mxu0 %v38_v15  ;;  %899 = vmatmul.msk.f32.gmra.mxu3 %vm173_vm0, %v107_v16  ;;  %v54_v16 = vld [vmem:[%s1826_s0 + $0x140] sm:$0xff] }
  0x87   :  { %867 = vmatmul.msk.f32.gmra.mxu1 %vm173_vm0, %v43_v17  ;;  %v123_v17 = vld [vmem:[%s1826_s0 + $0x368] sm:$0xff] }
  0x89   :  { %514 = vmatmul.f32.gmra.mxu2 %v102_v18 }
  0x8a   :  { %421 = vmatmul.f32.gmra.mxu0 %v40_v19  ;;  %900 = vmatmul.msk.f32.gmra.mxu3 %vm173_vm0, %v109_v20 }
  0x8f   :  { %868 = vmatmul.msk.f32.gmra.mxu1 %vm173_vm0, %v45_v21 }
  0x91   :  { %517 = vmatmul.f32.gmra.mxu2 %v104_v22  ;;  %v59_v22 = vld [vmem:[%s1826_s0 + $0x168] sm:$0xff] }
  0x92   :  { %424 = vmatmul.f32.gmra.mxu0 %v42_v23  ;;  %901 = vmatmul.msk.f32.gmra.mxu3 %vm173_vm0, %v111_v24 }
  0x94   :  { %v592_v25 = vpop.f32.mrf.mxu1 }
  0x97   :  { %869 = vmatmul.msk.f32.gmra.mxu1 %vm173_vm0, %v47_v26 }
  0x99   :  { %520 = vmatmul.f32.gmra.mxu2 %v106_v27 }
  0x9a   :  { %427 = vmatmul.f32.gmra.mxu0 %v44_v28  ;;  %902 = vmatmul.msk.f32.gmra.mxu3 %vm173_vm0, %v113_v29  ;;  %v56_v28 = vld [vmem:[%s1826_s0 + $0x150] sm:$0xff]  ;;  %v125_v29 = vld [vmem:[%s1826_s0 + $0x378] sm:$0xff] }
  0x9c   :  { %v595_v30 = vpop.f32.mrf.mxu1  ;;  %v691_v33 = vpop.f32.mrf.mxu3 }
  0x9f   :  { %870 = vmatmul.msk.f32.gmra.mxu1 %vm173_vm0, %v49_v31  ;;  %v383_v35 = vpop.f32.mrf.mxu0 }
  0xa0   :  { %v384_v38 = vadd.f32 %v1284_v32, %v383_v35  ;;  %v61_v35 = vld [vmem:[%s1826_s0 + $0x178] sm:$0xff] }
  0xa1   :  { %523 = vmatmul.f32.gmra.mxu2 %v108_v34 }
  0xa2   :  { %v593_v39 = vadd.f32 %v592_v25, %v384_v38  ;;  %430 = vmatmul.f32.gmra.mxu0 %v46_v36  ;;  %903 = vmatmul.msk.f32.gmra.mxu3 %vm173_vm0, %v115_v37  ;;  %v118_v25 = vld [vmem:[%s1826_s0 + $0x340] sm:$0xff]  ;;  %v120_v38 = vld [vmem:[%s1826_s0 + $0x350] sm:$0xff] }
  0xa4   :  { %785 = vst.msk [vmem:[%s1828_s3] sm:$0xff] %vm784_vm1, %v593_v39  ;;  %v1302_v40 = vpop.f32.mrf.mxu2  ;;  %v598_v41 = vpop.f32.mrf.mxu1 }
  0xa5   :  { %v694_v43 = vpop.f32.mrf.mxu3 }
  0xa7   :  { %871 = vmatmul.msk.f32.gmra.mxu1 %vm173_vm0, %v51_v42  ;;  %v386_v45 = vpop.f32.mrf.mxu0  ;;  %v58_v42 = vld [vmem:[%s1826_s0 + $0x160] sm:$0xff] }
  0xa8   :  { %v387_v48 = vadd.f32 %v1284_v32, %v386_v45 }
  0xa9   :  { %526 = vmatmul.f32.gmra.mxu2 %v110_v44 }
  0xaa   :  { %v596_v49 = vadd.f32 %v595_v30, %v387_v48  ;;  %433 = vmatmul.f32.gmra.mxu0 %v48_v46  ;;  %904 = vmatmul.msk.f32.gmra.mxu3 %vm173_vm0, %v117_v47  ;;  %v63_v48 = vld [vmem:[%s1826_s0 + $0x188] sm:$0xff] }
  0xac   :  { %786 = vst.msk [vmem:[%s1828_s3 + $0x8] sm:$0xff] %vm784_vm1, %v596_v49  ;;  %v1323_v50 = vpop.f32.mrf.mxu2  ;;  %v601_v51 = vpop.f32.mrf.mxu1 }
  0xad   :  { %v697_v53 = vpop.f32.mrf.mxu3 }
  0xaf   :  { %872 = vmatmul.msk.f32.gmra.mxu1 %vm173_vm0, %v53_v52  ;;  %v389_v55 = vpop.f32.mrf.mxu0  ;;  %v122_v52 = vld [vmem:[%s1826_s0 + $0x360] sm:$0xff] }
  0xb0   :  { %v390_v58 = vadd.f32 %v1284_v32, %v389_v55  ;;  %v60_v55 = vld [vmem:[%s1826_s0 + $0x170] sm:$0xff] }
  0xb1   :  { %529 = vmatmul.f32.gmra.mxu2 %v112_v54 }
  0xb2   :  { %v599_v59 = vadd.f32 %v598_v41, %v390_v58  ;;  %436 = vmatmul.f32.gmra.mxu0 %v50_v56  ;;  %905 = vmatmul.msk.f32.gmra.mxu3 %vm173_vm0, %v119_v57  ;;  %v129_v56 = vld [vmem:[%s1826_s0 + $0x398] sm:$0xff] }
  0xb4   :  { %787 = vst.msk [vmem:[%s1828_s3 + $0x10] sm:$0xff] %vm784_vm1, %v599_v59  ;;  %v482_v60 = vpop.f32.mrf.mxu2  ;;  %v604_v61 = vpop.f32.mrf.mxu1 }
  0xb5   :  { %v483_v63 = vadd.f32 %v1284_v32, %v482_v60  ;;  %v700_v0 = vpop.f32.mrf.mxu3 }
  0xb7   :  { %v692_v2 = vadd.f32 %v691_v33, %v483_v63  ;;  %873 = vmatmul.msk.f32.gmra.mxu1 %vm173_vm0, %v55_v62  ;;  %v392_v3 = vpop.f32.mrf.mxu0 }
  0xb8   :  { %v393_v6 = vadd.f32 %v1284_v32, %v392_v3  ;;  %v62_v3 = vld [vmem:[%s1826_s0 + $0x180] sm:$0xff] }
  0xb9   :  { %818 = vst.msk [vmem:[%s1828_s3 + $0x108] sm:$0xff] %vm784_vm1, %v692_v2  ;;  %532 = vmatmul.f32.gmra.mxu2 %v114_v1 }
  0xba   :  { %v602_v7 = vadd.f32 %v601_v51, %v393_v6  ;;  %439 = vmatmul.f32.gmra.mxu0 %v52_v4  ;;  %906 = vmatmul.msk.f32.gmra.mxu3 %vm173_vm0, %v121_v5  ;;  %v131_v4 = vld [vmem:[%s1826_s0 + $0x3a8] sm:$0xff] }
  0xbc   :  { %788 = vst.msk [vmem:[%s1828_s3 + $0x18] sm:$0xff] %vm784_vm1, %v602_v7  ;;  %v485_v8 = vpop.f32.mrf.mxu2  ;;  %v607_v9 = vpop.f32.mrf.mxu1 }
  0xbd   :  { %v486_v11 = vadd.f32 %v1284_v32, %v485_v8  ;;  %v703_v12 = vpop.f32.mrf.mxu3 }
  0xbf   :  { %v695_v14 = vadd.f32 %v694_v43, %v486_v11  ;;  %874 = vmatmul.msk.f32.gmra.mxu1 %vm173_vm0, %v57_v10  ;;  %v395_v15 = vpop.f32.mrf.mxu0  ;;  %v127_v43 = vld [vmem:[%s1826_s0 + $0x388] sm:$0xff] }
  0xc0   :  { %v396_v18 = vadd.f32 %v1284_v32, %v395_v15  ;;  %v64_v15 = vld [vmem:[%s1826_s0 + $0x190] sm:$0xff] }
  0xc1   :  { %819 = vst.msk [vmem:[%s1828_s3 + $0x110] sm:$0xff] %vm784_vm1, %v695_v14  ;;  %535 = vmatmul.f32.gmra.mxu2 %v116_v13 }
  0xc2   :  { %v605_v19 = vadd.f32 %v604_v61, %v396_v18  ;;  %442 = vmatmul.f32.gmra.mxu0 %v54_v16  ;;  %907 = vmatmul.msk.f32.gmra.mxu3 %vm173_vm0, %v123_v17  ;;  %v65_v61 = vld [vmem:[%s1826_s0 + $0x198] sm:$0xff] }
  0xc3   :  { %v133_v16 = vld [vmem:[%s1826_s0 + $0x3b8] sm:$0xff] }
  0xc4   :  { %789 = vst.msk [vmem:[%s1828_s3 + $0x20] sm:$0xff] %vm784_vm1, %v605_v19  ;;  %v488_v20 = vpop.f32.mrf.mxu2  ;;  %v610_v21 = vpop.f32.mrf.mxu1 }
  0xc5   :  { %v489_v23 = vadd.f32 %v1284_v32, %v488_v20  ;;  %v706_v24 = vpop.f32.mrf.mxu3 }
  0xc7   :  { %v698_v26 = vadd.f32 %v697_v53, %v489_v23  ;;  %875 = vmatmul.msk.f32.gmra.mxu1 %vm173_vm0, %v59_v22  ;;  %v398_v27 = vpop.f32.mrf.mxu0 }
  0xc8   :  { %v399_v30 = vadd.f32 %v1284_v32, %v398_v27  ;;  %v66_v27 = vld [vmem:[%s1826_s0 + $0x1a0] sm:$0xff] }
  0xc9   :  { %820 = vst.msk [vmem:[%s1828_s3 + $0x118] sm:$0xff] %vm784_vm1, %v698_v26  ;;  %538 = vmatmul.f32.gmra.mxu2 %v118_v25 }
  0xca   :  { %v608_v31 = vadd.f32 %v607_v9, %v399_v30  ;;  %445 = vmatmul.f32.gmra.mxu0 %v56_v28  ;;  %908 = vmatmul.msk.f32.gmra.mxu3 %vm173_vm0, %v125_v29  ;;  %v67_v9 = vld [vmem:[%s1826_s0 + $0x1a8] sm:$0xff] }
  0xcb   :  { %v135_v28 = vld [vmem:[%s1826_s0 + $0x3c8] sm:$0xff] }
  0xcc   :  { %790 = vst.msk [vmem:[%s1828_s3 + $0x28] sm:$0xff] %vm784_vm1, %v608_v31  ;;  %v491_v33 = vpop.f32.mrf.mxu2  ;;  %v613_v34 = vpop.f32.mrf.mxu1 }
  0xcd   :  { %v492_v36 = vadd.f32 %v1284_v32, %v491_v33  ;;  %v709_v37 = vpop.f32.mrf.mxu3 }
  0xcf   :  { %v701_v39 = vadd.f32 %v700_v0, %v492_v36  ;;  %876 = vmatmul.msk.f32.gmra.mxu1 %vm173_vm0, %v61_v35  ;;  %v401_v41 = vpop.f32.mrf.mxu0  ;;  %v124_v0 = vld [vmem:[%s1826_s0 + $0x370] sm:$0xff] }
  0xd0   :  { %v402_v44 = vadd.f32 %v1284_v32, %v401_v41  ;;  %v68_v41 = vld [vmem:[%s1826_s0 + $0x1b0] sm:$0xff] }
  0xd1   :  { %821 = vst.msk [vmem:[%s1828_s3 + $0x120] sm:$0xff] %vm784_vm1, %v701_v39  ;;  %541 = vmatmul.f32.gmra.mxu2 %v120_v38 }
  0xd2   :  { %v611_v45 = vadd.f32 %v610_v21, %v402_v44  ;;  %448 = vmatmul.f32.gmra.mxu0 %v58_v42  ;;  %909 = vmatmul.msk.f32.gmra.mxu3 %vm173_vm0, %v127_v43  ;;  %v69_v21 = vld [vmem:[%s1826_s0 + $0x1b8] sm:$0xff] }
  0xd3   :  { %v137_v42 = vld [vmem:[%s1826_s0 + $0x3d8] sm:$0xff] }
  0xd4   :  { %791 = vst.msk [vmem:[%s1828_s3 + $0x30] sm:$0xff] %vm784_vm1, %v611_v45  ;;  %v494_v46 = vpop.f32.mrf.mxu2  ;;  %v616_v47 = vpop.f32.mrf.mxu1 }
  0xd5   :  { %v495_v49 = vadd.f32 %v1284_v32, %v494_v46  ;;  %v712_v51 = vpop.f32.mrf.mxu3 }
  0xd7   :  { %v704_v53 = vadd.f32 %v703_v12, %v495_v49  ;;  %877 = vmatmul.msk.f32.gmra.mxu1 %vm173_vm0, %v63_v48  ;;  %v404_v54 = vpop.f32.mrf.mxu0  ;;  %v126_v12 = vld [vmem:[%s1826_s0 + $0x380] sm:$0xff] }
  0xd8   :  { %v405_v57 = vadd.f32 %v1284_v32, %v404_v54  ;;  %v70_v54 = vld [vmem:[%s1826_s0 + $0x1c0] sm:$0xff] }
  0xd9   :  { %822 = vst.msk [vmem:[%s1828_s3 + $0x128] sm:$0xff] %vm784_vm1, %v704_v53  ;;  %544 = vmatmul.f32.gmra.mxu2 %v122_v52 }
  0xda   :  { %v614_v58 = vadd.f32 %v613_v34, %v405_v57  ;;  %451 = vmatmul.f32.gmra.mxu0 %v60_v55  ;;  %910 = vmatmul.msk.f32.gmra.mxu3 %vm173_vm0, %v129_v56  ;;  %v71_v34 = vld [vmem:[%s1826_s0 + $0x1c8] sm:$0xff] }
  0xdb   :  { %v139_v55 = vld [vmem:[%s1826_s0 + $0x3e8] sm:$0xff] }
  0xdc   :  { %792 = vst.msk [vmem:[%s1828_s3 + $0x38] sm:$0xff] %vm784_vm1, %v614_v58  ;;  %v497_v59 = vpop.f32.mrf.mxu2  ;;  %v619_v60 = vpop.f32.mrf.mxu1 }
  0xdd   :  { %v498_v62 = vadd.f32 %v1284_v32, %v497_v59  ;;  %v715_v63 = vpop.f32.mrf.mxu3 }
  0xdf   :  { %v707_v1 = vadd.f32 %v706_v24, %v498_v62  ;;  %878 = vmatmul.msk.f32.gmra.mxu1 %vm173_vm0, %v65_v61  ;;  %v407_v2 = vpop.f32.mrf.mxu0  ;;  %v128_v24 = vld [vmem:[%s1826_s0 + $0x390] sm:$0xff] }
  0xe0   :  { %v408_v5 = vadd.f32 %v1284_v32, %v407_v2  ;;  %v72_v2 = vld [vmem:[%s1826_s0 + $0x1d0] sm:$0xff] }
  0xe1   :  { %823 = vst.msk [vmem:[%s1828_s3 + $0x130] sm:$0xff] %vm784_vm1, %v707_v1  ;;  %547 = vmatmul.f32.gmra.mxu2 %v124_v0 }
  0xe2   :  { %v617_v6 = vadd.f32 %v616_v47, %v408_v5  ;;  %454 = vmatmul.f32.gmra.mxu0 %v62_v3  ;;  %911 = vmatmul.msk.f32.gmra.mxu3 %vm173_vm0, %v131_v4  ;;  %v73_v47 = vld [vmem:[%s1826_s0 + $0x1d8] sm:$0xff] }
  0xe3   :  { %v141_v3 = vld [vmem:[%s1826_s0 + $0x3f8] sm:$0xff] }
  0xe4   :  { %793 = vst.msk [vmem:[%s1828_s3 + $0x40] sm:$0xff] %vm784_vm1, %v617_v6  ;;  %v500_v7 = vpop.f32.mrf.mxu2  ;;  %v622_v8 = vpop.f32.mrf.mxu1 }
  0xe5   :  { %v501_v10 = vadd.f32 %v1284_v32, %v500_v7  ;;  %v718_v11 = vpop.f32.mrf.mxu3 }
  0xe7   :  { %v710_v13 = vadd.f32 %v709_v37, %v501_v10  ;;  %879 = vmatmul.msk.f32.gmra.mxu1 %vm173_vm0, %v67_v9  ;;  %v410_v14 = vpop.f32.mrf.mxu0  ;;  %v130_v37 = vld [vmem:[%s1826_s0 + $0x3a0] sm:$0xff] }
  0xe8   :  { %v411_v17 = vadd.f32 %v1284_v32, %v410_v14  ;;  %v74_v14 = vld [vmem:[%s1826_s0 + $0x1e0] sm:$0xff] }
  0xe9   :  { %824 = vst.msk [vmem:[%s1828_s3 + $0x138] sm:$0xff] %vm784_vm1, %v710_v13  ;;  %550 = vmatmul.f32.gmra.mxu2 %v126_v12 }
  0xea   :  { %v620_v18 = vadd.f32 %v619_v60, %v411_v17  ;;  %457 = vmatmul.f32.gmra.mxu0 %v64_v15  ;;  %912 = vmatmul.msk.f32.gmra.mxu3 %vm173_vm0, %v133_v16  ;;  %v75_v60 = vld [vmem:[%s1826_s0 + $0x1e8] sm:$0xff] }
  0xec   :  { %794 = vst.msk [vmem:[%s1828_s3 + $0x48] sm:$0xff] %vm784_vm1, %v620_v18  ;;  %v503_v19 = vpop.f32.mrf.mxu2  ;;  %v625_v20 = vpop.f32.mrf.mxu1 }
  0xed   :  { %v504_v22 = vadd.f32 %v1284_v32, %v503_v19  ;;  %v721_v23 = vpop.f32.mrf.mxu3  ;;  %v79_v19 = vld [vmem:[%s1826_s0 + $0x208] sm:$0xff] }
  0xef   :  { %v713_v25 = vadd.f32 %v712_v51, %v504_v22  ;;  %880 = vmatmul.msk.f32.gmra.mxu1 %vm173_vm0, %v69_v21  ;;  %v413_v26 = vpop.f32.mrf.mxu0  ;;  %v132_v51 = vld [vmem:[%s1826_s0 + $0x3b0] sm:$0xff]  ;;  %v138_v22 = vld [vmem:[%s1826_s0 + $0x3e0] sm:$0xff] }
  0xf0   :  { %v414_v29 = vadd.f32 %v1284_v32, %v413_v26 }
  0xf1   :  { %825 = vst.msk [vmem:[%s1828_s3 + $0x140] sm:$0xff] %vm784_vm1, %v713_v25  ;;  %553 = vmatmul.f32.gmra.mxu2 %v128_v24 }
  0xf2   :  { %v623_v30 = vadd.f32 %v622_v8, %v414_v29  ;;  %460 = vmatmul.f32.gmra.mxu0 %v66_v27  ;;  %913 = vmatmul.msk.f32.gmra.mxu3 %vm173_vm0, %v135_v28  ;;  %v77_v8 = vld [vmem:[%s1826_s0 + $0x1f8] sm:$0xff] }
  0xf4   :  { %795 = vst.msk [vmem:[%s1828_s3 + $0x50] sm:$0xff] %vm784_vm1, %v623_v30  ;;  %v506_v31 = vpop.f32.mrf.mxu2  ;;  %v628_v33 = vpop.f32.mrf.mxu1 }
  0xf5   :  { %v507_v35 = vadd.f32 %v1284_v32, %v506_v31  ;;  %v724_v36 = vpop.f32.mrf.mxu3  ;;  %v140_v31 = vld [vmem:[%s1826_s0 + $0x3f0] sm:$0xff] }
  0xf7   :  { %v716_v38 = vadd.f32 %v715_v63, %v507_v35  ;;  %881 = vmatmul.msk.f32.gmra.mxu1 %vm173_vm0, %v71_v34  ;;  %v416_v39 = vpop.f32.mrf.mxu0  ;;  %v134_v63 = vld [vmem:[%s1826_s0 + $0x3c0] sm:$0xff] }
  0xf8   :  { %v417_v43 = vadd.f32 %v1284_v32, %v416_v39 }
  0xf9   :  { %826 = vst.msk [vmem:[%s1828_s3 + $0x148] sm:$0xff] %vm784_vm1, %v716_v38  ;;  %556 = vmatmul.f32.gmra.mxu2 %v130_v37 }
  0xfa   :  { %v626_v44 = vadd.f32 %v625_v20, %v417_v43  ;;  %463 = vmatmul.f32.gmra.mxu0 %v68_v41  ;;  %914 = vmatmul.msk.f32.gmra.mxu3 %vm173_vm0, %v137_v42 }
  0xfc   :  { %796 = vst.msk [vmem:[%s1828_s3 + $0x58] sm:$0xff] %vm784_vm1, %v626_v44  ;;  %v509_v45 = vpop.f32.mrf.mxu2  ;;  %v631_v46 = vpop.f32.mrf.mxu1 }
  0xfd   :  { %v510_v48 = vadd.f32 %v1284_v32, %v509_v45  ;;  %v727_v49 = vpop.f32.mrf.mxu3 }
  0xff   :  { %v719_v52 = vadd.f32 %v718_v11, %v510_v48  ;;  %882 = vmatmul.msk.f32.gmra.mxu1 %vm173_vm0, %v73_v47  ;;  %v419_v53 = vpop.f32.mrf.mxu0  ;;  %v136_v11 = vld [vmem:[%s1826_s0 + $0x3d0] sm:$0xff] }
 0x100   :  { %v420_v56 = vadd.f32 %v1284_v32, %v419_v53 }
 0x101   :  { %827 = vst.msk [vmem:[%s1828_s3 + $0x150] sm:$0xff] %vm784_vm1, %v719_v52  ;;  %559 = vmatmul.f32.gmra.mxu2 %v132_v51 }
 0x102   :  { %v629_v57 = vadd.f32 %v628_v33, %v420_v56  ;;  %466 = vmatmul.f32.gmra.mxu0 %v70_v54  ;;  %915 = vmatmul.msk.f32.gmra.mxu3 %vm173_vm0, %v139_v55 }
 0x104   :  { %797 = vst.msk [vmem:[%s1828_s3 + $0x60] sm:$0xff] %vm784_vm1, %v629_v57  ;;  %v512_v58 = vpop.f32.mrf.mxu2  ;;  %v634_v59 = vpop.f32.mrf.mxu1 }
 0x105   :  { %v513_v61 = vadd.f32 %v1284_v32, %v512_v58  ;;  %v730_v62 = vpop.f32.mrf.mxu3 }
 0x107   :  { %v722_v0 = vadd.f32 %v721_v23, %v513_v61  ;;  %883 = vmatmul.msk.f32.gmra.mxu1 %vm173_vm0, %v75_v60  ;;  %v422_v1 = vpop.f32.mrf.mxu0 }
 0x108   :  { %v423_v4 = vadd.f32 %v1284_v32, %v422_v1 }
 0x109   :  { %828 = vst.msk [vmem:[%s1828_s3 + $0x158] sm:$0xff] %vm784_vm1, %v722_v0  ;;  %562 = vmatmul.f32.gmra.mxu2 %v134_v63 }
 0x10a   :  { %v632_v5 = vadd.f32 %v631_v46, %v423_v4  ;;  %469 = vmatmul.f32.gmra.mxu0 %v72_v2  ;;  %916 = vmatmul.msk.f32.gmra.mxu3 %vm173_vm0, %v141_v3 }
 0x10c   :  { %798 = vst.msk [vmem:[%s1828_s3 + $0x68] sm:$0xff] %vm784_vm1, %v632_v5  ;;  %v515_v6 = vpop.f32.mrf.mxu2  ;;  %v637_v7 = vpop.f32.mrf.mxu1 }
 0x10d   :  { %v516_v9 = vadd.f32 %v1284_v32, %v515_v6  ;;  %v733_v10 = vpop.f32.mrf.mxu3 }
 0x10f   :  { %v725_v12 = vadd.f32 %v724_v36, %v516_v9  ;;  %884 = vmatmul.msk.f32.gmra.mxu1 %vm173_vm0, %v77_v8  ;;  %v425_v13 = vpop.f32.mrf.mxu0 }
 0x110   :  { %v426_v15 = vadd.f32 %v1284_v32, %v425_v13 }
 0x111   :  { %829 = vst.msk [vmem:[%s1828_s3 + $0x160] sm:$0xff] %vm784_vm1, %v725_v12  ;;  %565 = vmatmul.f32.gmra.mxu2 %v136_v11 }
 0x112   :  { %v635_v16 = vadd.f32 %v634_v59, %v426_v15  ;;  %472 = vmatmul.f32.gmra.mxu0 %v74_v14 }
 0x114   :  { %799 = vst.msk [vmem:[%s1828_s3 + $0x70] sm:$0xff] %vm784_vm1, %v635_v16  ;;  %v518_v17 = vpop.f32.mrf.mxu2  ;;  %v640_v18 = vpop.f32.mrf.mxu1 }
 0x115   :  { %v519_v20 = vadd.f32 %v1284_v32, %v518_v17  ;;  %v736_v21 = vpop.f32.mrf.mxu3 }
 0x117   :  { %v728_v23 = vadd.f32 %v727_v49, %v519_v20  ;;  %885 = vmatmul.msk.f32.gmra.mxu1 %vm173_vm0, %v79_v19  ;;  %v428_v24 = vpop.f32.mrf.mxu0 }
 0x118   :  { %v429_v25 = vadd.f32 %v1284_v32, %v428_v24 }
 0x119   :  { %830 = vst.msk [vmem:[%s1828_s3 + $0x168] sm:$0xff] %vm784_vm1, %v728_v23  ;;  %568 = vmatmul.f32.gmra.mxu2 %v138_v22 }
 0x11a   :  { %v638_v26 = vadd.f32 %v637_v7, %v429_v25 }
 0x11c   :  { %800 = vst.msk [vmem:[%s1828_s3 + $0x78] sm:$0xff] %vm784_vm1, %v638_v26  ;;  %v521_v27 = vpop.f32.mrf.mxu2  ;;  %v643_v28 = vpop.f32.mrf.mxu1 }
 0x11d   :  { %v522_v29 = vadd.f32 %v1284_v32, %v521_v27  ;;  %v739_v30 = vpop.f32.mrf.mxu3 }
 0x11f   :  { %v731_v33 = vadd.f32 %v730_v62, %v522_v29  ;;  %v431_v34 = vpop.f32.mrf.mxu0 }
 0x120   :  { %v432_v35 = vadd.f32 %v1284_v32, %v431_v34 }
 0x121   :  { %831 = vst.msk [vmem:[%s1828_s3 + $0x170] sm:$0xff] %vm784_vm1, %v731_v33  ;;  %571 = vmatmul.f32.gmra.mxu2 %v140_v31 }
 0x122   :  { %v641_v36 = vadd.f32 %v640_v18, %v432_v35 }
 0x124   :  { %801 = vst.msk [vmem:[%s1828_s3 + $0x80] sm:$0xff] %vm784_vm1, %v641_v36  ;;  %v524_v37 = vpop.f32.mrf.mxu2  ;;  %v646_v38 = vpop.f32.mrf.mxu1 }
 0x125   :  { %v525_v39 = vadd.f32 %v1284_v32, %v524_v37  ;;  %v742_v41 = vpop.f32.mrf.mxu3 }
 0x127   :  { %v734_v42 = vadd.f32 %v733_v10, %v525_v39  ;;  %v434_v43 = vpop.f32.mrf.mxu0 }
 0x128   :  { %v435_v44 = vadd.f32 %v1284_v32, %v434_v43 }
 0x129   :  { %832 = vst.msk [vmem:[%s1828_s3 + $0x178] sm:$0xff] %vm784_vm1, %v734_v42 }
 0x12a   :  { %v644_v45 = vadd.f32 %v643_v28, %v435_v44 }
 0x12c   :  { %802 = vst.msk [vmem:[%s1828_s3 + $0x88] sm:$0xff] %vm784_vm1, %v644_v45  ;;  %v527_v46 = vpop.f32.mrf.mxu2  ;;  %v649_v47 = vpop.f32.mrf.mxu1 }
 0x12d   :  { %v528_v48 = vadd.f32 %v1284_v32, %v527_v46  ;;  %v745_v49 = vpop.f32.mrf.mxu3 }
 0x12f   :  { %v737_v51 = vadd.f32 %v736_v21, %v528_v48  ;;  %v437_v52 = vpop.f32.mrf.mxu0 }
 0x130   :  { %v438_v53 = vadd.f32 %v1284_v32, %v437_v52 }
 0x131   :  { %833 = vst.msk [vmem:[%s1828_s3 + $0x180] sm:$0xff] %vm784_vm1, %v737_v51 }
 0x132   :  { %v647_v54 = vadd.f32 %v646_v38, %v438_v53 }
 0x134   :  { %803 = vst.msk [vmem:[%s1828_s3 + $0x90] sm:$0xff] %vm784_vm1, %v647_v54  ;;  %v530_v55 = vpop.f32.mrf.mxu2  ;;  %v652_v56 = vpop.f32.mrf.mxu1 }
 0x135   :  { %v531_v57 = vadd.f32 %v1284_v32, %v530_v55  ;;  %v748_v58 = vpop.f32.mrf.mxu3 }
 0x137   :  { %v740_v59 = vadd.f32 %v739_v30, %v531_v57  ;;  %v440_v60 = vpop.f32.mrf.mxu0 }
 0x138   :  { %v441_v61 = vadd.f32 %v1284_v32, %v440_v60 }
 0x139   :  { %834 = vst.msk [vmem:[%s1828_s3 + $0x188] sm:$0xff] %vm784_vm1, %v740_v59 }
 0x13a   :  { %v650_v62 = vadd.f32 %v649_v47, %v441_v61 }
 0x13c   :  { %804 = vst.msk [vmem:[%s1828_s3 + $0x98] sm:$0xff] %vm784_vm1, %v650_v62  ;;  %v533_v63 = vpop.f32.mrf.mxu2  ;;  %v655_v0 = vpop.f32.mrf.mxu1 }
 0x13d   :  { %v534_v1 = vadd.f32 %v1284_v32, %v533_v63  ;;  %v751_v4 = vpop.f32.mrf.mxu3 }
 0x13f   :  { %v743_v2 = vadd.f32 %v742_v41, %v534_v1  ;;  %v443_v3 = vpop.f32.mrf.mxu0 }
 0x140   :  { %v444_v5 = vadd.f32 %v1284_v32, %v443_v3 }
 0x141   :  { %835 = vst.msk [vmem:[%s1828_s3 + $0x190] sm:$0xff] %vm784_vm1, %v743_v2 }
 0x142   :  { %v653_v6 = vadd.f32 %v652_v56, %v444_v5 }
 0x144   :  { %805 = vst.msk [vmem:[%s1828_s3 + $0xa0] sm:$0xff] %vm784_vm1, %v653_v6  ;;  %v536_v7 = vpop.f32.mrf.mxu2  ;;  %v658_v8 = vpop.f32.mrf.mxu1 }
 0x145   :  { %v537_v9 = vadd.f32 %v1284_v32, %v536_v7  ;;  %v754_v13 = vpop.f32.mrf.mxu3 }
 0x147   :  { %v746_v10 = vadd.f32 %v745_v49, %v537_v9  ;;  %v446_v11 = vpop.f32.mrf.mxu0 }
 0x148   :  { %v447_v12 = vadd.f32 %v1284_v32, %v446_v11 }
 0x149   :  { %836 = vst.msk [vmem:[%s1828_s3 + $0x198] sm:$0xff] %vm784_vm1, %v746_v10 }
 0x14a   :  { %v656_v14 = vadd.f32 %v655_v0, %v447_v12 }
 0x14c   :  { %806 = vst.msk [vmem:[%s1828_s3 + $0xa8] sm:$0xff] %vm784_vm1, %v656_v14  ;;  %v539_v15 = vpop.f32.mrf.mxu2  ;;  %v661_v16 = vpop.f32.mrf.mxu1 }
 0x14d   :  { %v540_v17 = vadd.f32 %v1284_v32, %v539_v15  ;;  %v757_v22 = vpop.f32.mrf.mxu3 }
 0x14f   :  { %v749_v18 = vadd.f32 %v748_v58, %v540_v17  ;;  %v449_v19 = vpop.f32.mrf.mxu0 }
 0x150   :  { %v450_v20 = vadd.f32 %v1284_v32, %v449_v19 }
 0x151   :  { %837 = vst.msk [vmem:[%s1828_s3 + $0x1a0] sm:$0xff] %vm784_vm1, %v749_v18 }
 0x152   :  { %v659_v21 = vadd.f32 %v658_v8, %v450_v20 }
 0x154   :  { %807 = vst.msk [vmem:[%s1828_s3 + $0xb0] sm:$0xff] %vm784_vm1, %v659_v21  ;;  %v542_v23 = vpop.f32.mrf.mxu2  ;;  %v664_v24 = vpop.f32.mrf.mxu1 }
 0x155   :  { %v543_v25 = vadd.f32 %v1284_v32, %v542_v23  ;;  %v760_v34 = vpop.f32.mrf.mxu3 }
 0x157   :  { %v752_v26 = vadd.f32 %v751_v4, %v543_v25  ;;  %v452_v27 = vpop.f32.mrf.mxu0  ;;  %v480_v25 = vadd.f32 %v1284_v32, %v1323_v50 }
 0x158   :  { %v453_v28 = vadd.f32 %v1284_v32, %v452_v27 }
 0x159   :  { %838 = vst.msk [vmem:[%s1828_s3 + $0x1a8] sm:$0xff] %vm784_vm1, %v752_v26 }
 0x15a   :  { %v662_v29 = vadd.f32 %v661_v16, %v453_v28  ;;  %v477_v16 = vadd.f32 %v1284_v32, %v1302_v40 }
 0x15c   :  { %808 = vst.msk [vmem:[%s1828_s3 + $0xb8] sm:$0xff] %vm784_vm1, %v662_v29  ;;  %v545_v30 = vpop.f32.mrf.mxu2  ;;  %v667_v31 = vpop.f32.mrf.mxu1 }
 0x15d   :  { %v546_v33 = vadd.f32 %v1284_v32, %v545_v30  ;;  %v763_v45 = vpop.f32.mrf.mxu3 }
 0x15f   :  { %v755_v35 = vadd.f32 %v754_v13, %v546_v33  ;;  %v455_v36 = vpop.f32.mrf.mxu0 }
 0x160   :  { %v456_v37 = vadd.f32 %v1284_v32, %v455_v36 }
 0x161   :  { %839 = vst.msk [vmem:[%s1828_s3 + $0x1b0] sm:$0xff] %vm784_vm1, %v755_v35 }
 0x162   :  { %v665_v38 = vadd.f32 %v664_v24, %v456_v37 }
 0x164   :  { %809 = vst.msk [vmem:[%s1828_s3 + $0xc0] sm:$0xff] %vm784_vm1, %v665_v38  ;;  %v548_v39 = vpop.f32.mrf.mxu2  ;;  %v670_v41 = vpop.f32.mrf.mxu1 }
 0x165   :  { %v549_v42 = vadd.f32 %v1284_v32, %v548_v39  ;;  %v766_v55 = vpop.f32.mrf.mxu3 }
 0x167   :  { %v758_v43 = vadd.f32 %v757_v22, %v549_v42  ;;  %v458_v44 = vpop.f32.mrf.mxu0 }
 0x168   :  { %v459_v46 = vadd.f32 %v1284_v32, %v458_v44 }
 0x169   :  { %840 = vst.msk [vmem:[%s1828_s3 + $0x1b8] sm:$0xff] %vm784_vm1, %v758_v43 }
 0x16a   :  { %v668_v47 = vadd.f32 %v667_v31, %v459_v46 }
 0x16c   :  { %810 = vst.msk [vmem:[%s1828_s3 + $0xc8] sm:$0xff] %vm784_vm1, %v668_v47  ;;  %v551_v48 = vpop.f32.mrf.mxu2  ;;  %v673_v49 = vpop.f32.mrf.mxu1 }
 0x16d   :  { %v552_v51 = vadd.f32 %v1284_v32, %v551_v48  ;;  %v769_v0 = vpop.f32.mrf.mxu3 }
 0x16f   :  { %v761_v52 = vadd.f32 %v760_v34, %v552_v51  ;;  %v461_v53 = vpop.f32.mrf.mxu0 }
 0x170   :  { %v462_v54 = vadd.f32 %v1284_v32, %v461_v53 }
 0x171   :  { %841 = vst.msk [vmem:[%s1828_s3 + $0x1c0] sm:$0xff] %vm784_vm1, %v761_v52 }
 0x172   :  { %v671_v56 = vadd.f32 %v670_v41, %v462_v54 }
 0x174   :  { %811 = vst.msk [vmem:[%s1828_s3 + $0xd0] sm:$0xff] %vm784_vm1, %v671_v56  ;;  %v554_v57 = vpop.f32.mrf.mxu2  ;;  %v676_v58 = vpop.f32.mrf.mxu1 }
 0x175   :  { %v555_v59 = vadd.f32 %v1284_v32, %v554_v57  ;;  %v772_v11 = vpop.f32.mrf.mxu3 }
 0x177   :  { %v764_v60 = vadd.f32 %v763_v45, %v555_v59  ;;  %v464_v61 = vpop.f32.mrf.mxu0 }
 0x178   :  { %v465_v62 = vadd.f32 %v1284_v32, %v464_v61 }
 0x179   :  { %842 = vst.msk [vmem:[%s1828_s3 + $0x1c8] sm:$0xff] %vm784_vm1, %v764_v60 }
 0x17a   :  { %v674_v63 = vadd.f32 %v673_v49, %v465_v62 }
 0x17c   :  { %812 = vst.msk [vmem:[%s1828_s3 + $0xd8] sm:$0xff] %vm784_vm1, %v674_v63  ;;  %v557_v1 = vpop.f32.mrf.mxu2  ;;  %v679_v2 = vpop.f32.mrf.mxu1 }
 0x17d   :  { %v558_v3 = vadd.f32 %v1284_v32, %v557_v1  ;;  %v775_v40 = vpop.f32.mrf.mxu3 }
 0x17f   :  { %v767_v4 = vadd.f32 %v766_v55, %v558_v3  ;;  %v467_v5 = vpop.f32.mrf.mxu0 }
 0x180   :  { %v468_v6 = vadd.f32 %v1284_v32, %v467_v5 }
 0x181   :  { %843 = vst.msk [vmem:[%s1828_s3 + $0x1d0] sm:$0xff] %vm784_vm1, %v767_v4 }
 0x182   :  { %v677_v7 = vadd.f32 %v676_v58, %v468_v6 }
 0x184   :  { %813 = vst.msk [vmem:[%s1828_s3 + $0xe0] sm:$0xff] %vm784_vm1, %v677_v7  ;;  %v560_v8 = vpop.f32.mrf.mxu2  ;;  %v682_v9 = vpop.f32.mrf.mxu1 }
 0x185   :  { %v561_v10 = vadd.f32 %v1284_v32, %v560_v8  ;;  %v778_v50 = vpop.f32.mrf.mxu3 }
 0x187   :  { %v770_v12 = vadd.f32 %v769_v0, %v561_v10  ;;  %v470_v13 = vpop.f32.mrf.mxu0 }
 0x188   :  { %v471_v14 = vadd.f32 %v1284_v32, %v470_v13 }
 0x189   :  { %844 = vst.msk [vmem:[%s1828_s3 + $0x1d8] sm:$0xff] %vm784_vm1, %v770_v12 }
 0x18a   :  { %v680_v15 = vadd.f32 %v679_v2, %v471_v14 }
 0x18c   :  { %814 = vst.msk [vmem:[%s1828_s3 + $0xe8] sm:$0xff] %vm784_vm1, %v680_v15  ;;  %v563_v17 = vpop.f32.mrf.mxu2  ;;  %v685_v18 = vpop.f32.mrf.mxu1 }
 0x18d   :  { %v564_v19 = vadd.f32 %v1284_v32, %v563_v17  ;;  %v686_v20 = vadd.f32 %v685_v18, %v477_v16  ;;  %v781_v36 = vpop.f32.mrf.mxu3 }
 0x18f   :  { %816 = vst.msk [vmem:[%s1828_s3 + $0xf8] sm:$0xff] %vm784_vm1, %v686_v20  ;;  %v773_v21 = vadd.f32 %v772_v11, %v564_v19  ;;  %v473_v22 = vpop.f32.mrf.mxu0 }
 0x190   :  { %v474_v23 = vadd.f32 %v1284_v32, %v473_v22 }
 0x191   :  { %845 = vst.msk [vmem:[%s1828_s3 + $0x1e0] sm:$0xff] %vm784_vm1, %v773_v21 }
 0x192   :  { %v683_v24 = vadd.f32 %v682_v9, %v474_v23 }
 0x194   :  { %815 = vst.msk [vmem:[%s1828_s3 + $0xf0] sm:$0xff] %vm784_vm1, %v683_v24  ;;  %v566_v26 = vpop.f32.mrf.mxu2  ;;  %v688_v27 = vpop.f32.mrf.mxu1 }
 0x195   :  { %v567_v28 = vadd.f32 %v1284_v32, %v566_v26  ;;  %v689_v29 = vadd.f32 %v688_v27, %v480_v25 }
 0x197   :  { %817 = vst.msk [vmem:[%s1828_s3 + $0x100] sm:$0xff] %vm784_vm1, %v689_v29  ;;  %v776_v30 = vadd.f32 %v775_v40, %v567_v28 }
 0x199   :  { %846 = vst.msk [vmem:[%s1828_s3 + $0x1e8] sm:$0xff] %vm784_vm1, %v776_v30 }
 0x19c   :  { %v569_v31 = vpop.f32.mrf.mxu2 }
 0x19d   :  { %v570_v33 = vadd.f32 %v1284_v32, %v569_v31 }
 0x19f   :  { %v779_v34 = vadd.f32 %v778_v50, %v570_v33 }
 0x1a1   :  { %847 = vst.msk [vmem:[%s1828_s3 + $0x1f0] sm:$0xff] %vm784_vm1, %v779_v34 }
 0x1a4   :  { %v572_v35 = vpop.f32.mrf.mxu2 }
 0x1a5   :  { %v573_v37 = vadd.f32 %v1284_v32, %v572_v35 }
 0x1a7   :  { %v782_v38 = vadd.f32 %v781_v36, %v573_v37 }
 0x1a9   :  { %848 = vst.msk [vmem:[%s1828_s3 + $0x1f8] sm:$0xff] %vm784_vm1, %v782_v38 }

</bundles_post_ra>
